<compile_context>
chip_gen: v6e
topology: v6e:2x2x1
jax: 0.10.0
libtpu: 0.0.40
codegen_flags: <defaults>
</compile_context>

<pallas_src>
import functools

import jax
import jax.numpy as jnp
from jax import lax
from jax.experimental import pallas as pl
from jax.experimental.pallas import tpu as pltpu

_MXU_DTYPE = jnp.bfloat16          # MXU-native; accumulation stays f32
_LANES = 128                       # vreg lane width: channel dim padded to this
_VMEM_LIMIT = 48 * 1024 * 1024     # < physical on v5e/v6e (128 MiB) and v7x (64 MiB)


def _round_up(x, m):
    return (x + m - 1) // m * m


def _cparams(semantics):
    return pltpu.CompilerParams(dimension_semantics=semantics,
                                vmem_limit_bytes=_VMEM_LIMIT)


# --------------------------- in-kernel conv helpers ---------------------------

def _sepconv_taps(z, w_ref, *, K, stride, oh, ow):
    """Fused depthwise+pointwise conv as K*K MXU matmuls (tiny channel count path).

    z: (1, Hp, Wp, C) f32 padded activations; w_ref: (K*K, C, Cp) bf16.
    Returns (oh*ow, Cp) f32 accumulator.
    """
    cp = w_ref.shape[-1]
    acc = jnp.zeros((oh * ow, cp), jnp.float32)
    for ki in range(K):                       # static unroll
        for kj in range(K):
            patch = z[0,
                      ki:ki + (oh - 1) * stride + 1:stride,
                      kj:kj + (ow - 1) * stride + 1:stride, :]       # (oh, ow, C)
            acc = acc + jnp.dot(
                patch.reshape(oh * ow, -1).astype(_MXU_DTYPE),
                w_ref[ki * K + kj],
                preferred_element_type=jnp.float32)
    return acc


def _sepconv_im2col(z, w_ref, *, K, stride, oh, ow):
    """Fused depthwise+pointwise conv as ONE im2col MXU matmul.

    z: (1, Hp, Wp, C) f32 with C a multiple of 128 (lane-aligned concat);
    w_ref: (K*K*C, Cp) bf16.  Contraction depth K*K*C fills the 256-deep MXU.
    """
    cols = []
    for ki in range(K):
        for kj in range(K):
            patch = z[0,
                      ki:ki + (oh - 1) * stride + 1:stride,
                      kj:kj + (ow - 1) * stride + 1:stride, :]       # (oh, ow, C)
            cols.append(patch.reshape(oh * ow, -1))
    pm = jnp.concatenate(cols, axis=-1).astype(_MXU_DTYPE)           # (oh*ow, K*K*C)
    return jnp.dot(pm, w_ref[...], preferred_element_type=jnp.float32)


def _store_stats(st_ref, acc):
    # one-pass BN statistics: per-channel sum and sum-of-squares of this tile (f32)
    st_ref[:, 0:1, :] = jnp.sum(acc, axis=0, keepdims=True)[None]
    st_ref[:, 1:2, :] = jnp.sum(acc * acc, axis=0, keepdims=True)[None]


# --------------------------------- kernels ------------------------------------

def _block1_kernel(x_ref, w_ref, y_ref, st_ref, zpad_ref, *, K, stride, oh, ow, p):
    # ReLU -> in-kernel zero halo (no XLA pad pass) -> separable_1 on the MXU.
    zpad_ref[...] = jnp.zeros_like(zpad_ref)
    h, w = x_ref.shape[1], x_ref.shape[2]
    zpad_ref[:, p:p + h, p:p + w, :] = jnp.maximum(x_ref[...], 0.0)
    acc = _sepconv_taps(zpad_ref[...], w_ref, K=K, stride=stride, oh=oh, ow=ow)
    y_ref[...] = acc.reshape(1, oh, ow, -1).astype(y_ref.dtype)      # bf16 to HBM
    _store_stats(st_ref, acc)


def _block2_kernel(y1_ref, a_ref, b_ref, w_ref, y_ref, st_ref, zpad_ref, *,
                   K, oh, ow, p):
    # BN1 affine + ReLU fused here (no extra HBM pass over y1), exact-zero halo via
    # scratch, then separable_2 as a single 1152-deep im2col MXU matmul.
    zpad_ref[...] = jnp.zeros_like(zpad_ref)
    h, w = y1_ref.shape[1], y1_ref.shape[2]
    v = jnp.maximum(y1_ref[...].astype(jnp.float32) * a_ref[...] + b_ref[...], 0.0)
    zpad_ref[:, p:p + h, p:p + w, :] = v
    acc = _sepconv_im2col(zpad_ref[...], w_ref, K=K, stride=1, oh=oh, ow=ow)
    y_ref[...] = acc[None].astype(y_ref.dtype)                       # bf16 to HBM
    _store_stats(st_ref, acc)


def _bn_out_kernel(y_ref, a_ref, b_ref, o_ref, *, cout):
    # BN2 affine + channel un-pad + NHWC->NCHW fused: XLU transpose, lane-dense
    # (spatial-last) output block so stores stay unmasked and no dead lanes hit HBM.
    v = y_ref[...][0].astype(jnp.float32) * a_ref[...] + b_ref[...]  # (S, Cp)
    o_ref[...] = jnp.transpose(v, (1, 0))[None, :cout, :]            # (1, Cout, S)


def _bn_affine(stats, gamma, beta, count, eps):
    """Fold training-mode BatchNorm (batch stats, biased var) into scale/shift."""
    s = jnp.sum(stats[:, 0, :], axis=0)
    ss = jnp.sum(stats[:, 1, :], axis=0)
    mean = s / count
    var = jnp.maximum(ss / count - mean * mean, 0.0)
    a = gamma * lax.rsqrt(var + eps)
    b = beta - mean * a
    return (a.reshape(1, -1).astype(jnp.float32),
            b.reshape(1, -1).astype(jnp.float32))


# --------------------------------- wrapper ------------------------------------

@functools.partial(jax.jit, static_argnames=("stride", "padding", "eps"))
def branch_separables_stem(x_nchw, params, *, stride, padding, eps=1e-3):
    """Forward pass of BranchSeparablesStem (NCHW in / NCHW out)."""
    x = jnp.transpose(x_nchw, (0, 2, 3, 1)).astype(jnp.float32)      # NCHW -> NHWC
    N, H, W, Cin = x.shape
    dw1, pw1 = params["dw1"], params["pw1"]
    dw2, pw2 = params["dw2"], params["pw2"]
    K = dw1.shape[0]
    Cout = pw1.shape[1]
    Cp = _round_up(Cout, _LANES)
    p = padding

    OH1 = (H + 2 * p - K) // stride + 1
    OW1 = (W + 2 * p - K) // stride + 1
    OH2 = OH1 + 2 * p - K + 1
    OW2 = OW1 + 2 * p - K + 1

    # fused depthwise*pointwise weights (a single linear map), bf16, Cout padded to Cp
    wf1 = dw1.reshape(K * K, Cin, 1) * pw1.reshape(1, Cin, Cout)        # (K*K,Cin,Cout)
    wf1 = jnp.pad(wf1, ((0, 0), (0, 0), (0, Cp - Cout))).astype(_MXU_DTYPE)
    wf2 = dw2.reshape(K * K, Cout, 1) * pw2.reshape(1, Cout, Cout)      # (K*K,Cout,Cout)
    wf2 = jnp.pad(wf2, ((0, 0), (0, Cp - Cout), (0, Cp - Cout)))
    wf2 = wf2.reshape(K * K * Cp, Cp).astype(_MXU_DTYPE)                # im2col layout

    gamma1 = jnp.pad(params["gamma1"], (0, Cp - Cout), constant_values=1.0)
    beta1 = jnp.pad(params["beta1"], (0, Cp - Cout))
    gamma2 = jnp.pad(params["gamma2"], (0, Cp - Cout), constant_values=1.0)
    beta2 = jnp.pad(params["beta2"], (0, Cp - Cout))

    # ----- kernel 1: relu -> sepconv1 (MXU) + BN1 partial stats (grid over batch) ----
    y1, st1 = pl.pallas_call(
        functools.partial(_block1_kernel, K=K, stride=stride, oh=OH1, ow=OW1, p=p),
        out_shape=[jax.ShapeDtypeStruct((N, OH1, OW1, Cp), jnp.bfloat16),
                   jax.ShapeDtypeStruct((N, 2, Cp), jnp.float32)],
        grid=(N,),
        in_specs=[pl.BlockSpec((1, H, W, Cin), lambda n: (n, 0, 0, 0)),
                  pl.BlockSpec((K * K, Cin, Cp), lambda n: (0, 0, 0))],
        out_specs=[pl.BlockSpec((1, OH1, OW1, Cp), lambda n: (n, 0, 0, 0)),
                   pl.BlockSpec((1, 2, Cp), lambda n: (n, 0, 0))],
        scratch_shapes=[pltpu.VMEM((1, H + 2 * p, W + 2 * p, Cin), jnp.float32)],
        compiler_params=_cparams(("parallel",)),
    )(x, wf1)

    a1, b1 = _bn_affine(st1, gamma1, beta1, N * OH1 * OW1, eps)

    # ----- kernel 2: (BN1 affine + relu fused) -> sepconv2 + BN2 partial stats -------
    y2, st2 = pl.pallas_call(
        functools.partial(_block2_kernel, K=K, oh=OH2, ow=OW2, p=p),
        out_shape=[jax.ShapeDtypeStruct((N, OH2 * OW2, Cp), jnp.bfloat16),
                   jax.ShapeDtypeStruct((N, 2, Cp), jnp.float32)],
        grid=(N,),
        in_specs=[pl.BlockSpec((1, OH1, OW1, Cp), lambda n: (n, 0, 0, 0)),
                  pl.BlockSpec((1, Cp), lambda n: (0, 0)),
                  pl.BlockSpec((1, Cp), lambda n: (0, 0)),
                  pl.BlockSpec((K * K * Cp, Cp), lambda n: (0, 0))],
        out_specs=[pl.BlockSpec((1, OH2 * OW2, Cp), lambda n: (n, 0, 0)),
                   pl.BlockSpec((1, 2, Cp), lambda n: (n, 0, 0))],
        scratch_shapes=[pltpu.VMEM((1, OH1 + 2 * p, OW1 + 2 * p, Cp), jnp.float32)],
        compiler_params=_cparams(("parallel",)),
    )(y1, a1, b1, wf2)

    a2, b2 = _bn_affine(st2, gamma2, beta2, N * OH2 * OW2, eps)

    # ----- kernel 3: BN2 affine + channel un-pad + NHWC->NCHW (fused epilogue) -------
    out = pl.pallas_call(
        functools.partial(_bn_out_kernel, cout=Cout),
        out_shape=jax.ShapeDtypeStruct((N, Cout, OH2 * OW2), jnp.float32),
        grid=(N,),
        in_specs=[pl.BlockSpec((1, OH2 * OW2, Cp), lambda n: (n, 0, 0)),
                  pl.BlockSpec((1, Cp), lambda n: (0, 0)),
                  pl.BlockSpec((1, Cp), lambda n: (0, 0))],
        out_specs=pl.BlockSpec((1, Cout, OH2 * OW2), lambda n: (n, 0, 0)),
        compiler_params=_cparams(("parallel",)),
    )(y2, a2, b2)

    return out.reshape(N, Cout, OH2, OW2)                             # already NCHW


def init_params(key, in_channels, out_channels, kernel_size):
    ks = jax.random.split(key, 8)
    K = kernel_size
    return {
        # separable_1: depthwise (Cin groups) + pointwise Cin->Cout
        "dw1": 0.1 * jax.random.normal(ks[0], (K, K, in_channels), jnp.float32),
        "pw1": 0.1 * jax.random.normal(ks[1], (in_channels, out_channels), jnp.float32),
        "gamma1": 1.0 + 0.1 * jax.random.normal(ks[2], (out_channels,), jnp.float32),
        "beta1": 0.1 * jax.random.normal(ks[3], (out_channels,), jnp.float32),
        # separable_2: depthwise (Cout groups) + pointwise Cout->Cout
        "dw2": 0.1 * jax.random.normal(ks[4], (K, K, out_channels), jnp.float32),
        "pw2": 0.1 * jax.random.normal(ks[5], (out_channels, out_channels), jnp.float32),
        "gamma2": 1.0 + 0.1 * jax.random.normal(ks[6], (out_channels,), jnp.float32),
        "beta2": 0.1 * jax.random.normal(ks[7], (out_channels,), jnp.float32),
    }


# ---- plain-JAX reference (for correctness check only) ----
def _ref_block(x, dw_w, pw_w, gamma, beta, *, stride, padding, eps=1e-3):
    x = jax.nn.relu(x)
    K, _, Cin = dw_w.shape
    Cout = pw_w.shape[1]
    dw_out = lax.conv_general_dilated(
        x, dw_w.reshape(K, K, 1, Cin),
        window_strides=(stride, stride),
        padding=[(padding, padding), (padding, padding)],
        dimension_numbers=("NHWC", "HWIO", "NHWC"),
        feature_group_count=Cin)
    pw_out = lax.conv_general_dilated(
        dw_out, pw_w.reshape(1, 1, Cin, Cout),
        window_strides=(1, 1), padding="VALID",
        dimension_numbers=("NHWC", "HWIO", "NHWC"))
    mean = jnp.mean(pw_out, axis=(0, 1, 2))
    var = jnp.mean((pw_out - mean) ** 2, axis=(0, 1, 2))
    return (pw_out - mean) / jnp.sqrt(var + eps) * gamma + beta


if __name__ == "__main__":
    in_channels, out_channels = 4, 8
    kernel_size, stride, padding = 3, 1, 1

    key = jax.random.PRNGKey(0)
    kx, kp = jax.random.split(key)
    x = jax.random.normal(kx, (2, in_channels, 16, 16), jnp.float32)
    params = init_params(kp, in_channels, out_channels, kernel_size)

    out = branch_separables_stem(x, params, stride=stride, padding=padding)
    out = jax.block_until_ready(out)

    # reference check (bf16 MXU/intermediates -> loosened tolerance)
    xr = jnp.transpose(x, (0, 2, 3, 1))
    r = _ref_block(xr, params["dw1"], params["pw1"], params["gamma1"],
                   params["beta1"], stride=stride, padding=padding)
    r = _ref_block(r, params["dw2"], params["pw2"], params["gamma2"],
                   params["beta2"], stride=1, padding=padding)
    r = jnp.transpose(r, (0, 3, 1, 2))

    assert out.shape == (2, out_channels, 16, 16), out.shape
    err = float(jnp.max(jnp.abs(out - r)))
    assert jnp.allclose(out, r, atol=5e-2, rtol=5e-2), err
    print("KERNEL_OK")
</pallas_src>

<mosaic_0001>
module attributes {stable_mosaic.version = 11 : i64} {
  func.func @_block1_kernel(%arg0: i32, %arg1: memref<1x16x16x4xf32, #tpu.memory_space<vmem>>, %arg2: memref<9x4x128xbf16, #tpu.memory_space<vmem>>, %arg3: memref<1x16x16x128xbf16, #tpu.memory_space<vmem>>, %arg4: memref<1x2x128xf32, #tpu.memory_space<vmem>>, %arg5: memref<1x18x18x4xf32, #tpu.memory_space<vmem>>) attributes {dimension_semantics = [#tpu.dimension_semantics<parallel>], iteration_bounds = array<i64: 2>, scalar_prefetch = 0 : i64, scratch_operands = 1 : i64, tpu.core_type = #tpu.core_type<tc>, window_params = [{transform_indices = @transform_0, window_bounds = array<i64: 1, 16, 16, 4>}, {pipeline_mode = #tpu.pipeline_mode<synchronous>, transform_indices = @transform_1, window_bounds = array<i64: 9, 4, 128>}, {transform_indices = @transform_2, window_bounds = array<i64: 1, 16, 16, 128>}, {transform_indices = @transform_3, window_bounds = array<i64: 1, 2, 128>}]} {
    %cst = arith.constant 0.000000e+00 : f32
    %0 = vector.broadcast %cst : f32 to vector<1x18x18x4xf32>
    %c0 = arith.constant 0 : index
    %c0_0 = arith.constant 0 : index
    %c0_1 = arith.constant 0 : index
    %c0_2 = arith.constant 0 : index
    %1 = vector.load %arg5[%c0, %c0_0, %c0_1, %c0_2] : memref<1x18x18x4xf32, #tpu.memory_space<vmem>>, vector<1x18x18x4xf32>
    tpu.vector_store %arg5[%c0, %c0_0, %c0_1, %c0_2], %0 {strides = array<i32>} : memref<1x18x18x4xf32, #tpu.memory_space<vmem>>, vector<1x18x18x4xf32>,
    %c0_3 = arith.constant 0 : index
    %c0_4 = arith.constant 0 : index
    %c0_5 = arith.constant 0 : index
    %c0_6 = arith.constant 0 : index
    %2 = vector.load %arg1[%c0_3, %c0_4, %c0_5, %c0_6] : memref<1x16x16x4xf32, #tpu.memory_space<vmem>>, vector<1x16x16x4xf32>
    %cst_7 = arith.constant 0.000000e+00 : f32
    %3 = vector.broadcast %cst_7 : f32 to vector<1x16x16x4xf32>
    %4 = arith.maximumf %2, %3 : vector<1x16x16x4xf32>
    %c0_8 = arith.constant 0 : index
    %c1 = arith.constant 1 : index
    %c1_9 = arith.constant 1 : index
    %c0_10 = arith.constant 0 : index
    %5 = vector.load %arg5[%c0_8, %c1, %c1_9, %c0_10] : memref<1x18x18x4xf32, #tpu.memory_space<vmem>>, vector<1x16x16x4xf32>
    tpu.vector_store %arg5[%c0_8, %c1, %c1_9, %c0_10], %4 {strides = array<i32>} : memref<1x18x18x4xf32, #tpu.memory_space<vmem>>, vector<1x16x16x4xf32>,
    %c0_11 = arith.constant 0 : index
    %c0_12 = arith.constant 0 : index
    %c0_13 = arith.constant 0 : index
    %c0_14 = arith.constant 0 : index
    %6 = vector.load %arg5[%c0_11, %c0_12, %c0_13, %c0_14] : memref<1x18x18x4xf32, #tpu.memory_space<vmem>>, vector<1x18x18x4xf32>
    %cst_15 = arith.constant 0.000000e+00 : f32
    %7 = vector.broadcast %cst_15 : f32 to vector<256x128xf32>
    %8 = vector.extract_strided_slice %6 {offsets = [0, 0, 0, 0], sizes = [1, 16, 16, 4], strides = [1, 1, 1, 1]} : vector<1x18x18x4xf32> to vector<1x16x16x4xf32>
    %9 = vector.shape_cast %8 : vector<1x16x16x4xf32> to vector<16x16x4xf32>
    %10 = vector.shape_cast %9 : vector<16x16x4xf32> to vector<256x4xf32>
    %11 = arith.truncf %10 : vector<256x4xf32> to vector<256x4xbf16>
    %c0_16 = arith.constant 0 : index
    %c0_17 = arith.constant 0 : index
    %c0_18 = arith.constant 0 : index
    %12 = vector.load %arg2[%c0_16, %c0_17, %c0_18] : memref<9x4x128xbf16, #tpu.memory_space<vmem>>, vector<1x4x128xbf16>
    %13 = vector.shape_cast %12 : vector<1x4x128xbf16> to vector<4x128xbf16>
    %cst_19 = arith.constant dense<0.000000e+00> : vector<256x128xf32>
    %14 = tpu.matmul %11, %13, %cst_19 {dimension_numbers = #tpu.dot_dimension_numbers<[1], [0], [0], [1], [0, 0, 1, 1], [], []>} : vector<256x4xbf16>, vector<4x128xbf16>, vector<256x128xf32> -> vector<256x128xf32>
    %15 = arith.addf %7, %14 : vector<256x128xf32>
    %16 = vector.extract_strided_slice %6 {offsets = [0, 0, 1, 0], sizes = [1, 16, 16, 4], strides = [1, 1, 1, 1]} : vector<1x18x18x4xf32> to vector<1x16x16x4xf32>
    %17 = vector.shape_cast %16 : vector<1x16x16x4xf32> to vector<16x16x4xf32>
    %18 = vector.shape_cast %17 : vector<16x16x4xf32> to vector<256x4xf32>
    %19 = arith.truncf %18 : vector<256x4xf32> to vector<256x4xbf16>
    %c1_20 = arith.constant 1 : index
    %c0_21 = arith.constant 0 : index
    %c0_22 = arith.constant 0 : index
    %20 = vector.load %arg2[%c1_20, %c0_21, %c0_22] : memref<9x4x128xbf16, #tpu.memory_space<vmem>>, vector<1x4x128xbf16>
    %21 = vector.shape_cast %20 : vector<1x4x128xbf16> to vector<4x128xbf16>
    %cst_23 = arith.constant dense<0.000000e+00> : vector<256x128xf32>
    %22 = tpu.matmul %19, %21, %cst_23 {dimension_numbers = #tpu.dot_dimension_numbers<[1], [0], [0], [1], [0, 0, 1, 1], [], []>} : vector<256x4xbf16>, vector<4x128xbf16>, vector<256x128xf32> -> vector<256x128xf32>
    %23 = arith.addf %15, %22 : vector<256x128xf32>
    %24 = vector.extract_strided_slice %6 {offsets = [0, 0, 2, 0], sizes = [1, 16, 16, 4], strides = [1, 1, 1, 1]} : vector<1x18x18x4xf32> to vector<1x16x16x4xf32>
    %25 = vector.shape_cast %24 : vector<1x16x16x4xf32> to vector<16x16x4xf32>
    %26 = vector.shape_cast %25 : vector<16x16x4xf32> to vector<256x4xf32>
    %27 = arith.truncf %26 : vector<256x4xf32> to vector<256x4xbf16>
    %c2 = arith.constant 2 : index
    %c0_24 = arith.constant 0 : index
    %c0_25 = arith.constant 0 : index
    %28 = vector.load %arg2[%c2, %c0_24, %c0_25] : memref<9x4x128xbf16, #tpu.memory_space<vmem>>, vector<1x4x128xbf16>
    %29 = vector.shape_cast %28 : vector<1x4x128xbf16> to vector<4x128xbf16>
    %cst_26 = arith.constant dense<0.000000e+00> : vector<256x128xf32>
    %30 = tpu.matmul %27, %29, %cst_26 {dimension_numbers = #tpu.dot_dimension_numbers<[1], [0], [0], [1], [0, 0, 1, 1], [], []>} : vector<256x4xbf16>, vector<4x128xbf16>, vector<256x128xf32> -> vector<256x128xf32>
    %31 = arith.addf %23, %30 : vector<256x128xf32>
    %32 = vector.extract_strided_slice %6 {offsets = [0, 1, 0, 0], sizes = [1, 16, 16, 4], strides = [1, 1, 1, 1]} : vector<1x18x18x4xf32> to vector<1x16x16x4xf32>
    %33 = vector.shape_cast %32 : vector<1x16x16x4xf32> to vector<16x16x4xf32>
    %34 = vector.shape_cast %33 : vector<16x16x4xf32> to vector<256x4xf32>
    %35 = arith.truncf %34 : vector<256x4xf32> to vector<256x4xbf16>
    %c3 = arith.constant 3 : index
    %c0_27 = arith.constant 0 : index
    %c0_28 = arith.constant 0 : index
    %36 = vector.load %arg2[%c3, %c0_27, %c0_28] : memref<9x4x128xbf16, #tpu.memory_space<vmem>>, vector<1x4x128xbf16>
    %37 = vector.shape_cast %36 : vector<1x4x128xbf16> to vector<4x128xbf16>
    %cst_29 = arith.constant dense<0.000000e+00> : vector<256x128xf32>
    %38 = tpu.matmul %35, %37, %cst_29 {dimension_numbers = #tpu.dot_dimension_numbers<[1], [0], [0], [1], [0, 0, 1, 1], [], []>} : vector<256x4xbf16>, vector<4x128xbf16>, vector<256x128xf32> -> vector<256x128xf32>
    %39 = arith.addf %31, %38 : vector<256x128xf32>
    %40 = vector.extract_strided_slice %6 {offsets = [0, 1, 1, 0], sizes = [1, 16, 16, 4], strides = [1, 1, 1, 1]} : vector<1x18x18x4xf32> to vector<1x16x16x4xf32>
    %41 = vector.shape_cast %40 : vector<1x16x16x4xf32> to vector<16x16x4xf32>
    %42 = vector.shape_cast %41 : vector<16x16x4xf32> to vector<256x4xf32>
    %43 = arith.truncf %42 : vector<256x4xf32> to vector<256x4xbf16>
    %c4 = arith.constant 4 : index
    %c0_30 = arith.constant 0 : index
    %c0_31 = arith.constant 0 : index
    %44 = vector.load %arg2[%c4, %c0_30, %c0_31] : memref<9x4x128xbf16, #tpu.memory_space<vmem>>, vector<1x4x128xbf16>
    %45 = vector.shape_cast %44 : vector<1x4x128xbf16> to vector<4x128xbf16>
    %cst_32 = arith.constant dense<0.000000e+00> : vector<256x128xf32>
    %46 = tpu.matmul %43, %45, %cst_32 {dimension_numbers = #tpu.dot_dimension_numbers<[1], [0], [0], [1], [0, 0, 1, 1], [], []>} : vector<256x4xbf16>, vector<4x128xbf16>, vector<256x128xf32> -> vector<256x128xf32>
    %47 = arith.addf %39, %46 : vector<256x128xf32>
    %48 = vector.extract_strided_slice %6 {offsets = [0, 1, 2, 0], sizes = [1, 16, 16, 4], strides = [1, 1, 1, 1]} : vector<1x18x18x4xf32> to vector<1x16x16x4xf32>
    %49 = vector.shape_cast %48 : vector<1x16x16x4xf32> to vector<16x16x4xf32>
    %50 = vector.shape_cast %49 : vector<16x16x4xf32> to vector<256x4xf32>
    %51 = arith.truncf %50 : vector<256x4xf32> to vector<256x4xbf16>
    %c5 = arith.constant 5 : index
    %c0_33 = arith.constant 0 : index
    %c0_34 = arith.constant 0 : index
    %52 = vector.load %arg2[%c5, %c0_33, %c0_34] : memref<9x4x128xbf16, #tpu.memory_space<vmem>>, vector<1x4x128xbf16>
    %53 = vector.shape_cast %52 : vector<1x4x128xbf16> to vector<4x128xbf16>
    %cst_35 = arith.constant dense<0.000000e+00> : vector<256x128xf32>
    %54 = tpu.matmul %51, %53, %cst_35 {dimension_numbers = #tpu.dot_dimension_numbers<[1], [0], [0], [1], [0, 0, 1, 1], [], []>} : vector<256x4xbf16>, vector<4x128xbf16>, vector<256x128xf32> -> vector<256x128xf32>
    %55 = arith.addf %47, %54 : vector<256x128xf32>
    %56 = vector.extract_strided_slice %6 {offsets = [0, 2, 0, 0], sizes = [1, 16, 16, 4], strides = [1, 1, 1, 1]} : vector<1x18x18x4xf32> to vector<1x16x16x4xf32>
    %57 = vector.shape_cast %56 : vector<1x16x16x4xf32> to vector<16x16x4xf32>
    %58 = vector.shape_cast %57 : vector<16x16x4xf32> to vector<256x4xf32>
    %59 = arith.truncf %58 : vector<256x4xf32> to vector<256x4xbf16>
    %c6 = arith.constant 6 : index
    %c0_36 = arith.constant 0 : index
    %c0_37 = arith.constant 0 : index
    %60 = vector.load %arg2[%c6, %c0_36, %c0_37] : memref<9x4x128xbf16, #tpu.memory_space<vmem>>, vector<1x4x128xbf16>
    %61 = vector.shape_cast %60 : vector<1x4x128xbf16> to vector<4x128xbf16>
    %cst_38 = arith.constant dense<0.000000e+00> : vector<256x128xf32>
    %62 = tpu.matmul %59, %61, %cst_38 {dimension_numbers = #tpu.dot_dimension_numbers<[1], [0], [0], [1], [0, 0, 1, 1], [], []>} : vector<256x4xbf16>, vector<4x128xbf16>, vector<256x128xf32> -> vector<256x128xf32>
    %63 = arith.addf %55, %62 : vector<256x128xf32>
    %64 = vector.extract_strided_slice %6 {offsets = [0, 2, 1, 0], sizes = [1, 16, 16, 4], strides = [1, 1, 1, 1]} : vector<1x18x18x4xf32> to vector<1x16x16x4xf32>
    %65 = vector.shape_cast %64 : vector<1x16x16x4xf32> to vector<16x16x4xf32>
    %66 = vector.shape_cast %65 : vector<16x16x4xf32> to vector<256x4xf32>
    %67 = arith.truncf %66 : vector<256x4xf32> to vector<256x4xbf16>
    %c7 = arith.constant 7 : index
    %c0_39 = arith.constant 0 : index
    %c0_40 = arith.constant 0 : index
    %68 = vector.load %arg2[%c7, %c0_39, %c0_40] : memref<9x4x128xbf16, #tpu.memory_space<vmem>>, vector<1x4x128xbf16>
    %69 = vector.shape_cast %68 : vector<1x4x128xbf16> to vector<4x128xbf16>
    %cst_41 = arith.constant dense<0.000000e+00> : vector<256x128xf32>
    %70 = tpu.matmul %67, %69, %cst_41 {dimension_numbers = #tpu.dot_dimension_numbers<[1], [0], [0], [1], [0, 0, 1, 1], [], []>} : vector<256x4xbf16>, vector<4x128xbf16>, vector<256x128xf32> -> vector<256x128xf32>
    %71 = arith.addf %63, %70 : vector<256x128xf32>
    %72 = vector.extract_strided_slice %6 {offsets = [0, 2, 2, 0], sizes = [1, 16, 16, 4], strides = [1, 1, 1, 1]} : vector<1x18x18x4xf32> to vector<1x16x16x4xf32>
    %73 = vector.shape_cast %72 : vector<1x16x16x4xf32> to vector<16x16x4xf32>
    %74 = vector.shape_cast %73 : vector<16x16x4xf32> to vector<256x4xf32>
    %75 = arith.truncf %74 : vector<256x4xf32> to vector<256x4xbf16>
    %c8 = arith.constant 8 : index
    %c0_42 = arith.constant 0 : index
    %c0_43 = arith.constant 0 : index
    %76 = vector.load %arg2[%c8, %c0_42, %c0_43] : memref<9x4x128xbf16, #tpu.memory_space<vmem>>, vector<1x4x128xbf16>
    %77 = vector.shape_cast %76 : vector<1x4x128xbf16> to vector<4x128xbf16>
    %cst_44 = arith.constant dense<0.000000e+00> : vector<256x128xf32>
    %78 = tpu.matmul %75, %77, %cst_44 {dimension_numbers = #tpu.dot_dimension_numbers<[1], [0], [0], [1], [0, 0, 1, 1], [], []>} : vector<256x4xbf16>, vector<4x128xbf16>, vector<256x128xf32> -> vector<256x128xf32>
    %79 = arith.addf %71, %78 : vector<256x128xf32>
    %80 = vector.shape_cast %79 : vector<256x128xf32> to vector<1x16x16x128xf32>
    %81 = arith.truncf %80 : vector<1x16x16x128xf32> to vector<1x16x16x128xbf16>
    %c0_45 = arith.constant 0 : index
    %c0_46 = arith.constant 0 : index
    %c0_47 = arith.constant 0 : index
    %c0_48 = arith.constant 0 : index
    %82 = vector.load %arg3[%c0_45, %c0_46, %c0_47, %c0_48] : memref<1x16x16x128xbf16, #tpu.memory_space<vmem>>, vector<1x16x16x128xbf16>
    tpu.vector_store %arg3[%c0_45, %c0_46, %c0_47, %c0_48], %81 {strides = array<i32>} : memref<1x16x16x128xbf16, #tpu.memory_space<vmem>>, vector<1x16x16x128xbf16>,
    %cst_49 = arith.constant dense<0.000000e+00> : vector<128xf32>
    %83 = vector.multi_reduction <add>, %79, %cst_49 [0] : vector<256x128xf32> to vector<128xf32>
    %84 = vector.shape_cast %83 : vector<128xf32> to vector<1x128xf32>
    %85 = vector.shape_cast %84 : vector<1x128xf32> to vector<1x1x128xf32>
    %c0_50 = arith.constant 0 : index
    %c0_51 = arith.constant 0 : index
    %c0_52 = arith.constant 0 : index
    %86 = vector.load %arg4[%c0_50, %c0_51, %c0_52] : memref<1x2x128xf32, #tpu.memory_space<vmem>>, vector<1x1x128xf32>
    tpu.vector_store %arg4[%c0_50, %c0_51, %c0_52], %85 {strides = array<i32>} : memref<1x2x128xf32, #tpu.memory_space<vmem>>, vector<1x1x128xf32>,
    %87 = arith.mulf %79, %79 : vector<256x128xf32>
    %cst_53 = arith.constant dense<0.000000e+00> : vector<128xf32>
    %88 = vector.multi_reduction <add>, %87, %cst_53 [0] : vector<256x128xf32> to vector<128xf32>
    %89 = vector.shape_cast %88 : vector<128xf32> to vector<1x128xf32>
    %90 = vector.shape_cast %89 : vector<1x128xf32> to vector<1x1x128xf32>
    %c0_54 = arith.constant 0 : index
    %c1_55 = arith.constant 1 : index
    %c0_56 = arith.constant 0 : index
    %91 = vector.load %arg4[%c0_54, %c1_55, %c0_56] : memref<1x2x128xf32, #tpu.memory_space<vmem>>, vector<1x1x128xf32>
    tpu.vector_store %arg4[%c0_54, %c1_55, %c0_56], %90 {strides = array<i32>} : memref<1x2x128xf32, #tpu.memory_space<vmem>>, vector<1x1x128xf32>,
    return
  }
  func.func @transform_0(%arg0: i32) -> (i32, i32, i32, i32) {
    %c0_i32 = arith.constant 0 : i32
    %c0_i32_0 = arith.constant 0 : i32
    %c0_i32_1 = arith.constant 0 : i32
    %c0_i32_2 = arith.constant 0 : i32
    return %arg0, %c0_i32, %c0_i32_0, %c0_i32_1 : i32, i32, i32, i32
  }
  func.func @transform_1(%arg0: i32) -> (i32, i32, i32) {
    %c0_i32 = arith.constant 0 : i32
    %c0_i32_0 = arith.constant 0 : i32
    %c0_i32_1 = arith.constant 0 : i32
    %c0_i32_2 = arith.constant 0 : i32
    return %c0_i32, %c0_i32_0, %c0_i32_1 : i32, i32, i32
  }
  func.func @transform_2(%arg0: i32) -> (i32, i32, i32, i32) {
    %c0_i32 = arith.constant 0 : i32
    %c0_i32_0 = arith.constant 0 : i32
    %c0_i32_1 = arith.constant 0 : i32
    %c0_i32_2 = arith.constant 0 : i32
    return %arg0, %c0_i32, %c0_i32_0, %c0_i32_1 : i32, i32, i32, i32
  }
  func.func @transform_3(%arg0: i32) -> (i32, i32, i32) {
    %c0_i32 = arith.constant 0 : i32
    %c0_i32_0 = arith.constant 0 : i32
    %c0_i32_1 = arith.constant 0 : i32
    return %arg0, %c0_i32, %c0_i32_0 : i32, i32, i32
  }
}

module attributes {stable_mosaic.version = 11 : i64} {
  func.func @_block2_kernel(%arg0: i32, %arg1: memref<1x16x16x128xbf16, #tpu.memory_space<vmem>>, %arg2: memref<1x128xf32, #tpu.memory_space<vmem>>, %arg3: memref<1x128xf32, #tpu.memory_space<vmem>>, %arg4: memref<1152x128xbf16, #tpu.memory_space<vmem>>, %arg5: memref<1x256x128xbf16, #tpu.memory_space<vmem>>, %arg6: memref<1x2x128xf32, #tpu.memory_space<vmem>>, %arg7: memref<1x18x18x128xf32, #tpu.memory_space<vmem>>) attributes {dimension_semantics = [#tpu.dimension_semantics<parallel>], iteration_bounds = array<i64: 2>, scalar_prefetch = 0 : i64, scratch_operands = 1 : i64, tpu.core_type = #tpu.core_type<tc>, window_params = [{transform_indices = @transform_0, window_bounds = array<i64: 1, 16, 16, 128>}, {pipeline_mode = #tpu.pipeline_mode<synchronous>, transform_indices = @transform_1, window_bounds = array<i64: 1, 128>}, {pipeline_mode = #tpu.pipeline_mode<synchronous>, transform_indices = @transform_2, window_bounds = array<i64: 1, 128>}, {pipeline_mode = #tpu.pipeline_mode<synchronous>, transform_indices = @transform_3, window_bounds = array<i64: 1152, 128>}, {transform_indices = @transform_4, window_bounds = array<i64: 1, 256, 128>}, {transform_indices = @transform_5, window_bounds = array<i64: 1, 2, 128>}]} {
    %cst = arith.constant 0.000000e+00 : f32
    %0 = vector.broadcast %cst : f32 to vector<1x18x18x128xf32>
    %c0 = arith.constant 0 : index
    %c0_0 = arith.constant 0 : index
    %c0_1 = arith.constant 0 : index
    %c0_2 = arith.constant 0 : index
    %1 = vector.load %arg7[%c0, %c0_0, %c0_1, %c0_2] : memref<1x18x18x128xf32, #tpu.memory_space<vmem>>, vector<1x18x18x128xf32>
    tpu.vector_store %arg7[%c0, %c0_0, %c0_1, %c0_2], %0 {strides = array<i32>} : memref<1x18x18x128xf32, #tpu.memory_space<vmem>>, vector<1x18x18x128xf32>,
    %c0_3 = arith.constant 0 : index
    %c0_4 = arith.constant 0 : index
    %c0_5 = arith.constant 0 : index
    %c0_6 = arith.constant 0 : index
    %2 = vector.load %arg1[%c0_3, %c0_4, %c0_5, %c0_6] : memref<1x16x16x128xbf16, #tpu.memory_space<vmem>>, vector<1x16x16x128xbf16>
    %3 = arith.extf %2 : vector<1x16x16x128xbf16> to vector<1x16x16x128xf32>
    %c0_7 = arith.constant 0 : index
    %c0_8 = arith.constant 0 : index
    %4 = vector.load %arg2[%c0_7, %c0_8] : memref<1x128xf32, #tpu.memory_space<vmem>>, vector<1x128xf32>
    %5 = vector.shape_cast %4 : vector<1x128xf32> to vector<1x1x1x128xf32>
    %6 = vector.broadcast %5 : vector<1x1x1x128xf32> to vector<1x16x16x128xf32>
    %7 = arith.mulf %3, %6 : vector<1x16x16x128xf32>
    %c0_9 = arith.constant 0 : index
    %c0_10 = arith.constant 0 : index
    %8 = vector.load %arg3[%c0_9, %c0_10] : memref<1x128xf32, #tpu.memory_space<vmem>>, vector<1x128xf32>
    %9 = vector.shape_cast %8 : vector<1x128xf32> to vector<1x1x1x128xf32>
    %10 = vector.broadcast %9 : vector<1x1x1x128xf32> to vector<1x16x16x128xf32>
    %11 = arith.addf %7, %10 : vector<1x16x16x128xf32>
    %cst_11 = arith.constant 0.000000e+00 : f32
    %12 = vector.broadcast %cst_11 : f32 to vector<1x16x16x128xf32>
    %13 = arith.maximumf %11, %12 : vector<1x16x16x128xf32>
    %c0_12 = arith.constant 0 : index
    %c1 = arith.constant 1 : index
    %c1_13 = arith.constant 1 : index
    %c0_14 = arith.constant 0 : index
    %14 = vector.load %arg7[%c0_12, %c1, %c1_13, %c0_14] : memref<1x18x18x128xf32, #tpu.memory_space<vmem>>, vector<1x16x16x128xf32>
    tpu.vector_store %arg7[%c0_12, %c1, %c1_13, %c0_14], %13 {strides = array<i32>} : memref<1x18x18x128xf32, #tpu.memory_space<vmem>>, vector<1x16x16x128xf32>,
    %c0_15 = arith.constant 0 : index
    %c0_16 = arith.constant 0 : index
    %c0_17 = arith.constant 0 : index
    %c0_18 = arith.constant 0 : index
    %15 = vector.load %arg7[%c0_15, %c0_16, %c0_17, %c0_18] : memref<1x18x18x128xf32, #tpu.memory_space<vmem>>, vector<1x18x18x128xf32>
    %16 = vector.extract_strided_slice %15 {offsets = [0, 0, 0, 0], sizes = [1, 16, 16, 128], strides = [1, 1, 1, 1]} : vector<1x18x18x128xf32> to vector<1x16x16x128xf32>
    %17 = vector.shape_cast %16 : vector<1x16x16x128xf32> to vector<16x16x128xf32>
    %18 = vector.shape_cast %17 : vector<16x16x128xf32> to vector<256x128xf32>
    %19 = vector.extract_strided_slice %15 {offsets = [0, 0, 1, 0], sizes = [1, 16, 16, 128], strides = [1, 1, 1, 1]} : vector<1x18x18x128xf32> to vector<1x16x16x128xf32>
    %20 = vector.shape_cast %19 : vector<1x16x16x128xf32> to vector<16x16x128xf32>
    %21 = vector.shape_cast %20 : vector<16x16x128xf32> to vector<256x128xf32>
    %22 = vector.extract_strided_slice %15 {offsets = [0, 0, 2, 0], sizes = [1, 16, 16, 128], strides = [1, 1, 1, 1]} : vector<1x18x18x128xf32> to vector<1x16x16x128xf32>
    %23 = vector.shape_cast %22 : vector<1x16x16x128xf32> to vector<16x16x128xf32>
    %24 = vector.shape_cast %23 : vector<16x16x128xf32> to vector<256x128xf32>
    %25 = vector.extract_strided_slice %15 {offsets = [0, 1, 0, 0], sizes = [1, 16, 16, 128], strides = [1, 1, 1, 1]} : vector<1x18x18x128xf32> to vector<1x16x16x128xf32>
    %26 = vector.shape_cast %25 : vector<1x16x16x128xf32> to vector<16x16x128xf32>
    %27 = vector.shape_cast %26 : vector<16x16x128xf32> to vector<256x128xf32>
    %28 = vector.extract_strided_slice %15 {offsets = [0, 1, 1, 0], sizes = [1, 16, 16, 128], strides = [1, 1, 1, 1]} : vector<1x18x18x128xf32> to vector<1x16x16x128xf32>
    %29 = vector.shape_cast %28 : vector<1x16x16x128xf32> to vector<16x16x128xf32>
    %30 = vector.shape_cast %29 : vector<16x16x128xf32> to vector<256x128xf32>
    %31 = vector.extract_strided_slice %15 {offsets = [0, 1, 2, 0], sizes = [1, 16, 16, 128], strides = [1, 1, 1, 1]} : vector<1x18x18x128xf32> to vector<1x16x16x128xf32>
    %32 = vector.shape_cast %31 : vector<1x16x16x128xf32> to vector<16x16x128xf32>
    %33 = vector.shape_cast %32 : vector<16x16x128xf32> to vector<256x128xf32>
    %34 = vector.extract_strided_slice %15 {offsets = [0, 2, 0, 0], sizes = [1, 16, 16, 128], strides = [1, 1, 1, 1]} : vector<1x18x18x128xf32> to vector<1x16x16x128xf32>
    %35 = vector.shape_cast %34 : vector<1x16x16x128xf32> to vector<16x16x128xf32>
    %36 = vector.shape_cast %35 : vector<16x16x128xf32> to vector<256x128xf32>
    %37 = vector.extract_strided_slice %15 {offsets = [0, 2, 1, 0], sizes = [1, 16, 16, 128], strides = [1, 1, 1, 1]} : vector<1x18x18x128xf32> to vector<1x16x16x128xf32>
    %38 = vector.shape_cast %37 : vector<1x16x16x128xf32> to vector<16x16x128xf32>
    %39 = vector.shape_cast %38 : vector<16x16x128xf32> to vector<256x128xf32>
    %40 = vector.extract_strided_slice %15 {offsets = [0, 2, 2, 0], sizes = [1, 16, 16, 128], strides = [1, 1, 1, 1]} : vector<1x18x18x128xf32> to vector<1x16x16x128xf32>
    %41 = vector.shape_cast %40 : vector<1x16x16x128xf32> to vector<16x16x128xf32>
    %42 = vector.shape_cast %41 : vector<16x16x128xf32> to vector<256x128xf32>
    %43 = tpu.concatenate %18, %21, %24, %27, %30, %33, %36, %39, %42 in 1 : vector<256x128xf32>, vector<256x128xf32>, vector<256x128xf32>, vector<256x128xf32>, vector<256x128xf32>, vector<256x128xf32>, vector<256x128xf32>, vector<256x128xf32>, vector<256x128xf32> -> vector<256x1152xf32>
    %44 = arith.truncf %43 : vector<256x1152xf32> to vector<256x1152xbf16>
    %c0_19 = arith.constant 0 : index
    %c0_20 = arith.constant 0 : index
    %45 = vector.load %arg4[%c0_19, %c0_20] : memref<1152x128xbf16, #tpu.memory_space<vmem>>, vector<1152x128xbf16>
    %cst_21 = arith.constant dense<0.000000e+00> : vector<256x128xf32>
    %46 = tpu.matmul %44, %45, %cst_21 {dimension_numbers = #tpu.dot_dimension_numbers<[1], [0], [0], [1], [0, 0, 1, 1], [], []>} : vector<256x1152xbf16>, vector<1152x128xbf16>, vector<256x128xf32> -> vector<256x128xf32>
    %47 = vector.shape_cast %46 : vector<256x128xf32> to vector<1x256x128xf32>
    %48 = arith.truncf %47 : vector<1x256x128xf32> to vector<1x256x128xbf16>
    %c0_22 = arith.constant 0 : index
    %c0_23 = arith.constant 0 : index
    %c0_24 = arith.constant 0 : index
    %49 = vector.load %arg5[%c0_22, %c0_23, %c0_24] : memref<1x256x128xbf16, #tpu.memory_space<vmem>>, vector<1x256x128xbf16>
    tpu.vector_store %arg5[%c0_22, %c0_23, %c0_24], %48 {strides = array<i32>} : memref<1x256x128xbf16, #tpu.memory_space<vmem>>, vector<1x256x128xbf16>,
    %cst_25 = arith.constant dense<0.000000e+00> : vector<128xf32>
    %50 = vector.multi_reduction <add>, %46, %cst_25 [0] : vector<256x128xf32> to vector<128xf32>
    %51 = vector.shape_cast %50 : vector<128xf32> to vector<1x128xf32>
    %52 = vector.shape_cast %51 : vector<1x128xf32> to vector<1x1x128xf32>
    %c0_26 = arith.constant 0 : index
    %c0_27 = arith.constant 0 : index
    %c0_28 = arith.constant 0 : index
    %53 = vector.load %arg6[%c0_26, %c0_27, %c0_28] : memref<1x2x128xf32, #tpu.memory_space<vmem>>, vector<1x1x128xf32>
    tpu.vector_store %arg6[%c0_26, %c0_27, %c0_28], %52 {strides = array<i32>} : memref<1x2x128xf32, #tpu.memory_space<vmem>>, vector<1x1x128xf32>,
    %54 = arith.mulf %46, %46 : vector<256x128xf32>
    %cst_29 = arith.constant dense<0.000000e+00> : vector<128xf32>
    %55 = vector.multi_reduction <add>, %54, %cst_29 [0] : vector<256x128xf32> to vector<128xf32>
    %56 = vector.shape_cast %55 : vector<128xf32> to vector<1x128xf32>
    %57 = vector.shape_cast %56 : vector<1x128xf32> to vector<1x1x128xf32>
    %c0_30 = arith.constant 0 : index
    %c1_31 = arith.constant 1 : index
    %c0_32 = arith.constant 0 : index
    %58 = vector.load %arg6[%c0_30, %c1_31, %c0_32] : memref<1x2x128xf32, #tpu.memory_space<vmem>>, vector<1x1x128xf32>
    tpu.vector_store %arg6[%c0_30, %c1_31, %c0_32], %57 {strides = array<i32>} : memref<1x2x128xf32, #tpu.memory_space<vmem>>, vector<1x1x128xf32>,
    return
  }
  func.func @transform_0(%arg0: i32) -> (i32, i32, i32, i32) {
    %c0_i32 = arith.constant 0 : i32
    %c0_i32_0 = arith.constant 0 : i32
    %c0_i32_1 = arith.constant 0 : i32
    %c0_i32_2 = arith.constant 0 : i32
    return %arg0, %c0_i32, %c0_i32_0, %c0_i32_1 : i32, i32, i32, i32
  }
  func.func @transform_1(%arg0: i32) -> (i32, i32) {
    %c0_i32 = arith.constant 0 : i32
    %c0_i32_0 = arith.constant 0 : i32
    %c0_i32_1 = arith.constant 0 : i32
    return %c0_i32, %c0_i32_0 : i32, i32
  }
  func.func @transform_2(%arg0: i32) -> (i32, i32) {
    %c0_i32 = arith.constant 0 : i32
    %c0_i32_0 = arith.constant 0 : i32
    %c0_i32_1 = arith.constant 0 : i32
    return %c0_i32, %c0_i32_0 : i32, i32
  }
  func.func @transform_3(%arg0: i32) -> (i32, i32) {
    %c0_i32 = arith.constant 0 : i32
    %c0_i32_0 = arith.constant 0 : i32
    %c0_i32_1 = arith.constant 0 : i32
    return %c0_i32, %c0_i32_0 : i32, i32
  }
  func.func @transform_4(%arg0: i32) -> (i32, i32, i32) {
    %c0_i32 = arith.constant 0 : i32
    %c0_i32_0 = arith.constant 0 : i32
    %c0_i32_1 = arith.constant 0 : i32
    return %arg0, %c0_i32, %c0_i32_0 : i32, i32, i32
  }
  func.func @transform_5(%arg0: i32) -> (i32, i32, i32) {
    %c0_i32 = arith.constant 0 : i32
    %c0_i32_0 = arith.constant 0 : i32
    %c0_i32_1 = arith.constant 0 : i32
    return %arg0, %c0_i32, %c0_i32_0 : i32, i32, i32
  }
}

module attributes {stable_mosaic.version = 11 : i64} {
  func.func @_bn_out_kernel(%arg0: i32, %arg1: memref<1x256x128xbf16, #tpu.memory_space<vmem>>, %arg2: memref<1x128xf32, #tpu.memory_space<vmem>>, %arg3: memref<1x128xf32, #tpu.memory_space<vmem>>, %arg4: memref<1x8x256xf32, #tpu.memory_space<vmem>>) attributes {dimension_semantics = [#tpu.dimension_semantics<parallel>], iteration_bounds = array<i64: 2>, scalar_prefetch = 0 : i64, scratch_operands = 0 : i64, tpu.core_type = #tpu.core_type<tc>, window_params = [{transform_indices = @transform_0, window_bounds = array<i64: 1, 256, 128>}, {pipeline_mode = #tpu.pipeline_mode<synchronous>, transform_indices = @transform_1, window_bounds = array<i64: 1, 128>}, {pipeline_mode = #tpu.pipeline_mode<synchronous>, transform_indices = @transform_2, window_bounds = array<i64: 1, 128>}, {transform_indices = @transform_3, window_bounds = array<i64: 1, 8, 256>}]} {
    %c0 = arith.constant 0 : index
    %c0_0 = arith.constant 0 : index
    %c0_1 = arith.constant 0 : index
    %0 = vector.load %arg1[%c0, %c0_0, %c0_1] : memref<1x256x128xbf16, #tpu.memory_space<vmem>>, vector<1x256x128xbf16>
    %1 = vector.shape_cast %0 : vector<1x256x128xbf16> to vector<256x128xbf16>
    %2 = arith.extf %1 : vector<256x128xbf16> to vector<256x128xf32>
    %c0_2 = arith.constant 0 : index
    %c0_3 = arith.constant 0 : index
    %3 = vector.load %arg2[%c0_2, %c0_3] : memref<1x128xf32, #tpu.memory_space<vmem>>, vector<1x128xf32>
    %4 = vector.broadcast %3 : vector<1x128xf32> to vector<256x128xf32>
    %5 = arith.mulf %2, %4 : vector<256x128xf32>
    %c0_4 = arith.constant 0 : index
    %c0_5 = arith.constant 0 : index
    %6 = vector.load %arg3[%c0_4, %c0_5] : memref<1x128xf32, #tpu.memory_space<vmem>>, vector<1x128xf32>
    %7 = vector.broadcast %6 : vector<1x128xf32> to vector<256x128xf32>
    %8 = arith.addf %5, %7 : vector<256x128xf32>
    %9 = tpu.transpose %8, [1, 0] : vector<256x128xf32> -> vector<128x256xf32>
    %10 = vector.extract_strided_slice %9 {offsets = [0, 0], sizes = [8, 256], strides = [1, 1]} : vector<128x256xf32> to vector<8x256xf32>
    %11 = vector.shape_cast %10 : vector<8x256xf32> to vector<1x8x256xf32>
    %c0_6 = arith.constant 0 : index
    %c0_7 = arith.constant 0 : index
    %c0_8 = arith.constant 0 : index
    %12 = vector.load %arg4[%c0_6, %c0_7, %c0_8] : memref<1x8x256xf32, #tpu.memory_space<vmem>>, vector<1x8x256xf32>
    tpu.vector_store %arg4[%c0_6, %c0_7, %c0_8], %11 {strides = array<i32>} : memref<1x8x256xf32, #tpu.memory_space<vmem>>, vector<1x8x256xf32>,
    return
  }
  func.func @transform_0(%arg0: i32) -> (i32, i32, i32) {
    %c0_i32 = arith.constant 0 : i32
    %c0_i32_0 = arith.constant 0 : i32
    %c0_i32_1 = arith.constant 0 : i32
    return %arg0, %c0_i32, %c0_i32_0 : i32, i32, i32
  }
  func.func @transform_1(%arg0: i32) -> (i32, i32) {
    %c0_i32 = arith.constant 0 : i32
    %c0_i32_0 = arith.constant 0 : i32
    %c0_i32_1 = arith.constant 0 : i32
    return %c0_i32, %c0_i32_0 : i32, i32
  }
  func.func @transform_2(%arg0: i32) -> (i32, i32) {
    %c0_i32 = arith.constant 0 : i32
    %c0_i32_0 = arith.constant 0 : i32
    %c0_i32_1 = arith.constant 0 : i32
    return %c0_i32, %c0_i32_0 : i32, i32
  }
  func.func @transform_3(%arg0: i32) -> (i32, i32, i32) {
    %c0_i32 = arith.constant 0 : i32
    %c0_i32_0 = arith.constant 0 : i32
    %c0_i32_1 = arith.constant 0 : i32
    return %arg0, %c0_i32, %c0_i32_0 : i32, i32, i32
  }
}

</mosaic_0001>

<bundles_post_ra>
// kernel: mul.28
= control target key start
LH: loop header
LB: loop body
LE: loop exit
PB: predicated region body
PF: predicated region fallthrough
CT: control target
= control target key end

     0   :  { %vm17_vm0 = vcmask 64512   ;;  %s62_s0 = inlined_call_operand.vmem [shape: f32[3,3,8], index: 0, kind: input, shape index: {}]   ;;  %s63_s1 = inlined_call_operand.vmem [shape: f32[9,8], index: 1, kind: output, shape index: {}]  }
   0x1   :  { %v30_v0 = vld [vmem:[%s62_s0 + $0x8] sm:$0xf]  ;;  %v31_v1 = vld [vmem:[%s62_s0 + $0x4] sm:$0xf]  ;;  %v14_v2 = vld [vmem:[%s62_s0] sm:$0xf] }
   0x2   :  { %9 = vst [vmem:[#allocation0] sm:$0xf] %v30_v0  ;;  %13 = vst [vmem:[#allocation0 + $0x10] sm:$0xf] %v31_v1 }
   0x3   :  { %15 = vst [vmem:[#allocation0 + $0x8] sm:$0xf] %v14_v2 }
   0x9   :  { %v20_v4 = vld [vmem:[#allocation0 + $0x10] sm:$0x7]   ;;  %v25_v5 = vld [vmem:[#allocation0] sm:$0x7]  }
   0xa   :  { %v16_v3 = vld [vmem:[#allocation0 + $0x8] sm:$0x7]   ;;  %32 = vst.msk [vmem:[%s63_s1 + $0x3] sm:$0x7] %vm17_vm0, %v20_v4   ;;  %33 = vst.msk [vmem:[%s63_s1 + $0x6] sm:$0x7] %vm17_vm0, %v25_v5  }
   0xb   :  { %18 = vst.msk [vmem:[%s63_s1] sm:$0x7] %vm17_vm0, %v16_v3  }

// kernel: branch_separables_stem.5
= control target key start
LH: loop header
LB: loop body
LE: loop exit
PB: predicated region body
PF: predicated region fallthrough
CT: control target
= control target key end

     0   :  { %s564_s12 = smov 0   ;;  %s677_s0 = inlined_call_operand.vmem [shape: bf16[2,256,128], index: 0, kind: input, shape index: {}]   ;;  %s678_s1 = inlined_call_operand.vmem [shape: f32[1,128], index: 1, kind: input, shape index: {}]   ;;  %s679_s2 = inlined_call_operand.vmem [shape: f32[1,128], index: 2, kind: input, shape index: {}]   ;;  %s680_s3 = inlined_call_operand.vmem [shape: f32[2,8,256], index: 3, kind: output, shape index: {}]  }
   0x1 LB: > { %s434_s13 = sadd.s32 4294967295, %s542_s12   ;;  %p438_p0 = scmp.ge.s32.totalorder %s542_s12, 1  ;;  %s542_s12 = sphi %s564_s12, %s13_s12  }
   0x2   : > { %p137_p1 = scmp.lt.s32.totalorder %s542_s12, 3 }
   0x4   : > { %p138_p2 = pnand %p438_p0, %p137_p1 }
   0x5   : > { %p161_p3 = scmp.lt.s32.totalorder (!%p138_p2), %s434_s13, 1 }
   0x6   : > { %141 = sbr.rel (%p138_p2) target bundleno = 148 (0x94), region = 32 }
   0xb   : > { %s682_s13 = smov (!%p161_p3, %s434_s13), 1  ;;  %v583_v0 = vld [vmem:[%s678_s1] ss:$0 sm:$0xff] }
   0xc   : > { %s447_s14 = sshll.u32 %s682_s13, 7  ;;  %v592_v9 = vld [vmem:[%s679_s2] ss:$0 sm:$0xff]  ;;  %s448_s22 = sshll.u32 %s682_s13, 4 }
   0xd   : > { %s578_s17 = scalar_lea.vmem %s677_s0, %s447_s14  ;;  %s170_s25 = scalar_lea.vmem %s680_s3, %s448_s22 }
   0xe   : > { %v520_v1 = vld [vmem:[%s578_s17 + $0x40] sm:$0xff]   ;;  %v521_v3 = vld [vmem:[%s578_s17 + $0x48] sm:$0xff]   ;;  %v522_v24 = vld [vmem:[%s578_s17 + $0x50] sm:$0xff]  }
   0xf   : > { %v450_v2 = vld [vmem:[%s578_s17] sm:$0xff]   ;;  %v483_v4 = vunpack.c.l.bf16 %v520_v1  ;;  %v484_v6 = vunpack.c.h.bf16 %v520_v1  ;;  %v513_v8 = vld [vmem:[%s578_s17 + $0x8] sm:$0xff]   ;;  %v487_v10 = vunpack.c.l.bf16 %v521_v3  ;;  %v488_v19 = vunpack.c.h.bf16 %v521_v3  ;;  %v514_v25 = vld [vmem:[%s578_s17 + $0x10] sm:$0xff]  }
  0x10   : > { %v451_v5 = vunpack.c.l.bf16 %v450_v2  ;;  %v452_v7 = vunpack.c.h.bf16 %v450_v2  ;;  %v455_v11 = vunpack.c.l.bf16 %v513_v8  ;;  %v456_v20 = vunpack.c.h.bf16 %v513_v8  ;;  %v523_v38 = vld [vmem:[%s578_s17 + $0x58] sm:$0xff]   ;;  %v524_v52 = vld [vmem:[%s578_s17 + $0x60] sm:$0xff]   ;;  %v525_v3 = vld [vmem:[%s578_s17 + $0x68] sm:$0xff]  }
  0x11   : > { %v258_v12 = vmul.f32 %v483_v4, %v583_v0  ;;  %v259_v14 = vmul.f32 %v484_v6, %v583_v0  ;;  %v260_v18 = vmul.f32 %v487_v10, %v583_v0  ;;  %v261_v26 = vmul.f32 %v488_v19, %v583_v0  ;;  %v515_v39 = vld [vmem:[%s578_s17 + $0x18] sm:$0xff]   ;;  %v516_v53 = vld [vmem:[%s578_s17 + $0x20] sm:$0xff]   ;;  %v517_v4 = vld [vmem:[%s578_s17 + $0x28] sm:$0xff]  }
  0x12   : > { %v242_v13 = vmul.f32 %v451_v5, %v583_v0  ;;  %v243_v15 = vmul.f32 %v452_v7, %v583_v0  ;;  %v244_v23 = vmul.f32 %v455_v11, %v583_v0  ;;  %v245_v27 = vmul.f32 %v456_v20, %v583_v0  ;;  %v518_v19 = vld [vmem:[%s578_s17 + $0x30] sm:$0xff]  }
  0x13   : > { %v297_v16 = vadd.f32 %v592_v9, %v258_v12  ;;  %v298_v21 = vadd.f32 %v592_v9, %v259_v14  ;;  %v299_v28 = vadd.f32 %v592_v9, %v260_v18  ;;  %v491_v30 = vunpack.c.l.bf16 %v522_v24  ;;  %v526_v18 = vld [vmem:[%s578_s17 + $0x70] sm:$0xff]  }
  0x14   : > { %v281_v17 = vadd.f32 %v592_v9, %v242_v13  ;;  %v282_v22 = vadd.f32 %v592_v9, %v243_v15  ;;  %v283_v29 = vadd.f32 %v592_v9, %v244_v23  ;;  %v459_v31 = vunpack.c.l.bf16 %v514_v25 }
  0x15   : > { %345 = vxpose.xlu1.b32.start [1/16] (narrow) %v297_v16, 8  ;;  %v300_v32 = vadd.f32 %v592_v9, %v261_v26  ;;  %v492_v33 = vunpack.c.h.bf16 %v522_v24  ;;  %v284_v34 = vadd.f32 %v592_v9, %v245_v27  ;;  %v262_v35 = vmul.f32 %v491_v30, %v583_v0 }
  0x16   : > { %313 = vxpose.xlu0.b32.start [1/16] (narrow) %v281_v17, 8  ;;  %v246_v36 = vmul.f32 %v459_v31, %v583_v0  ;;  %v460_v37 = vunpack.c.h.bf16 %v514_v25  ;;  %v495_v41 = vunpack.c.l.bf16 %v523_v38  ;;  %v463_v45 = vunpack.c.l.bf16 %v515_v39 }
  0x17   : > { %v263_v40 = vmul.f32 %v492_v33, %v583_v0  ;;  %v301_v42 = vadd.f32 %v592_v9, %v262_v35  ;;  %v496_v47 = vunpack.c.h.bf16 %v523_v38  ;;  %v464_v51 = vunpack.c.h.bf16 %v515_v39  ;;  %v519_v33 = vld [vmem:[%s578_s17 + $0x38] sm:$0xff]  }
  0x18   : > { %v285_v43 = vadd.f32 %v592_v9, %v246_v36  ;;  %v247_v44 = vmul.f32 %v460_v37, %v583_v0  ;;  %v264_v46 = vmul.f32 %v495_v41, %v583_v0  ;;  %v248_v50 = vmul.f32 %v463_v45, %v583_v0 }
  0x19   : > { %346 = vxpose.xlu1.b32.cont [2/16] (narrow) %v298_v21, 8  ;;  %v302_v48 = vadd.f32 %v592_v9, %v263_v40  ;;  %v265_v54 = vmul.f32 %v496_v47, %v583_v0  ;;  %v499_v55 = vunpack.c.l.bf16 %v524_v52  ;;  %v249_v58 = vmul.f32 %v464_v51, %v583_v0 }
  0x1a   : > { %314 = vxpose.xlu0.b32.cont [2/16] (narrow) %v282_v22, 8  ;;  %v286_v49 = vadd.f32 %v592_v9, %v247_v44  ;;  %v303_v56 = vadd.f32 %v592_v9, %v264_v46  ;;  %v287_v57 = vadd.f32 %v592_v9, %v248_v50  ;;  %v467_v59 = vunpack.c.l.bf16 %v516_v53 }
  0x1b   : > { %v304_v60 = vadd.f32 %v592_v9, %v265_v54  ;;  %v266_v61 = vmul.f32 %v499_v55, %v583_v0  ;;  %v288_v62 = vadd.f32 %v592_v9, %v249_v58  ;;  %v500_v1 = vunpack.c.h.bf16 %v524_v52 }
  0x1c   : > { %v250_v63 = vmul.f32 %v467_v59, %v583_v0  ;;  %v468_v2 = vunpack.c.h.bf16 %v516_v53  ;;  %v503_v6 = vunpack.c.l.bf16 %v525_v3  ;;  %v471_v11 = vunpack.c.l.bf16 %v517_v4 }
  0x1d   : > { %347 = vxpose.xlu1.b32.cont [3/16] (narrow) %v299_v28, 8  ;;  %v305_v5 = vadd.f32 %v592_v9, %v266_v61  ;;  %v267_v8 = vmul.f32 %v500_v1, %v583_v0  ;;  %v504_v13 = vunpack.c.h.bf16 %v525_v3  ;;  %v472_v17 = vunpack.c.h.bf16 %v517_v4 }
  0x1e   : > { %315 = vxpose.xlu0.b32.cont [3/16] (narrow) %v283_v29, 8  ;;  %v289_v7 = vadd.f32 %v592_v9, %v250_v63  ;;  %v251_v10 = vmul.f32 %v468_v2, %v583_v0  ;;  %v268_v12 = vmul.f32 %v503_v6, %v583_v0  ;;  %v252_v16 = vmul.f32 %v471_v11, %v583_v0 }
  0x1f   : > { %v306_v14 = vadd.f32 %v592_v9, %v267_v8  ;;  %v269_v20 = vmul.f32 %v504_v13, %v583_v0  ;;  %v507_v21 = vunpack.c.l.bf16 %v526_v18  ;;  %v253_v24 = vmul.f32 %v472_v17, %v583_v0 }
  0x20   : > { %v290_v15 = vadd.f32 %v592_v9, %v251_v10  ;;  %v307_v22 = vadd.f32 %v592_v9, %v268_v12  ;;  %v291_v23 = vadd.f32 %v592_v9, %v252_v16  ;;  %v475_v25 = vunpack.c.l.bf16 %v518_v19 }
  0x21   : > { %348 = vxpose.xlu1.b32.cont [4/16] (narrow) %v300_v32, 8  ;;  %v308_v26 = vadd.f32 %v592_v9, %v269_v20  ;;  %v270_v27 = vmul.f32 %v507_v21, %v583_v0  ;;  %v292_v28 = vadd.f32 %v592_v9, %v253_v24  ;;  %v508_v30 = vunpack.c.h.bf16 %v526_v18  ;;  %v527_v32 = vld [vmem:[%s578_s17 + $0x78] sm:$0xff]  }
  0x22   : > { %316 = vxpose.xlu0.b32.cont [4/16] (narrow) %v284_v34, 8  ;;  %v254_v29 = vmul.f32 %v475_v25, %v583_v0  ;;  %v476_v31 = vunpack.c.h.bf16 %v518_v19  ;;  %v511_v35 = vunpack.c.l.bf16 %v527_v32  ;;  %v479_v39 = vunpack.c.l.bf16 %v519_v33 }
  0x23   : > { %v309_v34 = vadd.f32 %v592_v9, %v270_v27  ;;  %v271_v37 = vmul.f32 %v508_v30, %v583_v0  ;;  %v512_v41 = vunpack.c.h.bf16 %v527_v32  ;;  %v480_v45 = vunpack.c.h.bf16 %v519_v33 }
  0x24   : > { %v293_v36 = vadd.f32 %v592_v9, %v254_v29  ;;  %v255_v38 = vmul.f32 %v476_v31, %v583_v0  ;;  %v272_v40 = vmul.f32 %v511_v35, %v583_v0  ;;  %v256_v44 = vmul.f32 %v479_v39, %v583_v0 }
  0x25   : > { %349 = vxpose.xlu1.b32.cont [5/16] (narrow) %v301_v42, 8  ;;  %v310_v42 = vadd.f32 %v592_v9, %v271_v37  ;;  %v273_v46 = vmul.f32 %v512_v41, %v583_v0 }
  0x26   : > { %317 = vxpose.xlu0.b32.cont [5/16] (narrow) %v285_v43, 8  ;;  %v294_v43 = vadd.f32 %v592_v9, %v255_v38  ;;  %v311_v47 = vadd.f32 %v592_v9, %v272_v40 }
  0x27   : > { %v312_v50 = vadd.f32 %v592_v9, %v273_v46 }
  0x29   : > { %350 = vxpose.xlu1.b32.cont [6/16] (narrow) %v302_v48, 8  ;;  %v295_v48 = vadd.f32 %v592_v9, %v256_v44 }
  0x2a   : > { %318 = vxpose.xlu0.b32.cont [6/16] (narrow) %v286_v49, 8  ;;  %v257_v49 = vmul.f32 %v480_v45, %v583_v0 }
  0x2c   : > { %v296_v51 = vadd.f32 %v592_v9, %v257_v49 }
  0x2d   : > { %351 = vxpose.xlu1.b32.cont [7/16] (narrow) %v303_v56, 8 }
  0x2e   : > { %319 = vxpose.xlu0.b32.cont [7/16] (narrow) %v287_v57, 8 }
  0x31   : > { %352 = vxpose.xlu1.b32.cont [8/16] (narrow) %v304_v60, 8 }
  0x32   : > { %320 = vxpose.xlu0.b32.cont [8/16] (narrow) %v288_v62, 8 }
  0x35   : > { %353 = vxpose.xlu1.b32.cont [9/16] (narrow) %v305_v5, 8 }
  0x36   : > { %321 = vxpose.xlu0.b32.cont [9/16] (narrow) %v289_v7, 8 }
  0x39   : > { %354 = vxpose.xlu1.b32.cont [10/16] (narrow) %v306_v14, 8 }
  0x3a   : > { %322 = vxpose.xlu0.b32.cont [10/16] (narrow) %v290_v15, 8 }
  0x3d   : > { %355 = vxpose.xlu1.b32.cont [11/16] (narrow) %v307_v22, 8 }
  0x3e   : > { %323 = vxpose.xlu0.b32.cont [11/16] (narrow) %v291_v23, 8 }
  0x41   : > { %356 = vxpose.xlu1.b32.cont [12/16] (narrow) %v308_v26, 8 }
  0x42   : > { %324 = vxpose.xlu0.b32.cont [12/16] (narrow) %v292_v28, 8 }
  0x45   : > { %357 = vxpose.xlu1.b32.cont [13/16] (narrow) %v309_v34, 8 }
  0x46   : > { %325 = vxpose.xlu0.b32.cont [13/16] (narrow) %v293_v36, 8 }
  0x49   : > { %358 = vxpose.xlu1.b32.cont [14/16] (narrow) %v310_v42, 8 }
  0x4a   : > { %326 = vxpose.xlu0.b32.cont [14/16] (narrow) %v294_v43, 8 }
  0x4d   : > { %359 = vxpose.xlu1.b32.cont [15/16] (narrow) %v311_v47, 8 }
  0x4e   : > { %327 = vxpose.xlu0.b32.cont [15/16] (narrow) %v295_v48, 8 }
  0x51   : > { %360 = vxpose.xlu1.b32.end [16/16] (narrow) %v312_v50, 8 }
  0x52   : > { %328 = vxpose.xlu0.b32.end [16/16] (narrow) %v296_v51, 8 }
  0x91   : > { %v361_v52 = vpop.trf.xlu1 }
  0x92   : > { %v329_v53 = vpop.trf.xlu0  ;;  %378 = vst [vmem:[%s170_s25 + $0x8] sm:$0xff] %v361_v52 }
  0x93   : > { %377 = vst [vmem:[%s170_s25] sm:$0xff] %v329_v53 }
  0x94 PF: > { %s13_s12 = sadd.s32 1, %s542_s12  }
  0x95   : > { %p10_p4 = scmp.ge.s32.totalorder %s13_s12, 4  }
  0x97   :  { %12 = sbr.rel (!%p10_p4) target bundleno = 1 (0x1), region = 62 }

// kernel: branch_separables_stem.3
= control target key start
LH: loop header
LB: loop body
LE: loop exit
PB: predicated region body
PF: predicated region fallthrough
CT: control target
= control target key end

     0   :  { %s3820_s12 = smov 0   ;;  %s5191_s0 = inlined_call_operand.vmem [shape: f32[2,16,16,4], index: 0, kind: input, shape index: {}]   ;;  %s5192_s1 = inlined_call_operand.vmem [shape: bf16[9,4,128], index: 1, kind: input, shape index: {}]   ;;  %s5193_s2 = inlined_call_operand.vmem [shape: bf16[2,16,16,128], index: 2, kind: output, shape index: {0}]   ;;  %s5194_s3 = inlined_call_operand.vmem [shape: f32[2,2,128], index: 3, kind: output, shape index: {1}]  }
   0x1 LB: > { %s2986_s13 = sadd.s32 4294967295, %s3797_s12   ;;  %p2990_p0 = scmp.ge.s32.totalorder %s3797_s12, 1  ;;  %s3797_s12 = sphi %s3820_s12, %s14_s12  }
   0x2   : > { %p140_p1 = scmp.lt.s32.totalorder %s3797_s12, 3 }
   0x4   : > { %p141_p2 = pnand %p2990_p0, %p140_p1 }
   0x6   : > { %144 = sbr.rel (%p141_p2) target bundleno = 566 (0x236), region = 28 }
   0xb   : > { %v2996_v0 = vld [vmem:[%s5192_s1 + $0x2] sm:$0x3]  ;;  %vm634_vm0 = vcmask 1041408   ;;  %vm183_vm1 = vcmask 31744   ;;  %vm186_vm2 = vcmask 25600   ;;  %v3799_v2 = vmov 0.0  }
   0xc   : > { %3772 = vmatprep.subr.msk.bf16.mxu0 %vm634_vm0, %v2996_v0  ;;  %3773 = vmatprep.subr.msk.bf16.mxu1 %vm634_vm0, %v2996_v0  ;;  %v636_v1 = vsel %vm634_vm0, %v2996_v0, 0  ;;  %184 = vst.msk [vmem:[#allocation2] sm:$0xff] %vm183_vm1, %v3799_v2  ;;  %185 = vst.msk [vmem:[#allocation2 + $0x8] sm:$0xff] %vm183_vm1, %v3799_v2  ;;  %p168_p3 = scmp.lt.s32.totalorder %s2986_s13, 1  ;;  %v3893_v3 = vld [vmem:[%s5192_s1] sm:$0x3] }
   0xd   : > { %187 = vst.msk [vmem:[#allocation2 + $0x10] sm:$0x3] %vm186_vm2, %v3799_v2  ;;  %190 = vst.msk [vmem:[#allocation2 + $0x28] sm:$0x3] %vm186_vm2, %v3799_v2  ;;  %3465 = vmatpush3.bf16.msra.mxu0 %v636_v1  ;;  %3771 = vmatpush3.bf16.msra.mxu1 %v636_v1  ;;  %v3898_v4 = vld [vmem:[%s5192_s1 + $0x4] sm:$0x3] }
   0xe   : > { %188 = vst.msk [vmem:[#allocation2 + $0x18] sm:$0xff] %vm183_vm1, %v3799_v2  ;;  %189 = vst.msk [vmem:[#allocation2 + $0x20] sm:$0xff] %vm183_vm1, %v3799_v2  ;;  %s5348_s13 = smov (!%p168_p3, %s2986_s13), 1  ;;  %3774 = vmatprep.subr.msk.bf16.mxu1 %vm634_vm0, %v3893_v3  ;;  %3775 = vmatprep.subr.msk.bf16.mxu0 %vm634_vm0, %v3898_v4  ;;  %vm455_vm3 = vcmask 1046528   ;;  %vm1011_vm4 = vcmask 1045504  }
   0xf   : > { %191 = vst.msk [vmem:[#allocation2 + $0x30] sm:$0xff] %vm183_vm1, %v3799_v2  ;;  %192 = vst.msk [vmem:[#allocation2 + $0x38] sm:$0xff] %vm183_vm1, %v3799_v2  ;;  %s3182_s20 = sshll.u32 %s5348_s13, 8  ;;  %s3183_s9 = sshll.u32 %s5348_s13, 7 }
  0x10   : > { %193 = vst.msk [vmem:[#allocation2 + $0x40] sm:$0x3] %vm186_vm2, %v3799_v2  ;;  %196 = vst.msk [vmem:[#allocation2 + $0x58] sm:$0x3] %vm186_vm2, %v3799_v2  ;;  %s3912_s23 = scalar_lea.vmem %s5191_s0, %s3182_s20  ;;  %s5102_s14 = scalar_lea.vmem %s5193_s2, %s3183_s9 }
  0x11   : > { %194 = vst.msk [vmem:[#allocation2 + $0x48] sm:$0xff] %vm183_vm1, %v3799_v2  ;;  %195 = vst.msk [vmem:[#allocation2 + $0x50] sm:$0xff] %vm183_vm1, %v3799_v2  ;;  %v239_v5 = vld [vmem:[%s3912_s23] sm:$0xff]  ;;  %v240_v6 = vld [vmem:[%s3912_s23 + $0x8] sm:$0xff]  ;;  %s2995_s15 = sshll.u32 %s5348_s13, 1 }
  0x12   : > { %197 = vst.msk [vmem:[#allocation2 + $0x60] sm:$0xff] %vm183_vm1, %v3799_v2  ;;  %198 = vst.msk [vmem:[#allocation2 + $0x68] sm:$0xff] %vm183_vm1, %v3799_v2  ;;  %v253_v7 = vld [vmem:[%s3912_s23 + $0x70] sm:$0xff]  ;;  %v271_v11 = vmax.f32 %v239_v5, 0.0  ;;  %v272_v12 = vmax.f32 %v240_v6, 0.0  ;;  %v254_v16 = vld [vmem:[%s3912_s23 + $0x78] sm:$0xff]  ;;  %s181_s18 = scalar_lea.vmem %s5194_s3, %s2995_s15 }
  0x13   : > { %199 = vst.msk [vmem:[#allocation2 + $0x70] sm:$0x3] %vm186_vm2, %v3799_v2  ;;  %202 = vst.msk [vmem:[#allocation2 + $0x88] sm:$0x3] %vm186_vm2, %v3799_v2  ;;  %v3917_v8 = vld [vmem:[#allocation2] sm:$0xff]  ;;  %v3919_v9 = vld [vmem:[#allocation2 + $0x8] sm:$0xff] }
  0x14   : > { %200 = vst.msk [vmem:[#allocation2 + $0x78] sm:$0xff] %vm183_vm1, %v3799_v2  ;;  %201 = vst.msk [vmem:[#allocation2 + $0x80] sm:$0xff] %vm183_vm1, %v3799_v2  ;;  %v3921_v10 = vld [vmem:[#allocation2 + $0x10] sm:$0x3]  ;;  %v456_v13 = vrot.slane %v3917_v8, 1  ;;  %v457_v14 = vrot.slane %v3919_v9, 1 }
  0x15   : > { %203 = vst.msk [vmem:[#allocation2 + $0x90] sm:$0xff] %vm183_vm1, %v3799_v2  ;;  %204 = vst.msk [vmem:[#allocation2 + $0x98] sm:$0xff] %vm183_vm1, %v3799_v2  ;;  %v459_v15 = vrot.slane %v3921_v10, 1  ;;  %v255_v17 = vld [vmem:[%s3912_s23 + $0x80] sm:$0xff]  ;;  %v285_v18 = vmax.f32 %v253_v7, 0.0  ;;  %v286_v19 = vmax.f32 %v254_v16, 0.0 }
  0x16   : > { %205 = vst.msk [vmem:[#allocation2 + $0xa0] sm:$0x3] %vm186_vm2, %v3799_v2  ;;  %208 = vst.msk [vmem:[#allocation2 + $0xb8] sm:$0x3] %vm186_vm2, %v3799_v2  ;;  %v256_v20 = vld [vmem:[%s3912_s23 + $0x88] sm:$0xff]  ;;  %v241_v21 = vld [vmem:[%s3912_s23 + $0x10] sm:$0xff]  ;;  %v458_v22 = vsel %vm455_vm3, %v456_v13, %v457_v14 }
  0x17   : > { %206 = vst.msk [vmem:[#allocation2 + $0xa8] sm:$0xff] %vm183_vm1, %v3799_v2  ;;  %207 = vst.msk [vmem:[#allocation2 + $0xb0] sm:$0xff] %vm183_vm1, %v3799_v2  ;;  %v460_v23 = vsel %vm455_vm3, %v457_v14, %v459_v15  ;;  %v287_v24 = vmax.f32 %v255_v17, 0.0  ;;  %v288_v25 = vmax.f32 %v256_v20, 0.0  ;;  %v242_v26 = vld [vmem:[%s3912_s23 + $0x18] sm:$0xff]  ;;  %v243_v27 = vld [vmem:[%s3912_s23 + $0x20] sm:$0xff] }
  0x18   : > { %209 = vst.msk [vmem:[#allocation2 + $0xc0] sm:$0xff] %vm183_vm1, %v3799_v2  ;;  %210 = vst.msk [vmem:[#allocation2 + $0xc8] sm:$0xff] %vm183_vm1, %v3799_v2  ;;  %v244_v28 = vld [vmem:[%s3912_s23 + $0x28] sm:$0xff]  ;;  %v568_v29 = vpack.c.bf16 %v460_v23, %v458_v22  ;;  %v273_v30 = vmax.f32 %v241_v21, 0.0  ;;  %v274_v31 = vmax.f32 %v242_v26, 0.0  ;;  %v275_v32 = vmax.f32 %v243_v27, 0.0 }
  0x19   : > { %211 = vst.msk [vmem:[#allocation2 + $0xd0] sm:$0x3] %vm186_vm2, %v3799_v2  ;;  %214 = vst.msk [vmem:[#allocation2 + $0xe8] sm:$0x3] %vm186_vm2, %v3799_v2  ;;  %v257_v33 = vld [vmem:[%s3912_s23 + $0x90] sm:$0xff]  ;;  %v258_v34 = vld [vmem:[%s3912_s23 + $0x98] sm:$0xff] }
  0x1a   : > { %212 = vst.msk [vmem:[#allocation2 + $0xd8] sm:$0xff] %vm183_vm1, %v3799_v2  ;;  %213 = vst.msk [vmem:[#allocation2 + $0xe0] sm:$0xff] %vm183_vm1, %v3799_v2  ;;  %v259_v35 = vld [vmem:[%s3912_s23 + $0xa0] sm:$0xff]  ;;  %v276_v36 = vmax.f32 %v244_v28, 0.0  ;;  %v289_v37 = vmax.f32 %v257_v33, 0.0  ;;  %v290_v38 = vmax.f32 %v258_v34, 0.0  ;;  %3466 = vmatprep.mubr.msk.bf16.mxu0 %vm183_vm1, %v568_v29 }
  0x1b   : > { %215 = vst.msk [vmem:[#allocation2 + $0xf0] sm:$0xff] %vm183_vm1, %v3799_v2  ;;  %216 = vst.msk [vmem:[#allocation2 + $0xf8] sm:$0xff] %vm183_vm1, %v3799_v2  ;;  %v260_v39 = vld [vmem:[%s3912_s23 + $0xa8] sm:$0xff]  ;;  %v291_v40 = vmax.f32 %v259_v35, 0.0  ;;  %v245_v41 = vld [vmem:[%s3912_s23 + $0x30] sm:$0xff]  ;;  %v848_v7 = vsel %vm634_vm0, %v3893_v3, 0 }
  0x1c   : > { %217 = vst.msk [vmem:[#allocation2 + $0x100] sm:$0x3] %vm186_vm2, %v3799_v2  ;;  %220 = vst.msk [vmem:[#allocation2 + $0x118] sm:$0x3] %vm186_vm2, %v3799_v2  ;;  %v292_v42 = vmax.f32 %v260_v39, 0.0  ;;  %v246_v43 = vld [vmem:[%s3912_s23 + $0x38] sm:$0xff] }
  0x1d   : > { %218 = vst.msk [vmem:[#allocation2 + $0x108] sm:$0xff] %vm183_vm1, %v3799_v2  ;;  %219 = vst.msk [vmem:[#allocation2 + $0x110] sm:$0xff] %vm183_vm1, %v3799_v2  ;;  %v277_v44 = vmax.f32 %v245_v41, 0.0  ;;  %v247_v45 = vld [vmem:[%s3912_s23 + $0x40] sm:$0xff]  ;;  %v248_v46 = vld [vmem:[%s3912_s23 + $0x48] sm:$0xff]  ;;  %v278_v47 = vmax.f32 %v246_v43, 0.0 }
  0x1e   : > { %221 = vst.msk [vmem:[#allocation2 + $0x120] sm:$0xff] %vm183_vm1, %v3799_v2  ;;  %222 = vst.msk [vmem:[#allocation2 + $0x128] sm:$0xff] %vm183_vm1, %v3799_v2  ;;  %v279_v48 = vmax.f32 %v247_v45, 0.0  ;;  %v280_v49 = vmax.f32 %v248_v46, 0.0  ;;  %v261_v50 = vld [vmem:[%s3912_s23 + $0xb0] sm:$0xff]  ;;  %v262_v51 = vld [vmem:[%s3912_s23 + $0xb8] sm:$0xff] }
  0x1f   : > { %223 = vst.msk [vmem:[#allocation2 + $0x130] sm:$0x3] %vm186_vm2, %v3799_v2  ;;  %226 = vst.msk [vmem:[#allocation2 + $0x148] sm:$0x3] %vm186_vm2, %v3799_v2  ;;  %v263_v52 = vld [vmem:[%s3912_s23 + $0xc0] sm:$0xff]  ;;  %v293_v53 = vmax.f32 %v261_v50, 0.0 }
  0x20   : > { %224 = vst.msk [vmem:[#allocation2 + $0x138] sm:$0xff] %vm183_vm1, %v3799_v2  ;;  %225 = vst.msk [vmem:[#allocation2 + $0x140] sm:$0xff] %vm183_vm1, %v3799_v2  ;;  %v294_v54 = vmax.f32 %v262_v51, 0.0  ;;  %v264_v55 = vld [vmem:[%s3912_s23 + $0xc8] sm:$0xff]  ;;  %v295_v56 = vmax.f32 %v263_v52, 0.0  ;;  %v249_v57 = vld [vmem:[%s3912_s23 + $0x50] sm:$0xff] }
  0x21   : > { %227 = vst.msk [vmem:[#allocation2 + $0x150] sm:$0xff] %vm183_vm1, %v3799_v2  ;;  %228 = vst.msk [vmem:[#allocation2 + $0x158] sm:$0xff] %vm183_vm1, %v3799_v2  ;;  %v296_v61 = vmax.f32 %v264_v55, 0.0  ;;  %v281_v62 = vmax.f32 %v249_v57, 0.0  ;;  %v4002_v3 = vld [vmem:[%s5192_s1 + $0x8] sm:$0x3] }
  0x22   : > { %229 = vst.msk [vmem:[#allocation2 + $0x160] sm:$0x3] %vm186_vm2, %v3799_v2  ;;  %232 = vst.msk [vmem:[#allocation2 + $0x178] sm:$0x3] %vm186_vm2, %v3799_v2  ;;  %v1191_v21 = vsel %vm634_vm0, %v3898_v4, 0 }
  0x23   : > { %230 = vst.msk [vmem:[#allocation2 + $0x168] sm:$0xff] %vm183_vm1, %v3799_v2  ;;  %231 = vst.msk [vmem:[#allocation2 + $0x170] sm:$0xff] %vm183_vm1, %v3799_v2  ;;  %v4048_v43 = vld [vmem:[%s5192_s1 + $0x6] sm:$0x3] }
  0x24   : > { %233 = vst.msk [vmem:[#allocation2 + $0x180] sm:$0xff] %vm183_vm1, %v3799_v2  ;;  %234 = vst.msk [vmem:[#allocation2 + $0x188] sm:$0xff] %vm183_vm1, %v3799_v2 }
  0x25   : > { %235 = vst.msk [vmem:[#allocation2 + $0x190] sm:$0x3] %vm186_vm2, %v3799_v2  ;;  %238 = vst.msk [vmem:[#allocation2 + $0x1a8] sm:$0x3] %vm186_vm2, %v3799_v2 }
  0x26   : > { %236 = vst.msk [vmem:[#allocation2 + $0x198] sm:$0xff] %vm183_vm1, %v3799_v2  ;;  %237 = vst.msk [vmem:[#allocation2 + $0x1a0] sm:$0xff] %vm183_vm1, %v3799_v2 }
  0x27   : > { %304 = vst.msk [vmem:[#allocation2 + $0x19] sm:$0xff] %vm183_vm1, %v271_v11  ;;  %305 = vst.msk [vmem:[#allocation2 + $0x21] sm:$0xff] %vm183_vm1, %v272_v12 }
  0x28   : > { %318 = vst.msk [vmem:[#allocation2 + $0xc1] sm:$0xff] %vm183_vm1, %v285_v18  ;;  %319 = vst.msk [vmem:[#allocation2 + $0xc9] sm:$0xff] %vm183_vm1, %v286_v19 }
  0x29   : > { %320 = vst.msk [vmem:[#allocation2 + $0xd9] sm:$0xff] %vm183_vm1, %v287_v24  ;;  %321 = vst.msk [vmem:[#allocation2 + $0xe1] sm:$0xff] %vm183_vm1, %v288_v25 }
  0x2a   : > { %306 = vst.msk [vmem:[#allocation2 + $0x31] sm:$0xff] %vm183_vm1, %v273_v30  ;;  %307 = vst.msk [vmem:[#allocation2 + $0x39] sm:$0xff] %vm183_vm1, %v274_v31 }
  0x2b   : > { %308 = vst.msk [vmem:[#allocation2 + $0x49] sm:$0xff] %vm183_vm1, %v275_v32  ;;  %309 = vst.msk [vmem:[#allocation2 + $0x51] sm:$0xff] %vm183_vm1, %v276_v36 }
  0x2c   : > { %322 = vst.msk [vmem:[#allocation2 + $0xf1] sm:$0xff] %vm183_vm1, %v289_v37  ;;  %323 = vst.msk [vmem:[#allocation2 + $0xf9] sm:$0xff] %vm183_vm1, %v290_v38 }
  0x2d   : > { %324 = vst.msk [vmem:[#allocation2 + $0x109] sm:$0xff] %vm183_vm1, %v291_v40  ;;  %325 = vst.msk [vmem:[#allocation2 + $0x111] sm:$0xff] %vm183_vm1, %v292_v42 }
  0x2e   : > { %310 = vst.msk [vmem:[#allocation2 + $0x61] sm:$0xff] %vm183_vm1, %v277_v44  ;;  %v3964_v58 = vld [vmem:[#allocation2 + $0x18] sm:$0xff]  ;;  %v3966_v59 = vld [vmem:[#allocation2 + $0x20] sm:$0xff]  ;;  %v3968_v60 = vld [vmem:[#allocation2 + $0x28] sm:$0x3] }
  0x2f   : > { %311 = vst.msk [vmem:[#allocation2 + $0x69] sm:$0xff] %vm183_vm1, %v278_v47  ;;  %312 = vst.msk [vmem:[#allocation2 + $0x79] sm:$0xff] %vm183_vm1, %v279_v48  ;;  %v461_v63 = vrot.slane %v3964_v58, 1  ;;  %v462_v0 = vrot.slane %v3966_v59, 1  ;;  %v464_v1 = vrot.slane %v3968_v60, 1  ;;  %v3979_v2 = vld [vmem:[#allocation2 + $0xc0] sm:$0xff] }
  0x30   : > { %313 = vst.msk [vmem:[#allocation2 + $0x81] sm:$0xff] %vm183_vm1, %v280_v49  ;;  %326 = vst.msk [vmem:[#allocation2 + $0x121] sm:$0xff] %vm183_vm1, %v293_v53  ;;  %v3981_v5 = vld [vmem:[#allocation2 + $0xc8] sm:$0xff]  ;;  %v3983_v6 = vld [vmem:[#allocation2 + $0xd0] sm:$0x3]  ;;  %v496_v13 = vrot.slane %v3979_v2, 1 }
  0x31   : > { %327 = vst.msk [vmem:[#allocation2 + $0x129] sm:$0xff] %vm183_vm1, %v294_v54  ;;  %328 = vst.msk [vmem:[#allocation2 + $0x139] sm:$0xff] %vm183_vm1, %v295_v56  ;;  %v463_v11 = vsel %vm455_vm3, %v461_v63, %v462_v0  ;;  %v465_v12 = vsel %vm455_vm3, %v462_v0, %v464_v1  ;;  %v497_v14 = vrot.slane %v3981_v5, 1  ;;  %v3993_v15 = vld [vmem:[#allocation2 + $0xd8] sm:$0xff]  ;;  %v3995_v16 = vld [vmem:[#allocation2 + $0xe0] sm:$0xff]  ;;  %v499_v19 = vrot.slane %v3983_v6, 1 }
  0x32   : > { %5228 = vst [vmem:[#allocation3_spill] sm:$0xff] %v3983_v6  ;;  %329 = vst.msk [vmem:[#allocation2 + $0x141] sm:$0xff] %vm183_vm1, %v296_v61  ;;  %v3997_v17 = vld [vmem:[#allocation2 + $0xe8] sm:$0x3]  ;;  %v4004_v18 = vpack.c.bf16 %v465_v12, %v463_v11  ;;  %v501_v20 = vrot.slane %v3993_v15, 1  ;;  %v4010_v22 = vld [vmem:[#allocation2 + $0x30] sm:$0xff] }
  0x33   : > { %314 = vst.msk [vmem:[#allocation2 + $0x91] sm:$0xff] %vm183_vm1, %v281_v62  ;;  %v4012_v23 = vld [vmem:[#allocation2 + $0x38] sm:$0xff]  ;;  %v4014_v24 = vld [vmem:[#allocation2 + $0x48] sm:$0xff]  ;;  %v498_v25 = vsel %vm455_vm3, %v496_v13, %v497_v14  ;;  %v502_v26 = vrot.slane %v3995_v16, 1  ;;  %v504_v27 = vrot.slane %v3997_v17, 1  ;;  %v466_v29 = vrot.slane %v4010_v22, 1 }
  0x34   : > { %5229 = vst [vmem:[#allocation4_spill] sm:$0xff] %v4004_v18  ;;  %v4019_v28 = vld [vmem:[#allocation2 + $0x40] sm:$0x3]  ;;  %v4022_v30 = vld [vmem:[#allocation2 + $0x50] sm:$0xff]  ;;  %3467 = vmatmul.mubr.msk.bf16.vlgmr.msra.gmra.mxu0 %vm183_vm1, %v4004_v18  ;;  %v500_v4 = vsel %vm455_vm3, %v497_v14, %v499_v19  ;;  %v467_v31 = vrot.slane %v4012_v23, 1  ;;  %v471_v34 = vrot.slane %v4014_v24, 1 }
  0x35   : > { %v469_v32 = vrot.slane %v4019_v28, 1  ;;  %v4029_v33 = vld [vmem:[#allocation2 + $0x58] sm:$0x3]  ;;  %v4032_v35 = vld [vmem:[#allocation2 + $0xf0] sm:$0xff]  ;;  %v4034_v36 = vpack.c.bf16 %v500_v4, %v498_v25  ;;  %v503_v37 = vsel %vm455_vm3, %v501_v20, %v502_v26  ;;  %v505_v38 = vsel %vm455_vm3, %v502_v26, %v504_v27  ;;  %3533 = vmatpush3.bf16.msra.mxu0 %v1191_v21  ;;  %v4041_v41 = vld [vmem:[#allocation2 + $0x100] sm:$0x3] }
  0x36   : > { %v472_v39 = vrot.slane %v4022_v30, 1  ;;  %v4039_v40 = vld [vmem:[#allocation2 + $0xf8] sm:$0xff]  ;;  %5231 = vst [vmem:[#allocation6_spill] sm:$0xff] %v4041_v41  ;;  %v4043_v42 = vld [vmem:[#allocation2 + $0x108] sm:$0xff]  ;;  %v4050_v44 = vpack.c.bf16 %v505_v38, %v503_v37  ;;  %v468_v45 = vsel %vm455_vm3, %v466_v29, %v467_v31  ;;  %v474_v47 = vrot.slane %v4029_v33, 1  ;;  %v4055_v48 = vld [vmem:[#allocation2 + $0x110] sm:$0xff]  ;;  %3777 = vmatprep.subr.msk.bf16.mxu0 %vm634_vm0, %v4002_v3 }
  0x37   : > { %5230 = vst [vmem:[#allocation5_spill] sm:$0xff] %v4034_v36  ;;  %v470_v46 = vsel %vm455_vm3, %v467_v31, %v469_v32  ;;  %v4057_v49 = vld [vmem:[#allocation2 + $0x118] sm:$0x3]  ;;  %v4059_v50 = vld [vmem:[#allocation2 + $0x60] sm:$0xff]  ;;  %3482 = vmatprep.mubr.msk.bf16.mxu1 %vm183_vm1, %v4034_v36  ;;  %v506_v53 = vrot.slane %v4032_v35, 1  ;;  %v507_v54 = vrot.slane %v4039_v40, 1 }
  0x38   : > { %5232 = vst [vmem:[#allocation7_spill] sm:$0xff] %v4050_v44  ;;  %v4065_v51 = vpack.c.bf16 %v470_v46, %v468_v45  ;;  %v473_v52 = vsel %vm455_vm3, %v471_v34, %v472_v39  ;;  %v4070_v55 = vld [vmem:[#allocation2 + $0x68] sm:$0xff]  ;;  %v4072_v56 = vld [vmem:[#allocation2 + $0x70] sm:$0x3]  ;;  %3483 = vmatmul.mubr.msk.bf16.vlgmr.msra.gmra.mxu1 %vm183_vm1, %v4050_v44  ;;  %v475_v57 = vsel %vm455_vm3, %v472_v39, %v474_v47  ;;  %v509_v61 = vrot.slane %v4041_v41, 1  ;;  %v4080_v0 = vld [vmem:[#allocation2 + $0x78] sm:$0xff] }
  0x39   : > { %v511_v62 = vrot.slane %v4043_v42, 1  ;;  %v512_v63 = vrot.slane %v4055_v48, 1  ;;  %v4082_v1 = vld [vmem:[#allocation2 + $0x80] sm:$0xff]  ;;  %3499 = vmatpush3.bf16.msra.mxu1 %v848_v7  ;;  %v4086_v11 = vpack.c.bf16 %v475_v57, %v473_v52  ;;  %v508_v12 = vsel %vm455_vm3, %v506_v53, %v507_v54  ;;  %v4091_v19 = vld [vmem:[#allocation2 + $0x88] sm:$0x3]  ;;  %v4110_v37 = vld [vmem:[#allocation2 + $0x138] sm:$0xff] }
  0x3a   : > { %5233 = vst [vmem:[#allocation8_spill] sm:$0xff] %v4065_v51  ;;  %3470 = vmatprep.mubr.msk.bf16.mxu0 %vm183_vm1, %v4065_v51  ;;  %v514_v13 = vrot.slane %v4057_v49, 1  ;;  %v476_v14 = vrot.slane %v4059_v50, 1  ;;  %v510_v20 = vsel %vm455_vm3, %v507_v54, %v509_v61  ;;  %v477_v25 = vrot.slane %v4070_v55, 1  ;;  %v4097_v26 = vld [vmem:[#allocation2 + $0x120] sm:$0xff]  ;;  %v4099_v27 = vld [vmem:[#allocation2 + $0x128] sm:$0xff]  ;;  %3776 = vmatprep.subr.msk.bf16.mxu1 %vm634_vm0, %v4048_v43 }
  0x3b   : > { %5234 = vst [vmem:[#allocation9_spill] sm:$0xff] %v4086_v11  ;;  %v513_v21 = vsel %vm455_vm3, %v511_v62, %v512_v63  ;;  %v479_v7 = vrot.slane %v4072_v56, 1  ;;  %v4103_v29 = vpack.c.bf16 %v510_v20, %v508_v12  ;;  %v481_v31 = vrot.slane %v4080_v0, 1  ;;  %v4108_v34 = vld [vmem:[#allocation2 + $0x130] sm:$0x3]  ;;  %v4112_v38 = vld [vmem:[#allocation2 + $0x140] sm:$0xff] }
  0x3c   : > { %v515_v4 = vsel %vm455_vm3, %v512_v63, %v514_v13  ;;  %v482_v32 = vrot.slane %v4082_v1, 1  ;;  %5236 = vst [vmem:[#allocation11_spill] sm:$0xff] %v4108_v34  ;;  %3471 = vmatmul.mubr.msk.bf16.gmra.mxu0 %vm183_vm1, %v4086_v11  ;;  %v478_v45 = vsel %vm455_vm3, %v476_v14, %v477_v25  ;;  %v484_v47 = vrot.slane %v4091_v19, 1  ;;  %v4121_v52 = vld [vmem:[#allocation2 + $0x148] sm:$0x3]  ;;  %v250_v53 = vld [vmem:[%s3912_s23 + $0x58] sm:$0xff] }
  0x3d   : > { %5235 = vst [vmem:[#allocation10_spill] sm:$0xff] %v4103_v29  ;;  %v4116_v39 = vpack.c.bf16 %v515_v4, %v513_v21  ;;  %v480_v46 = vsel %vm455_vm3, %v477_v25, %v479_v7  ;;  %3486 = vmatprep.mubr.msk.bf16.mxu1 %vm183_vm1, %v4103_v29  ;;  %v516_v61 = vrot.slane %v4097_v26, 1  ;;  %v517_v62 = vrot.slane %v4099_v27, 1  ;;  %v251_v63 = vld [vmem:[%s3912_s23 + $0x60] sm:$0xff]  ;;  %v252_v21 = vld [vmem:[%s3912_s23 + $0x68] sm:$0xff]  ;;  %v265_v25 = vld [vmem:[%s3912_s23 + $0xd0] sm:$0xff] }
  0x3e   : > { %v4126_v54 = vpack.c.bf16 %v480_v46, %v478_v45  ;;  %v483_v57 = vsel %vm455_vm3, %v481_v31, %v482_v32  ;;  %v485_v12 = vsel %vm455_vm3, %v482_v32, %v484_v47  ;;  %v519_v13 = vrot.slane %v4108_v34, 1  ;;  %v266_v45 = vld [vmem:[%s3912_s23 + $0xd8] sm:$0xff]  ;;  %v267_v46 = vld [vmem:[%s3912_s23 + $0xe0] sm:$0xff]  ;;  %v268_v29 = vld [vmem:[%s3912_s23 + $0xe8] sm:$0xff] }
  0x3f   : > { %5237 = vst [vmem:[#allocation12_spill] sm:$0xff] %v4116_v39  ;;  %v521_v14 = vrot.slane %v4110_v37, 1  ;;  %v522_v20 = vrot.slane %v4112_v38, 1  ;;  %v518_v7 = vsel %vm455_vm3, %v516_v61, %v517_v62  ;;  %v524_v4 = vrot.slane %v4121_v52, 1 }
  0x40   : > { %5238 = vst [vmem:[#allocation13_spill] sm:$0xff] %v4126_v54  ;;  %3474 = vmatprep.mubr.msk.bf16.mxu0 %vm183_vm1, %v4126_v54  ;;  %v282_v31 = vmax.f32 %v250_v53, 0.0  ;;  %3487 = vmatmul.mubr.msk.bf16.gmra.mxu1 %vm183_vm1, %v4116_v39  ;;  %v4147_v32 = vpack.c.bf16 %v485_v12, %v483_v57  ;;  %v520_v47 = vsel %vm455_vm3, %v517_v62, %v519_v13  ;;  %v283_v36 = vmax.f32 %v251_v63, 0.0  ;;  %v4167_v63 = vld [vmem:[#allocation2 + $0x90] sm:$0xff] }
  0x41   : > { %v523_v44 = vsel %vm455_vm3, %v521_v14, %v522_v20  ;;  %v4151_v11 = vpack.c.bf16 %v520_v47, %v518_v7  ;;  %v525_v61 = vsel %vm455_vm3, %v522_v20, %v524_v4  ;;  %v284_v53 = vmax.f32 %v252_v21, 0.0 }
  0x42   : > { %5239 = vst [vmem:[#allocation14_spill] sm:$0xff] %v4147_v32  ;;  %315 = vst.msk [vmem:[#allocation2 + $0x99] sm:$0xff] %vm183_vm1, %v282_v31  ;;  %v297_v54 = vmax.f32 %v265_v25, 0.0  ;;  %v298_v51 = vmax.f32 %v266_v45, 0.0  ;;  %v299_v18 = vmax.f32 %v267_v46, 0.0  ;;  %v300_v39 = vmax.f32 %v268_v29, 0.0 }
  0x43   : > { %5240 = vst [vmem:[#allocation15_spill] sm:$0xff] %v4151_v11  ;;  %316 = vst.msk [vmem:[#allocation2 + $0xa9] sm:$0xff] %vm183_vm1, %v283_v36  ;;  %v1012_v57 = vrot.slane %v3917_v8, 2  ;;  %v1013_v62 = vrot.slane %v3919_v9, 2  ;;  %v1015_v12 = vrot.slane %v3921_v10, 2  ;;  %3490 = vmatprep.mubr.msk.bf16.mxu1 %vm183_vm1, %v4151_v11  ;;  %v4165_v36 = vpack.c.bf16 %v525_v61, %v523_v44 }
  0x44   : > { %317 = vst.msk [vmem:[#allocation2 + $0xb1] sm:$0xff] %vm183_vm1, %v284_v53  ;;  %330 = vst.msk [vmem:[#allocation2 + $0x151] sm:$0xff] %vm183_vm1, %v297_v54  ;;  %3475 = vmatmul.mubr.msk.bf16.gmra.mxu0 %vm183_vm1, %v4147_v32  ;;  %v486_v10 = vrot.slane %v4167_v63, 1  ;;  %v1017_v13 = vrot.slane %v3964_v58, 2  ;;  %v1018_v44 = vrot.slane %v3966_v59, 2  ;;  %v1020_v14 = vrot.slane %v3968_v60, 2 }
  0x45   : > { %5241 = vst [vmem:[#allocation16_spill] sm:$0xff] %v4165_v36  ;;  %331 = vst.msk [vmem:[#allocation2 + $0x159] sm:$0xff] %vm183_vm1, %v298_v51  ;;  %v1014_v29 = vsel %vm1011_vm4, %v1012_v57, %v1013_v62  ;;  %v1016_v54 = vsel %vm1011_vm4, %v1013_v62, %v1015_v12  ;;  %v1022_v25 = vrot.slane %v4010_v22, 2  ;;  %v1023_v7 = vrot.slane %v4012_v23, 2 }
  0x46   : > { %332 = vst.msk [vmem:[#allocation2 + $0x169] sm:$0xff] %vm183_vm1, %v299_v18  ;;  %333 = vst.msk [vmem:[#allocation2 + $0x171] sm:$0xff] %vm183_vm1, %v300_v39  ;;  %v1124_v46 = vpack.c.bf16 %v1016_v54, %v1014_v29  ;;  %v1025_v47 = vrot.slane %v4019_v28, 2 }
  0x48   : > { %3491 = vmatmul.mubr.msk.bf16.gmra.mxu1 %vm183_vm1, %v4165_v36 }
  0x49   : > { %v4180_v51 = vld [vmem:[#allocation2 + $0x98] sm:$0xff]  ;;  %v4182_v18 = vld [vmem:[#allocation2 + $0xa0] sm:$0x3] }
  0x4a   : > { %v487_v39 = vrot.slane %v4180_v51, 1  ;;  %v489_v20 = vrot.slane %v4182_v18, 1  ;;  %v4186_v21 = vld [vmem:[#allocation2 + $0xa8] sm:$0xff] }
  0x4b   : > { %v4190_v4 = vld [vmem:[#allocation2 + $0xb0] sm:$0xff]  ;;  %v4192_v60 = vld [vmem:[#allocation2 + $0xb8] sm:$0x3]  ;;  %v491_v31 = vrot.slane %v4186_v21, 1 }
  0x4c   : > { %v4195_v45 = vld [vmem:[#allocation2 + $0x150] sm:$0xff]  ;;  %v488_v61 = vsel %vm455_vm3, %v486_v10, %v487_v39  ;;  %v490_v53 = vsel %vm455_vm3, %v487_v39, %v489_v20  ;;  %v492_v57 = vrot.slane %v4190_v4, 1  ;;  %v494_v62 = vrot.slane %v4192_v60, 1  ;;  %v4202_v12 = vld [vmem:[#allocation2 + $0x158] sm:$0xff]  ;;  %v4204_v36 = vld [vmem:[#allocation2 + $0x160] sm:$0x3] }
  0x4d   : > { %5242 = vst [vmem:[#allocation17_spill] sm:$0xff] %v4195_v45  ;;  %5243 = vst [vmem:[#allocation18_spill] sm:$0xff] %v4202_v12  ;;  %v4206_v11 = vld [vmem:[#allocation2 + $0x168] sm:$0xff]  ;;  %v4208_v32 = vpack.c.bf16 %v490_v53, %v488_v61  ;;  %v526_v29 = vrot.slane %v4195_v45, 1  ;;  %v527_v28 = vrot.slane %v4202_v12, 1  ;;  %v529_v10 = vrot.slane %v4204_v36, 1 }
  0x4e   : > { %5244 = vst [vmem:[#allocation19_spill] sm:$0xff] %v4204_v36  ;;  %v4213_v54 = vld [vmem:[#allocation2 + $0x170] sm:$0xff]  ;;  %v4215_v39 = vld [vmem:[#allocation2 + $0x178] sm:$0x3]  ;;  %v493_v20 = vsel %vm455_vm3, %v491_v31, %v492_v57  ;;  %v495_v34 = vsel %vm455_vm3, %v492_v57, %v494_v62  ;;  %v531_v41 = vrot.slane %v4206_v11, 1  ;;  %v390_v62 = vpack.c.bf16 %v3919_v9, %v3917_v8 }
  0x4f   : > { %v532_v6 = vrot.slane %v4213_v54, 1  ;;  %3478 = vmatprep.mubr.msk.bf16.mxu0 %vm183_vm1, %v4208_v32  ;;  %v4223_v61 = vpack.c.bf16 %v495_v34, %v493_v20  ;;  %v528_v53 = vsel %vm455_vm3, %v526_v29, %v527_v28  ;;  %v530_v36 = vsel %vm455_vm3, %v527_v28, %v529_v10 }
  0x50   : > { %v534_v12 = vrot.slane %v4215_v39, 1  ;;  %v4228_v45 = vpack.c.bf16 %v530_v36, %v528_v53  ;;  %v1019_v36 = vsel %vm1011_vm4, %v1017_v13, %v1018_v44  ;;  %v1021_v29 = vsel %vm1011_vm4, %v1018_v44, %v1020_v14 }
  0x51   : > { %v533_v31 = vsel %vm455_vm3, %v531_v41, %v532_v6  ;;  %3479 = vmatmul.mubr.msk.bf16.gmra.mxu0 %vm183_vm1, %v4223_v61  ;;  %v1605_v41 = vsel %vm634_vm0, %v4002_v3, 0  ;;  %v1024_v28 = vsel %vm1011_vm4, %v1022_v25, %v1023_v7  ;;  %v1027_v8 = vrot.slane %v4014_v24, 2 }
  0x52   : > { %v535_v57 = vsel %vm455_vm3, %v532_v6, %v534_v12  ;;  %3494 = vmatprep.mubr.msk.bf16.mxu1 %vm183_vm1, %v4228_v45  ;;  %3534 = vmatprep.mubr.msk.bf16.mxu0 %vm183_vm1, %v1124_v46  ;;  %v1026_v6 = vsel %vm1011_vm4, %v1023_v7, %v1025_v47  ;;  %v1028_v9 = vrot.slane %v4022_v30, 2  ;;  %v1030_v46 = vrot.slane %v4029_v33, 2 }
  0x53   : > { %v4238_v34 = vpack.c.bf16 %v535_v57, %v533_v31  ;;  %v4254_v13 = vpack.c.bf16 %v3981_v5, %v3979_v2  ;;  %v4257_v3 = vpack.c.bf16 %v1021_v29, %v1019_v36  ;;  %v4261_v44 = vpack.c.bf16 %v3966_v59, %v3964_v58 }
  0x54   : > { %v1057_v14 = vrot.slane %v3993_v15, 2  ;;  %v1058_v25 = vrot.slane %v3995_v16, 2  ;;  %v4265_v7 = vpack.c.bf16 %v1026_v6, %v1024_v28  ;;  %v4269_v33 = vpack.c.bf16 %v4012_v23, %v4010_v22 }
  0x55   : > { %5245 = vst [vmem:[#allocation20_spill] sm:$0xff] %v4238_v34  ;;  %3495 = vmatmul.mubr.msk.bf16.gmra.mxu1 %vm183_vm1, %v4238_v34  ;;  %v1032_v47 = vrot.slane %v4059_v50, 2  ;;  %v1060_v12 = vrot.slane %v3997_v17, 2  ;;  %v1033_v10 = vrot.slane %v4070_v55, 2  ;;  %v1035_v20 = vrot.slane %v4072_v56, 2 }
  0x56   : > { %3500 = vmatprep.mubr.msk.bf16.mxu1 %vm183_vm1, %v390_v62  ;;  %v1059_v58 = vsel %vm1011_vm4, %v1057_v14, %v1058_v25  ;;  %v4278_v59 = vpack.c.bf16 %v3995_v16, %v3993_v15  ;;  %v1029_v53 = vsel %vm1011_vm4, %v1027_v8, %v1028_v9  ;;  %v1031_v31 = vsel %vm1011_vm4, %v1028_v9, %v1030_v46  ;;  %v4290_v17 = vld [vmem:[%s5192_s1 + $0xc] sm:$0x3] }
  0x57   : > { %v1061_v22 = vsel %vm1011_vm4, %v1058_v25, %v1060_v12  ;;  %v4285_v23 = vpack.c.bf16 %v4039_v40, %v4032_v35  ;;  %v1067_v16 = vrot.slane %v4043_v42, 2  ;;  %v1068_v56 = vrot.slane %v4055_v48, 2 }
  0x58   : > { %v4294_v15 = vpack.c.bf16 %v1061_v22, %v1059_v58  ;;  %v1070_v57 = vrot.slane %v4057_v49, 2  ;;  %v1393_v62 = vsel %vm634_vm0, %v4048_v43, 0  ;;  %v4305_v36 = vpack.c.bf16 %v4055_v48, %v4043_v42  ;;  %v4314_v43 = vld [vmem:[%s5192_s1 + $0xa] sm:$0x3] }
  0x59   : > { %3535 = vmatmul.mubr.msk.bf16.vlgmr.msra.gmra.mxu0 %vm183_vm1, %v4257_v3  ;;  %v1034_v29 = vsel %vm1011_vm4, %v1032_v47, %v1033_v10  ;;  %v1036_v28 = vsel %vm1011_vm4, %v1033_v10, %v1035_v20  ;;  %v1069_v6 = vsel %vm1011_vm4, %v1067_v16, %v1068_v56  ;;  %v4320_v42 = vpack.c.bf16 %v1031_v31, %v1029_v53  ;;  %v270_v31 = vld [vmem:[%s3912_s23 + $0xf8] sm:$0xff] }
  0x5a   : > { %3601 = vmatpush3.bf16.msra.mxu0 %v1605_v41  ;;  %3538 = vmatprep.mubr.msk.bf16.mxu0 %vm183_vm1, %v4265_v7  ;;  %v1071_v8 = vsel %vm1011_vm4, %v1068_v56, %v1070_v57  ;;  %v4326_v49 = vpack.c.bf16 %v4099_v27, %v4097_v26  ;;  %v1077_v41 = vrot.slane %v4110_v37, 2  ;;  %v1037_v9 = vrot.slane %v4080_v0, 2 }
  0x5b   : > { %3779 = vmatprep.subr.msk.bf16.mxu0 %vm634_vm0, %v4290_v17  ;;  %v4322_v48 = vpack.c.bf16 %v1071_v8, %v1069_v6  ;;  %v1078_v46 = vrot.slane %v4112_v38, 2  ;;  %v1080_v14 = vrot.slane %v4121_v52, 2  ;;  %v4336_v25 = vpack.c.bf16 %v4112_v38, %v4110_v37  ;;  %v269_v38 = vld [vmem:[%s3912_s23 + $0xf0] sm:$0xff] }
  0x5c   : > { %v4338_v47 = vpack.c.bf16 %v1036_v28, %v1034_v29  ;;  %v1038_v12 = vrot.slane %v4082_v1, 2  ;;  %v1040_v10 = vrot.slane %v4091_v19, 2  ;;  %v1042_v20 = vrot.slane %v4167_v63, 2 }
  0x5d   : > { %3501 = vmatmul.mubr.msk.bf16.vlgmr.msra.gmra.mxu1 %vm183_vm1, %v4261_v44  ;;  %v1043_v58 = vrot.slane %v4180_v51, 2  ;;  %v1045_v53 = vrot.slane %v4182_v18, 2  ;;  %v1079_v52 = vsel %vm1011_vm4, %v1077_v41, %v1078_v46  ;;  %v1081_v37 = vsel %vm1011_vm4, %v1078_v46, %v1080_v14  ;;  %v5246_v41 = vld [vmem:[#allocation3_spill] sm:$0xff] }
  0x5e   : > { %3567 = vmatpush3.bf16.msra.mxu1 %v1393_v62  ;;  %3504 = vmatprep.mubr.msk.bf16.mxu1 %vm183_vm1, %v4269_v33  ;;  %v4353_v22 = vpack.c.bf16 %v4022_v30, %v4014_v24  ;;  %v4355_v19 = vpack.c.bf16 %v1081_v37, %v1079_v52  ;;  %v4361_v16 = vpack.c.bf16 %v4070_v55, %v4059_v50  ;;  %v301_v30 = vmax.f32 %v269_v38, 0.0 }
  0x5f   : > { %3778 = vmatprep.subr.msk.bf16.mxu1 %vm634_vm0, %v4314_v43  ;;  %v4365_v18 = vpack.c.bf16 %v4213_v54, %v4206_v11  ;;  %v1039_v56 = vsel %vm1011_vm4, %v1037_v9, %v1038_v12  ;;  %v1041_v24 = vsel %vm1011_vm4, %v1038_v12, %v1040_v10  ;;  %v302_v57 = vmax.f32 %v270_v31, 0.0 }
  0x60   : > { %v1044_v62 = vsel %vm1011_vm4, %v1042_v20, %v1043_v58  ;;  %v1046_v29 = vsel %vm1011_vm4, %v1043_v58, %v1045_v53  ;;  %334 = vst.msk [vmem:[#allocation2 + $0x181] sm:$0xff] %vm183_vm1, %v301_v30  ;;  %v4379_v50 = vpack.c.bf16 %v1041_v24, %v1039_v56  ;;  %v1047_v28 = vrot.slane %v4186_v21, 2  ;;  %v5247_v58 = vld [vmem:[#allocation6_spill] sm:$0xff] }
  0x61   : > { %3539 = vmatmul.mubr.msk.bf16.gmra.mxu0 %vm183_vm1, %v4320_v42  ;;  %335 = vst.msk [vmem:[#allocation2 + $0x189] sm:$0xff] %vm183_vm1, %v302_v57  ;;  %v4381_v55 = vpack.c.bf16 %v1046_v29, %v1044_v62  ;;  %v1048_v6 = vrot.slane %v4190_v4, 2  ;;  %v1050_v8 = vrot.slane %v4192_v60, 2  ;;  %v1055_v9 = vrot.slane %v5246_v41, 2  ;;  %v5250_v57 = vld [vmem:[#allocation18_spill] sm:$0xff]  ;;  %v5251_v29 = vld [vmem:[#allocation19_spill] sm:$0xff] }
  0x62   : > { %3542 = vmatprep.mubr.msk.bf16.mxu0 %vm183_vm1, %v4338_v47  ;;  %v1052_v46 = vrot.slane %v3979_v2, 2  ;;  %v1053_v14 = vrot.slane %v3981_v5, 2  ;;  %v4391_v12 = vpack.c.bf16 %v4082_v1, %v4080_v0  ;;  %v4397_v10 = vpack.c.bf16 %v4180_v51, %v4167_v63 }
  0x63   : > { %v1049_v60 = vsel %vm1011_vm4, %v1047_v28, %v1048_v6  ;;  %v1051_v2 = vsel %vm1011_vm4, %v1048_v6, %v1050_v8  ;;  %v1062_v63 = vrot.slane %v4032_v35, 2  ;;  %v1063_v51 = vrot.slane %v4039_v40, 2 }
  0x64   : > { %v1054_v5 = vsel %vm1011_vm4, %v1052_v46, %v1053_v14  ;;  %v1056_v20 = vsel %vm1011_vm4, %v1053_v14, %v1055_v9  ;;  %v4409_v0 = vpack.c.bf16 %v1051_v2, %v1049_v60  ;;  %v1065_v53 = vrot.slane %v5247_v58, 2 }
  0x65   : > { %3505 = vmatmul.mubr.msk.bf16.gmra.mxu1 %vm183_vm1, %v4353_v22  ;;  %v4411_v1 = vpack.c.bf16 %v1056_v20, %v1054_v5  ;;  %v4418_v52 = vpack.c.bf16 %v4190_v4, %v4186_v21  ;;  %v1064_v37 = vsel %vm1011_vm4, %v1062_v63, %v1063_v51  ;;  %v1072_v40 = vrot.slane %v4097_v26, 2  ;;  %v5248_v4 = vld [vmem:[#allocation11_spill] sm:$0xff] }
  0x66   : > { %3508 = vmatprep.mubr.msk.bf16.mxu1 %vm183_vm1, %v4361_v16  ;;  %v1066_v38 = vsel %vm1011_vm4, %v1063_v51, %v1065_v53  ;;  %v1073_v21 = vrot.slane %v4099_v27, 2  ;;  %v1075_v31 = vrot.slane %v5248_v4, 2  ;;  %v5249_v27 = vld [vmem:[#allocation17_spill] sm:$0xff]  ;;  %v1083_v62 = vrot.slane %v5250_v57, 2  ;;  %v5252_v53 = vld [vmem:[#allocation4_spill] sm:$0xff] }
  0x67   : > { %v4430_v35 = vpack.c.bf16 %v1066_v38, %v1064_v37  ;;  %v1082_v30 = vrot.slane %v5249_v27, 2  ;;  %v1085_v28 = vrot.slane %v5251_v29, 2  ;;  %v1087_v9 = vrot.slane %v4206_v11, 2  ;;  %v3131_v4 = vld [vmem:[%s5192_s1 + $0x10] sm:$0x3] }
  0x68   : > { %v1074_v56 = vsel %vm1011_vm4, %v1072_v40, %v1073_v21  ;;  %v1076_v24 = vsel %vm1011_vm4, %v1073_v21, %v1075_v31  ;;  %v1088_v46 = vrot.slane %v4213_v54, 2  ;;  %v1090_v14 = vrot.slane %v4215_v39, 2  ;;  %v384_v54 = vld [vmem:[#allocation2 + $0x180] sm:$0xff]  ;;  %v385_v39 = vld [vmem:[#allocation2 + $0x188] sm:$0xff]  ;;  %v386_v20 = vld [vmem:[#allocation2 + $0x190] sm:$0x3] }
  0x69   : > { %3543 = vmatmul.mubr.msk.bf16.gmra.mxu0 %vm183_vm1, %v4379_v50  ;;  %v4445_v26 = vpack.c.bf16 %v1076_v24, %v1074_v56  ;;  %v1084_v6 = vsel %vm1011_vm4, %v1082_v30, %v1083_v62  ;;  %v1086_v8 = vsel %vm1011_vm4, %v1083_v62, %v1085_v28  ;;  %v4469_v60 = vpack.c.bf16 %v5250_v57, %v5249_v27  ;;  %v5253_v31 = vld [vmem:[#allocation8_spill] sm:$0xff]  ;;  %v5254_v24 = vld [vmem:[#allocation9_spill] sm:$0xff]  ;;  %v5258_v30 = vld [vmem:[#allocation7_spill] sm:$0xff] }
  0x6a   : > { %3546 = vmatprep.mubr.msk.bf16.mxu0 %vm183_vm1, %v4381_v55  ;;  %v4460_v41 = vpack.c.bf16 %v1086_v8, %v1084_v6  ;;  %v1089_v2 = vsel %vm1011_vm4, %v1087_v9, %v1088_v46  ;;  %v1091_v5 = vsel %vm1011_vm4, %v1088_v46, %v1090_v14  ;;  %v1800_v63 = vrot.slane %v384_v54, 2  ;;  %v5257_v27 = vld [vmem:[#allocation5_spill] sm:$0xff]  ;;  %v5259_v57 = vld [vmem:[#allocation10_spill] sm:$0xff]  ;;  %v5260_v62 = vld [vmem:[#allocation12_spill] sm:$0xff] }
  0x6b   : > { %v4479_v11 = vpack.c.bf16 %v1091_v5, %v1089_v2  ;;  %v1801_v51 = vrot.slane %v385_v39, 2  ;;  %v1803_v58 = vrot.slane %v386_v20, 2  ;;  %v2016_v21 = vsel %vm634_vm0, %v4290_v17, 0  ;;  %v5255_v17 = vld [vmem:[#allocation13_spill] sm:$0xff]  ;;  %v5261_v29 = vld [vmem:[#allocation15_spill] sm:$0xff]  ;;  %v5262_v28 = vld [vmem:[#allocation16_spill] sm:$0xff] }
  0x6c   : > { %v1814_v56 = vsel %vm634_vm0, %v4314_v43, 0  ;;  %v5256_v43 = vld [vmem:[#allocation14_spill] sm:$0xff]  ;;  %v1591_v6 = vrot.slane %v384_v54, 1  ;;  %v1592_v8 = vrot.slane %v385_v39, 1  ;;  %v1594_v9 = vrot.slane %v386_v20, 1  ;;  %v4561_v2 = vld [vmem:[#allocation2 + $0x198] sm:$0xff] }
  0x6d   : > { %3509 = vmatmul.mubr.msk.bf16.gmra.mxu1 %vm183_vm1, %v4391_v12  ;;  %v1802_v37 = vsel %vm1011_vm4, %v1800_v63, %v1801_v51  ;;  %v1804_v38 = vsel %vm1011_vm4, %v1801_v51, %v1803_v58  ;;  %v4563_v5 = vld [vmem:[#allocation2 + $0x1a0] sm:$0xff]  ;;  %v2214_v63 = vrot.slane %v4561_v2, 1  ;;  %v4571_v58 = vld [vmem:[#allocation2 + $0x1a8] sm:$0x3] }
  0x6e   : > { %3512 = vmatprep.mubr.msk.bf16.mxu1 %vm183_vm1, %v4397_v10  ;;  %v4487_v40 = vpack.c.bf16 %v1804_v38, %v1802_v37  ;;  %v1593_v46 = vsel %vm455_vm3, %v1591_v6, %v1592_v8  ;;  %v1595_v14 = vsel %vm455_vm3, %v1592_v8, %v1594_v9  ;;  %v2215_v51 = vrot.slane %v4563_v5, 1 }
  0x6f   : > { %v4567_v20 = vpack.c.bf16 %v1595_v14, %v1593_v46  ;;  %v1386_v37 = vpack.c.bf16 %v385_v39, %v384_v54  ;;  %v2437_v54 = vsel %vm634_vm0, %v3131_v4, 0 }
  0x70   : > { %v4577_v38 = vsel %vm455_vm3, %v2214_v63, %v2215_v51 }
  0x71   : > { %3547 = vmatmul.mubr.msk.bf16.gmra.mxu0 %vm183_vm1, %v4409_v0  ;;  %5263 = vst [vmem:[#allocation3_spill] sm:$0xff] %v4567_v20  ;;  %5264 = vst [vmem:[#allocation6_spill] sm:$0xff] %v4577_v38 }
  0x72   : > { %3550 = vmatprep.mubr.msk.bf16.mxu0 %vm183_vm1, %v4411_v1 }
  0x75   : > { %3513 = vmatmul.mubr.msk.bf16.gmra.mxu1 %vm183_vm1, %v4418_v52 }
  0x76   : > { %3516 = vmatprep.mubr.msk.bf16.mxu1 %vm183_vm1, %v4254_v13 }
  0x79   : > { %3551 = vmatmul.mubr.msk.bf16.gmra.mxu0 %vm183_vm1, %v4294_v15 }
  0x7a   : > { %3554 = vmatprep.mubr.msk.bf16.mxu0 %vm183_vm1, %v4430_v35 }
  0x7d   : > { %3517 = vmatmul.mubr.msk.bf16.gmra.mxu1 %vm183_vm1, %v4278_v59 }
  0x7e   : > { %3520 = vmatprep.mubr.msk.bf16.mxu1 %vm183_vm1, %v4285_v23 }
  0x81   : > { %3555 = vmatmul.mubr.msk.bf16.gmra.mxu0 %vm183_vm1, %v4322_v48 }
  0x82   : > { %3558 = vmatprep.mubr.msk.bf16.mxu0 %vm183_vm1, %v4445_v26 }
  0x85   : > { %3521 = vmatmul.mubr.msk.bf16.gmra.mxu1 %vm183_vm1, %v4305_v36 }
  0x86   : > { %3524 = vmatprep.mubr.msk.bf16.mxu1 %vm183_vm1, %v4326_v49 }
  0x89   : > { %3559 = vmatmul.mubr.msk.bf16.gmra.mxu0 %vm183_vm1, %v4355_v19 }
  0x8a   : > { %3562 = vmatprep.mubr.msk.bf16.mxu0 %vm183_vm1, %v4460_v41 }
  0x8d   : > { %3525 = vmatmul.mubr.msk.bf16.gmra.mxu1 %vm183_vm1, %v4336_v25 }
  0x8e   : > { %3528 = vmatprep.mubr.msk.bf16.mxu1 %vm183_vm1, %v4469_v60 }
  0x91   : > { %3563 = vmatmul.mubr.msk.bf16.gmra.mxu0 %vm183_vm1, %v4479_v11 }
  0x92   : > { %3602 = vmatprep.mubr.msk.bf16.mxu0 %vm183_vm1, %v5252_v53  ;;  %v2217_v53 = vrot.slane %v4571_v58, 1 }
  0x95   : > { %3529 = vmatmul.mubr.msk.bf16.gmra.mxu1 %vm183_vm1, %v4365_v18 }
  0x96   : > { %3568 = vmatprep.mubr.msk.bf16.mxu1 %vm183_vm1, %v4261_v44  ;;  %v3114_v44 = vld [vmem:[%s5192_s1 + $0xe] sm:$0x3] }
  0x97   : > { %v2228_v39 = vsel %vm634_vm0, %v3114_v44, 0 }
  0x99   : > { %3603 = vmatmul.mubr.msk.bf16.vlgmr.msra.gmra.mxu0 %vm183_vm1, %v5253_v31 }
  0x9a   : > { %3669 = vmatpush3.bf16.msra.mxu0 %v2016_v21  ;;  %3606 = vmatprep.mubr.msk.bf16.mxu0 %vm183_vm1, %v5254_v24  ;;  %v4580_v21 = vsel %vm455_vm3, %v2215_v51, %v2217_v53 }
  0x9b   : > { %3781 = vmatprep.subr.msk.bf16.mxu0 %vm634_vm0, %v3131_v4  ;;  %5265 = vst [vmem:[#allocation11_spill] sm:$0xff] %v4580_v21 }
  0x9d   : > { %3569 = vmatmul.mubr.msk.bf16.vlgmr.msra.gmra.mxu1 %vm183_vm1, %v4269_v33 }
  0x9e   : > { %3635 = vmatpush3.bf16.msra.mxu1 %v1814_v56  ;;  %3572 = vmatprep.mubr.msk.bf16.mxu1 %vm183_vm1, %v4353_v22 }
  0x9f   : > { %3780 = vmatprep.subr.msk.bf16.mxu1 %vm634_vm0, %v3114_v44 }
  0xa1   : > { %3607 = vmatmul.mubr.msk.bf16.gmra.mxu0 %vm183_vm1, %v5255_v17 }
  0xa2   : > { %3610 = vmatprep.mubr.msk.bf16.mxu0 %vm183_vm1, %v5256_v43 }
  0xa5   : > { %3573 = vmatmul.mubr.msk.bf16.gmra.mxu1 %vm183_vm1, %v4361_v16 }
  0xa6   : > { %3576 = vmatprep.mubr.msk.bf16.mxu1 %vm183_vm1, %v4391_v12 }
  0xa9   : > { %3611 = vmatmul.mubr.msk.bf16.gmra.mxu0 %vm183_vm1, %v4208_v32 }
  0xaa   : > { %3614 = vmatprep.mubr.msk.bf16.mxu0 %vm183_vm1, %v4223_v61 }
  0xad   : > { %3577 = vmatmul.mubr.msk.bf16.gmra.mxu1 %vm183_vm1, %v4397_v10 }
  0xae   : > { %3580 = vmatprep.mubr.msk.bf16.mxu1 %vm183_vm1, %v4418_v52 }
  0xb1   : > { %3615 = vmatmul.mubr.msk.bf16.gmra.mxu0 %vm183_vm1, %v5257_v27 }
  0xb2   : > { %3618 = vmatprep.mubr.msk.bf16.mxu0 %vm183_vm1, %v5258_v30 }
  0xb5   : > { %3581 = vmatmul.mubr.msk.bf16.gmra.mxu1 %vm183_vm1, %v4254_v13 }
  0xb6   : > { %3584 = vmatprep.mubr.msk.bf16.mxu1 %vm183_vm1, %v4278_v59 }
  0xb9   : > { %3619 = vmatmul.mubr.msk.bf16.gmra.mxu0 %vm183_vm1, %v5259_v57 }
  0xba   : > { %3622 = vmatprep.mubr.msk.bf16.mxu0 %vm183_vm1, %v5260_v62 }
  0xbd   : > { %3585 = vmatmul.mubr.msk.bf16.gmra.mxu1 %vm183_vm1, %v4285_v23 }
  0xbe   : > { %3588 = vmatprep.mubr.msk.bf16.mxu1 %vm183_vm1, %v4305_v36 }
  0xc1   : > { %3623 = vmatmul.mubr.msk.bf16.gmra.mxu0 %vm183_vm1, %v5261_v29 }
  0xc2   : > { %3626 = vmatprep.mubr.msk.bf16.mxu0 %vm183_vm1, %v5262_v28 }
  0xc5   : > { %3589 = vmatmul.mubr.msk.bf16.gmra.mxu1 %vm183_vm1, %v4326_v49 }
  0xc6   : > { %3592 = vmatprep.mubr.msk.bf16.mxu1 %vm183_vm1, %v4336_v25 }
  0xc9   : > { %3627 = vmatmul.mubr.msk.bf16.gmra.mxu0 %vm183_vm1, %v4228_v45 }
  0xca   : > { %3630 = vmatprep.mubr.msk.bf16.mxu0 %vm183_vm1, %v4238_v34 }
  0xcd   : > { %3593 = vmatmul.mubr.msk.bf16.gmra.mxu1 %vm183_vm1, %v4469_v60 }
  0xce   : > { %3596 = vmatprep.mubr.msk.bf16.mxu1 %vm183_vm1, %v4365_v18 }
  0xd1   : > { %3631 = vmatmul.mubr.msk.bf16.gmra.mxu0 %vm183_vm1, %v4567_v20 }
  0xd2   : > { %3670 = vmatprep.mubr.msk.bf16.mxu0 %vm183_vm1, %v4269_v33 }
  0xd5   : > { %3597 = vmatmul.mubr.msk.bf16.gmra.mxu1 %vm183_vm1, %v1386_v37 }
  0xd6   : > { %3636 = vmatprep.mubr.msk.bf16.mxu1 %vm183_vm1, %v4257_v3 }
  0xd9   : > { %3671 = vmatmul.mubr.msk.bf16.vlgmr.msra.gmra.mxu0 %vm183_vm1, %v4353_v22 }
  0xda   : > { %3737 = vmatpush3.bf16.msra.mxu0 %v2437_v54  ;;  %3674 = vmatprep.mubr.msk.bf16.mxu0 %vm183_vm1, %v4361_v16 }
  0xdd   : > { %3637 = vmatmul.mubr.msk.bf16.vlgmr.msra.gmra.mxu1 %vm183_vm1, %v4265_v7 }
  0xde   : > { %3703 = vmatpush3.bf16.msra.mxu1 %v2228_v39  ;;  %3640 = vmatprep.mubr.msk.bf16.mxu1 %vm183_vm1, %v4320_v42 }
  0xe1   : > { %3675 = vmatmul.mubr.msk.bf16.gmra.mxu0 %vm183_vm1, %v4391_v12 }
  0xe2   : > { %3678 = vmatprep.mubr.msk.bf16.mxu0 %vm183_vm1, %v4397_v10 }
  0xe5   : > { %3641 = vmatmul.mubr.msk.bf16.gmra.mxu1 %vm183_vm1, %v4338_v47 }
  0xe6   : > { %3644 = vmatprep.mubr.msk.bf16.mxu1 %vm183_vm1, %v4379_v50 }
  0xe9   : > { %3679 = vmatmul.mubr.msk.bf16.gmra.mxu0 %vm183_vm1, %v4418_v52 }
  0xea   : > { %3682 = vmatprep.mubr.msk.bf16.mxu0 %vm183_vm1, %v4254_v13 }
  0xed   : > { %3645 = vmatmul.mubr.msk.bf16.gmra.mxu1 %vm183_vm1, %v4381_v55 }
  0xee   : > { %3648 = vmatprep.mubr.msk.bf16.mxu1 %vm183_vm1, %v4409_v0 }
  0xf1   : > { %3683 = vmatmul.mubr.msk.bf16.gmra.mxu0 %vm183_vm1, %v4278_v59 }
  0xf2   : > { %3686 = vmatprep.mubr.msk.bf16.mxu0 %vm183_vm1, %v4285_v23 }
  0xf4   : > { %v3468_v3 = vpop.f32.mrf.mxu0 }
  0xf5   : > { %3649 = vmatmul.mubr.msk.bf16.gmra.mxu1 %vm183_vm1, %v4411_v1 }
  0xf6   : > { %3652 = vmatprep.mubr.msk.bf16.mxu1 %vm183_vm1, %v4294_v15  ;;  %v672_v13 = vpop.f32.mrf.mxu0 }
  0xf8   : > { %v4625_v33 = vpop.f32.mrf.mxu1  ;;  %v3469_v22 = vpop.f32.mrf.mxu0 }
  0xf9   : > { %3687 = vmatmul.mubr.msk.bf16.gmra.mxu0 %vm183_vm1, %v4305_v36 }
  0xfa   : > { %3690 = vmatprep.mubr.msk.bf16.mxu0 %vm183_vm1, %v4326_v49  ;;  %v4629_v59 = vpop.f32.mrf.mxu1  ;;  %v675_v23 = vpop.f32.mrf.mxu0 }
  0xfc   : > { %v4633_v16 = vpop.f32.mrf.mxu1  ;;  %v4635_v12 = vpop.f32.mrf.mxu0 }
  0xfd   : > { %3653 = vmatmul.mubr.msk.bf16.gmra.mxu1 %vm183_vm1, %v4430_v35 }
  0xfe   : > { %3656 = vmatprep.mubr.msk.bf16.mxu1 %vm183_vm1, %v4322_v48  ;;  %v4639_v36 = vpop.f32.mrf.mxu1  ;;  %v4641_v10 = vpop.f32.mrf.mxu0 }
 0x100   : > { %v4645_v49 = vpop.f32.mrf.mxu1  ;;  %v4647_v52 = vpop.f32.mrf.mxu0 }
 0x101   : > { %3691 = vmatmul.mubr.msk.bf16.gmra.mxu0 %vm183_vm1, %v4336_v25 }
 0x102   : > { %3694 = vmatprep.mubr.msk.bf16.mxu0 %vm183_vm1, %v4469_v60  ;;  %v4651_v4 = vpop.f32.mrf.mxu1  ;;  %v4653_v44 = vpop.f32.mrf.mxu0 }
 0x104   : > { %v4657_v6 = vpop.f32.mrf.mxu1  ;;  %v4659_v8 = vpop.f32.mrf.mxu0 }
 0x105   : > { %3657 = vmatmul.mubr.msk.bf16.gmra.mxu1 %vm183_vm1, %v4445_v26 }
 0x106   : > { %3660 = vmatprep.mubr.msk.bf16.mxu1 %vm183_vm1, %v4355_v19  ;;  %v4663_v25 = vpop.f32.mrf.mxu1  ;;  %v4665_v9 = vpop.f32.mrf.mxu0 }
 0x107   : > { %5266 = vst [vmem:[#allocation17_spill] sm:$0xff] %v4663_v25 }
 0x108   : > { %v4669_v60 = vpop.f32.mrf.mxu1  ;;  %v4671_v46 = vpop.f32.mrf.mxu0 }
 0x109   : > { %3695 = vmatmul.mubr.msk.bf16.gmra.mxu0 %vm183_vm1, %v4365_v18  ;;  %5267 = vst [vmem:[#allocation18_spill] sm:$0xff] %v4669_v60  ;;  %v2009_v18 = vpack.c.bf16 %v4563_v5, %v4561_v2 }
 0x10a   : > { %3698 = vmatprep.mubr.msk.bf16.mxu0 %vm183_vm1, %v1386_v37  ;;  %v4674_v14 = vpop.f32.mrf.mxu1  ;;  %v4680_v51 = vpop.f32.mrf.mxu0 }
 0x10b   : > { %5268 = vst [vmem:[#allocation19_spill] sm:$0xff] %v4674_v14 }
 0x10c   : > { %v4678_v63 = vpop.f32.mrf.mxu1 }
 0x10d   : > { %3661 = vmatmul.mubr.msk.bf16.gmra.mxu1 %vm183_vm1, %v4460_v41  ;;  %5269 = vst [vmem:[#allocation4_spill] sm:$0xff] %v4678_v63 }
 0x10e   : > { %3664 = vmatprep.mubr.msk.bf16.mxu1 %vm183_vm1, %v4479_v11  ;;  %v4686_v53 = vpop.f32.mrf.mxu1 }
 0x10f   : > { %5270 = vst [vmem:[#allocation8_spill] sm:$0xff] %v4686_v53 }
 0x111   : > { %v4688_v54 = vpop.f32.mrf.mxu0  ;;  %3699 = vmatmul.mubr.msk.bf16.gmra.mxu0 %vm183_vm1, %v2009_v18 }
 0x112   : > { %3738 = vmatprep.mubr.msk.bf16.mxu0 %vm183_vm1, %v4265_v7 }
 0x113   : > { %v4693_v37 = vpop.f32.mrf.mxu0 }
 0x115   : > { %v4695_v39 = vpop.f32.mrf.mxu1  ;;  %3665 = vmatmul.mubr.msk.bf16.gmra.mxu1 %vm183_vm1, %v4487_v40  ;;  %v4699_v56 = vpop.f32.mrf.mxu0 }
 0x116   : > { %5271 = vst [vmem:[#allocation9_spill] sm:$0xff] %v4695_v39  ;;  %3704 = vmatprep.mubr.msk.bf16.mxu1 %vm183_vm1, %v5253_v31 }
 0x117   : > { %v4703_v38 = vpop.f32.mrf.mxu1  ;;  %v4705_v21 = vpop.f32.mrf.mxu0 }
 0x118   : > { %5272 = vst [vmem:[#allocation13_spill] sm:$0xff] %v4703_v38 }
 0x119   : > { %v4707_v18 = vpop.f32.mrf.mxu1  ;;  %v3536_v53 = vpop.f32.mrf.mxu0  ;;  %3739 = vmatmul.mubr.msk.bf16.vlgmr.msra.gmra.mxu0 %vm183_vm1, %v4320_v42 }
 0x11a   : > { %5273 = vst [vmem:[#allocation14_spill] sm:$0xff] %v4707_v18  ;;  %3742 = vmatprep.mubr.msk.bf16.mxu0 %vm183_vm1, %v4338_v47 }
 0x11b   : > { %v4711_v7 = vpop.f32.mrf.mxu1  ;;  %v1227_v39 = vpop.f32.mrf.mxu0 }
 0x11c   : > { %5274 = vst [vmem:[#allocation5_spill] sm:$0xff] %v4711_v7 }
 0x11d   : > { %v3502_v63 = vpop.f32.mrf.mxu1  ;;  %3705 = vmatmul.mubr.msk.bf16.vlgmr.msra.gmra.mxu1 %vm183_vm1, %v5254_v24  ;;  %v3537_v38 = vpop.f32.mrf.mxu0 }
 0x11e   : > { %v893_v31 = vadd.f32 %v3502_v63, %v3468_v3  ;;  %3708 = vmatprep.mubr.msk.bf16.mxu1 %vm183_vm1, %v5255_v17 }
 0x11f   : > { %v884_v18 = vpop.f32.mrf.mxu1  ;;  %v1230_v20 = vpop.f32.mrf.mxu0 }
 0x120   : > { %v885_v14 = vadd.f32 %v884_v18, %v672_v13  ;;  %v4719_v60 = vadd.f32 %v3536_v53, %v893_v31 }
 0x121   : > { %v3503_v42 = vpop.f32.mrf.mxu1  ;;  %v3540_v34 = vpop.f32.mrf.mxu0  ;;  %3743 = vmatmul.mubr.msk.bf16.gmra.mxu0 %vm183_vm1, %v4379_v50 }
 0x122   : > { %v896_v7 = vadd.f32 %v3503_v42, %v3469_v22  ;;  %v4723_v47 = vadd.f32 %v1227_v39, %v885_v14  ;;  %3746 = vmatprep.mubr.msk.bf16.mxu0 %vm183_vm1, %v4381_v55 }
 0x123   : > { %v887_v25 = vpop.f32.mrf.mxu1  ;;  %v1243_v3 = vpop.f32.mrf.mxu0 }
 0x124   : > { %v888_v24 = vadd.f32 %v887_v25, %v675_v23  ;;  %v4727_v17 = vadd.f32 %v3537_v38, %v896_v7 }
 0x125   : > { %v3506_v13 = vpop.f32.mrf.mxu1  ;;  %3709 = vmatmul.mubr.msk.bf16.gmra.mxu1 %vm183_vm1, %v5256_v43  ;;  %v3541_v63 = vpop.f32.mrf.mxu0 }
 0x126   : > { %v909_v22 = vadd.f32 %v3506_v13, %v4635_v12  ;;  %3712 = vmatprep.mubr.msk.bf16.mxu1 %vm183_vm1, %v4208_v32  ;;  %v4734_v50 = vadd.f32 %v1230_v20, %v888_v24 }
 0x127   : > { %v900_v14 = vpop.f32.mrf.mxu1  ;;  %v1246_v55 = vpop.f32.mrf.mxu0 }
 0x128   : > { %v901_v53 = vadd.f32 %v900_v14, %v4641_v10  ;;  %v4737_v23 = vadd.f32 %v3540_v34, %v909_v22 }
 0x129   : > { %v3507_v38 = vpop.f32.mrf.mxu1  ;;  %v3544_v39 = vpop.f32.mrf.mxu0  ;;  %3747 = vmatmul.mubr.msk.bf16.gmra.mxu0 %vm183_vm1, %v4409_v0 }
 0x12a   : > { %v912_v25 = vadd.f32 %v3507_v38, %v4647_v52  ;;  %v4742_v43 = vadd.f32 %v1243_v3, %v901_v53  ;;  %3750 = vmatprep.mubr.msk.bf16.mxu0 %vm183_vm1, %v4411_v1 }
 0x12b   : > { %v903_v12 = vpop.f32.mrf.mxu1  ;;  %v1259_v20 = vpop.f32.mrf.mxu0 }
 0x12c   : > { %v904_v32 = vadd.f32 %v903_v12, %v4653_v44  ;;  %v4747_v10 = vadd.f32 %v3541_v63, %v912_v25 }
 0x12d   : > { %v3510_v34 = vpop.f32.mrf.mxu1  ;;  %3713 = vmatmul.mubr.msk.bf16.gmra.mxu1 %vm183_vm1, %v4223_v61  ;;  %v3545_v18 = vpop.f32.mrf.mxu0 }
 0x12e   : > { %v925_v52 = vadd.f32 %v3510_v34, %v4659_v8  ;;  %3716 = vmatprep.mubr.msk.bf16.mxu1 %vm183_vm1, %v5257_v27  ;;  %v4754_v0 = vadd.f32 %v1246_v55, %v904_v32 }
 0x12f   : > { %v916_v7 = vpop.f32.mrf.mxu1  ;;  %v1262_v31 = vpop.f32.mrf.mxu0 }
 0x130   : > { %v917_v1 = vadd.f32 %v916_v7, %v4665_v9  ;;  %v4757_v44 = vadd.f32 %v3544_v39, %v925_v52 }
 0x131   : > { %v3511_v42 = vpop.f32.mrf.mxu1  ;;  %v3548_v3 = vpop.f32.mrf.mxu0  ;;  %3751 = vmatmul.mubr.msk.bf16.gmra.mxu0 %vm183_vm1, %v4294_v15 }
 0x132   : > { %v928_v24 = vadd.f32 %v3511_v42, %v4671_v46  ;;  %v4762_v61 = vadd.f32 %v1259_v20, %v917_v1  ;;  %3754 = vmatprep.mubr.msk.bf16.mxu0 %vm183_vm1, %v4430_v35 }
 0x133   : > { %v919_v8 = vpop.f32.mrf.mxu1  ;;  %v1275_v13 = vpop.f32.mrf.mxu0 }
 0x134   : > { %v920_v27 = vadd.f32 %v919_v8, %v4680_v51  ;;  %v4767_v9 = vadd.f32 %v3545_v18, %v928_v24  ;;  %v2423_v24 = vrot.slane %v4561_v2, 2 }
 0x135   : > { %v3514_v22 = vpop.f32.mrf.mxu1  ;;  %3717 = vmatmul.mubr.msk.bf16.gmra.mxu1 %vm183_vm1, %v5258_v30  ;;  %v3549_v63 = vpop.f32.mrf.mxu0 }
 0x136   : > { %v941_v46 = vadd.f32 %v3514_v22, %v4688_v54  ;;  %3720 = vmatprep.mubr.msk.bf16.mxu1 %vm183_vm1, %v5259_v57  ;;  %v4774_v15 = vadd.f32 %v1262_v31, %v920_v27 }
 0x137   : > { %v932_v14 = vpop.f32.mrf.mxu1  ;;  %v1278_v53 = vpop.f32.mrf.mxu0 }
 0x138   : > { %v933_v35 = vadd.f32 %v932_v14, %v4693_v37  ;;  %v4777_v51 = vadd.f32 %v3548_v3, %v941_v46  ;;  %v2426_v3 = vrot.slane %v4571_v58, 2 }
 0x139   : > { %v3515_v55 = vpop.f32.mrf.mxu1  ;;  %v3552_v25 = vpop.f32.mrf.mxu0  ;;  %3755 = vmatmul.mubr.msk.bf16.gmra.mxu0 %vm183_vm1, %v4322_v48 }
 0x13a   : > { %v944_v38 = vadd.f32 %v3515_v55, %v4699_v56  ;;  %v4782_v30 = vadd.f32 %v1275_v13, %v933_v35  ;;  %3758 = vmatprep.mubr.msk.bf16.mxu0 %vm183_vm1, %v4445_v26  ;;  %v5276_v35 = vld [vmem:[#allocation20_spill] sm:$0xff] }
 0x13b   : > { %v935_v54 = vpop.f32.mrf.mxu1  ;;  %v1291_v39 = vpop.f32.mrf.mxu0 }
 0x13c   : > { %v936_v57 = vadd.f32 %v935_v54, %v4705_v21  ;;  %v4787_v37 = vadd.f32 %v3549_v63, %v944_v38  ;;  %v5278_v38 = vld [vmem:[#allocation3_spill] sm:$0xff] }
 0x13d   : > { %v3518_v12 = vpop.f32.mrf.mxu1  ;;  %3721 = vmatmul.mubr.msk.bf16.gmra.mxu1 %vm183_vm1, %v5260_v62  ;;  %v3553_v32 = vpop.f32.mrf.mxu0 }
 0x13e   : > { %v957_v56 = vadd.f32 %v3518_v12, %v4625_v33  ;;  %3724 = vmatprep.mubr.msk.bf16.mxu1 %vm183_vm1, %v5261_v29  ;;  %v4794_v48 = vadd.f32 %v1278_v53, %v936_v57  ;;  %v5279_v57 = vld [vmem:[#allocation19_spill] sm:$0xff] }
 0x13f   : > { %v948_v20 = vpop.f32.mrf.mxu1  ;;  %v1294_v34 = vpop.f32.mrf.mxu0 }
 0x140   : > { %v949_v26 = vadd.f32 %v948_v20, %v4629_v59  ;;  %v4797_v21 = vadd.f32 %v3552_v25, %v957_v56  ;;  %v5280_v20 = vld [vmem:[#allocation4_spill] sm:$0xff] }
 0x141   : > { %v3519_v52 = vpop.f32.mrf.mxu1  ;;  %v3556_v7 = vpop.f32.mrf.mxu0  ;;  %3759 = vmatmul.mubr.msk.bf16.gmra.mxu0 %vm183_vm1, %v4355_v19 }
 0x142   : > { %v960_v18 = vadd.f32 %v3519_v52, %v4633_v16  ;;  %v4802_v62 = vadd.f32 %v1291_v39, %v949_v26  ;;  %3762 = vmatprep.mubr.msk.bf16.mxu0 %vm183_vm1, %v4460_v41  ;;  %v2424_v41 = vrot.slane %v4563_v5, 2 }
 0x143   : > { %v951_v33 = vpop.f32.mrf.mxu1  ;;  %v1307_v1 = vpop.f32.mrf.mxu0 }
 0x144   : > { %v952_v29 = vadd.f32 %v951_v33, %v4639_v36  ;;  %v4807_v59 = vadd.f32 %v3553_v32, %v960_v18  ;;  %v2425_v5 = vsel %vm1011_vm4, %v2423_v24, %v2424_v41  ;;  %v2427_v58 = vsel %vm1011_vm4, %v2424_v41, %v2426_v3  ;;  %v5285_v41 = vld [vmem:[#allocation9_spill] sm:$0xff] }
 0x145   : > { %v3522_v31 = vpop.f32.mrf.mxu1  ;;  %3725 = vmatmul.mubr.msk.bf16.gmra.mxu1 %vm183_vm1, %v5262_v28  ;;  %v3557_v42 = vpop.f32.mrf.mxu0 }
 0x146   : > { %v973_v16 = vadd.f32 %v3522_v31, %v4645_v49  ;;  %3728 = vmatprep.mubr.msk.bf16.mxu1 %vm183_vm1, %v4228_v45  ;;  %v4814_v19 = vadd.f32 %v1294_v34, %v952_v29 }
 0x147   : > { %v964_v36 = vpop.f32.mrf.mxu1  ;;  %v1310_v27 = vpop.f32.mrf.mxu0 }
 0x148   : > { %v965_v8 = vadd.f32 %v964_v36, %v4651_v4  ;;  %v4820_v13 = vadd.f32 %v3556_v7, %v973_v16  ;;  %v5275_v4 = vld [vmem:[#allocation17_spill] sm:$0xff]  ;;  %v5281_v7 = vld [vmem:[#allocation8_spill] sm:$0xff]  ;;  %v5282_v16 = vld [vmem:[#allocation11_spill] sm:$0xff] }
 0x149   : > { %v3523_v28 = vpop.f32.mrf.mxu1  ;;  %v3560_v22 = vpop.f32.mrf.mxu0  ;;  %3763 = vmatmul.mubr.msk.bf16.gmra.mxu0 %vm183_vm1, %v4479_v11  ;;  %v5277_v11 = vld [vmem:[#allocation18_spill] sm:$0xff] }
 0x14a   : > { %v976_v49 = vadd.f32 %v3523_v28, %v4657_v6  ;;  %v4825_v45 = vadd.f32 %v1307_v1, %v965_v8  ;;  %3766 = vmatprep.mubr.msk.bf16.mxu0 %vm183_vm1, %v4487_v40  ;;  %v2430_v40 = vpack.c.bf16 %v2427_v58, %v2425_v5  ;;  %v5286_v28 = vld [vmem:[#allocation13_spill] sm:$0xff]  ;;  %v5287_v58 = vld [vmem:[#allocation14_spill] sm:$0xff] }
 0x14b   : > { %v967_v2 = vpop.f32.mrf.mxu1  ;;  %v1323_v63 = vpop.f32.mrf.mxu0 }
 0x14c   : > { %v968_v46 = vadd.f32 %v967_v2, %v5275_v4  ;;  %v4832_v14 = vadd.f32 %v3557_v42, %v976_v49  ;;  %v5283_v42 = vld [vmem:[#allocation6_spill] sm:$0xff] }
 0x14d   : > { %v3526_v6 = vpop.f32.mrf.mxu1  ;;  %3729 = vmatmul.mubr.msk.bf16.gmra.mxu1 %vm183_vm1, %v5276_v35  ;;  %v3561_v55 = vpop.f32.mrf.mxu0  ;;  %v5284_v24 = vpack.c.bf16 %v5282_v16, %v5283_v42  ;;  %v5288_v35 = vld [vmem:[#allocation5_spill] sm:$0xff] }
 0x14e   : > { %v989_v53 = vadd.f32 %v3526_v6, %v5277_v11  ;;  %3732 = vmatprep.mubr.msk.bf16.mxu1 %vm183_vm1, %v5278_v38  ;;  %v4839_v25 = vadd.f32 %v1310_v27, %v968_v46 }
 0x14f   : > { %v980_v54 = vpop.f32.mrf.mxu1  ;;  %v1326_v12 = vpop.f32.mrf.mxu0 }
 0x150   : > { %v981_v39 = vadd.f32 %v980_v54, %v5279_v57  ;;  %v4842_v56 = vadd.f32 %v3560_v22, %v989_v53 }
 0x151   : > { %v3527_v32 = vpop.f32.mrf.mxu1  ;;  %v3564_v34 = vpop.f32.mrf.mxu0  ;;  %3767 = vmatmul.mubr.msk.bf16.gmra.mxu0 %vm183_vm1, %v2430_v40 }
 0x152   : > { %v992_v26 = vadd.f32 %v3527_v32, %v5280_v20  ;;  %v4846_v52 = vadd.f32 %v1323_v63, %v981_v39 }
 0x153   : > { %v983_v18 = vpop.f32.mrf.mxu1  ;;  %v1339_v29 = vpop.f32.mrf.mxu0 }
 0x154   : > { %v984_v33 = vadd.f32 %v983_v18, %v5281_v7  ;;  %v4849_v1 = vadd.f32 %v3561_v55, %v992_v26 }
 0x155   : > { %v3530_v31 = vpop.f32.mrf.mxu1  ;;  %3733 = vmatmul.mubr.msk.bf16.gmra.mxu1 %vm183_vm1, %v5284_v24  ;;  %v3565_v3 = vpop.f32.mrf.mxu0 }
 0x156   : > { %v1005_v36 = vadd.f32 %v3530_v31, %v5285_v41  ;;  %v4856_v8 = vadd.f32 %v1326_v12, %v984_v33 }
 0x157   : > { %v996_v27 = vpop.f32.mrf.mxu1  ;;  %v1342_v22 = vpop.f32.mrf.mxu0 }
 0x158   : > { %v997_v49 = vadd.f32 %v996_v27, %v5286_v28  ;;  %v4859_v2 = vadd.f32 %v3564_v34, %v1005_v36 }
 0x159   : > { %v3531_v5 = vpop.f32.mrf.mxu1  ;;  %v3604_v46 = vpop.f32.mrf.mxu0 }
 0x15a   : > { %v1008_v4 = vadd.f32 %v3531_v5, %v5287_v58  ;;  %v4862_v63 = vadd.f32 %v1339_v29, %v997_v49 }
 0x15b   : > { %v999_v6 = vpop.f32.mrf.mxu1  ;;  %v1641_v53 = vpop.f32.mrf.mxu0 }
 0x15c   : > { %v1000_v11 = vadd.f32 %v999_v6, %v5288_v35  ;;  %v4865_v55 = vadd.f32 %v3565_v3, %v1008_v4 }
 0x15d   : > { %v3570_v38 = vpop.f32.mrf.mxu1  ;;  %v3605_v54 = vpop.f32.mrf.mxu0 }
 0x15e   : > { %v1558_v40 = vadd.f32 %v3570_v38, %v4719_v60  ;;  %v4868_v57 = vadd.f32 %v1342_v22, %v1000_v11 }
 0x15f   : > { %v1429_v39 = vpop.f32.mrf.mxu1  ;;  %v1644_v32 = vpop.f32.mrf.mxu0 }
 0x160   : > { %v1556_v12 = vadd.f32 %v1429_v39, %v4723_v47  ;;  %v4871_v20 = vadd.f32 %v3604_v46, %v1558_v40 }
 0x161   : > { %v3571_v26 = vpop.f32.mrf.mxu1  ;;  %v3608_v18 = vpop.f32.mrf.mxu0 }
 0x162   : > { %v1559_v34 = vadd.f32 %v3571_v26, %v4727_v17  ;;  %v4874_v7 = vadd.f32 %v1641_v53, %v1556_v12 }
 0x163   : > { %v1432_v33 = vpop.f32.mrf.mxu1  ;;  %v1657_v31 = vpop.f32.mrf.mxu0 }
 0x164   : > { %v1557_v29 = vadd.f32 %v1432_v33, %v4734_v50  ;;  %v4877_v60 = vadd.f32 %v3605_v54, %v1559_v34 }
 0x165   : > { %v3574_v16 = vpop.f32.mrf.mxu1  ;;  %v3609_v24 = vpop.f32.mrf.mxu0 }
 0x166   : > { %v1562_v42 = vadd.f32 %v3574_v16, %v4737_v23  ;;  %v4880_v47 = vadd.f32 %v1644_v32, %v1557_v29 }
 0x167   : > { %v1445_v41 = vpop.f32.mrf.mxu1  ;;  %v1660_v3 = vpop.f32.mrf.mxu0 }
 0x168   : > { %v1560_v36 = vadd.f32 %v1445_v41, %v4742_v43  ;;  %v4883_v17 = vadd.f32 %v3608_v18, %v1562_v42 }
 0x169   : > { %v3575_v27 = vpop.f32.mrf.mxu1  ;;  %v3612_v49 = vpop.f32.mrf.mxu0 }
 0x16a   : > { %v1563_v28 = vadd.f32 %v3575_v27, %v4747_v10  ;;  %v4886_v50 = vadd.f32 %v1657_v31, %v1560_v36 }
 0x16b   : > { %v1448_v22 = vpop.f32.mrf.mxu1  ;;  %v1673_v58 = vpop.f32.mrf.mxu0 }
 0x16c   : > { %v1561_v5 = vadd.f32 %v1448_v22, %v4754_v0  ;;  %v4889_v23 = vadd.f32 %v3609_v24, %v1563_v28 }
 0x16d   : > { %v3578_v4 = vpop.f32.mrf.mxu1  ;;  %v3613_v6 = vpop.f32.mrf.mxu0 }
 0x16e   : > { %v1566_v46 = vadd.f32 %v3578_v4, %v4757_v44  ;;  %v4892_v43 = vadd.f32 %v1660_v3, %v1561_v5 }
 0x16f   : > { %v1461_v35 = vpop.f32.mrf.mxu1  ;;  %v1676_v53 = vpop.f32.mrf.mxu0 }
 0x170   : > { %v1564_v11 = vadd.f32 %v1461_v35, %v4762_v61  ;;  %v4895_v10 = vadd.f32 %v3612_v49, %v1566_v46 }
 0x171   : > { %v3579_v38 = vpop.f32.mrf.mxu1  ;;  %v3616_v54 = vpop.f32.mrf.mxu0 }
 0x172   : > { %v1567_v40 = vadd.f32 %v3579_v38, %v4767_v9  ;;  %v4898_v0 = vadd.f32 %v1673_v58, %v1564_v11 }
 0x173   : > { %v1464_v39 = vpop.f32.mrf.mxu1  ;;  %v1689_v32 = vpop.f32.mrf.mxu0 }
 0x174   : > { %v1565_v12 = vadd.f32 %v1464_v39, %v4774_v15  ;;  %v4901_v44 = vadd.f32 %v3613_v6, %v1567_v40 }
 0x175   : > { %v3582_v26 = vpop.f32.mrf.mxu1  ;;  %v3617_v18 = vpop.f32.mrf.mxu0 }
 0x176   : > { %v1570_v34 = vadd.f32 %v3582_v26, %v4777_v51  ;;  %v4904_v61 = vadd.f32 %v1676_v53, %v1565_v12 }
 0x177   : > { %v1477_v33 = vpop.f32.mrf.mxu1  ;;  %v1692_v31 = vpop.f32.mrf.mxu0 }
 0x178   : > { %v1568_v29 = vadd.f32 %v1477_v33, %v4782_v30  ;;  %v4907_v9 = vadd.f32 %v3616_v54, %v1570_v34 }
 0x179   : > { %v3583_v16 = vpop.f32.mrf.mxu1  ;;  %v3620_v24 = vpop.f32.mrf.mxu0 }
 0x17a   : > { %v1571_v42 = vadd.f32 %v3583_v16, %v4787_v37  ;;  %v4910_v15 = vadd.f32 %v1689_v32, %v1568_v29 }
 0x17b   : > { %v1480_v41 = vpop.f32.mrf.mxu1  ;;  %v1705_v3 = vpop.f32.mrf.mxu0 }
 0x17c   : > { %v1569_v36 = vadd.f32 %v1480_v41, %v4794_v48  ;;  %v4913_v51 = vadd.f32 %v3617_v18, %v1571_v42 }
 0x17d   : > { %v3586_v27 = vpop.f32.mrf.mxu1  ;;  %v3621_v49 = vpop.f32.mrf.mxu0 }
 0x17e   : > { %v1574_v28 = vadd.f32 %v3586_v27, %v4797_v21  ;;  %v4916_v30 = vadd.f32 %v1692_v31, %v1569_v36 }
 0x17f   : > { %v1493_v22 = vpop.f32.mrf.mxu1  ;;  %v1708_v58 = vpop.f32.mrf.mxu0 }
 0x180   : > { %v1572_v5 = vadd.f32 %v1493_v22, %v4802_v62  ;;  %v4919_v37 = vadd.f32 %v3620_v24, %v1574_v28 }
 0x181   : > { %v3587_v4 = vpop.f32.mrf.mxu1  ;;  %v3624_v6 = vpop.f32.mrf.mxu0 }
 0x182   : > { %v1575_v46 = vadd.f32 %v3587_v4, %v4807_v59  ;;  %v4922_v48 = vadd.f32 %v1705_v3, %v1572_v5 }
 0x183   : > { %v1496_v35 = vpop.f32.mrf.mxu1  ;;  %v1721_v53 = vpop.f32.mrf.mxu0 }
 0x184   : > { %v1573_v11 = vadd.f32 %v1496_v35, %v4814_v19  ;;  %v4925_v21 = vadd.f32 %v3621_v49, %v1575_v46 }
 0x185   : > { %v3590_v38 = vpop.f32.mrf.mxu1  ;;  %v3625_v54 = vpop.f32.mrf.mxu0 }
 0x186   : > { %v1578_v40 = vadd.f32 %v3590_v38, %v4820_v13  ;;  %v4928_v62 = vadd.f32 %v1708_v58, %v1573_v11 }
 0x187   : > { %v1509_v39 = vpop.f32.mrf.mxu1  ;;  %v1724_v32 = vpop.f32.mrf.mxu0 }
 0x188   : > { %v1576_v12 = vadd.f32 %v1509_v39, %v4825_v45  ;;  %v4931_v59 = vadd.f32 %v3624_v6, %v1578_v40 }
 0x189   : > { %v3591_v26 = vpop.f32.mrf.mxu1  ;;  %v3628_v18 = vpop.f32.mrf.mxu0 }
 0x18a   : > { %v1579_v34 = vadd.f32 %v3591_v26, %v4832_v14  ;;  %v4934_v19 = vadd.f32 %v1721_v53, %v1576_v12 }
 0x18b   : > { %v1512_v33 = vpop.f32.mrf.mxu1  ;;  %v1737_v31 = vpop.f32.mrf.mxu0 }
 0x18c   : > { %5289 = vst [vmem:[#allocation7_spill] sm:$0xff] %v4934_v19  ;;  %v1577_v29 = vadd.f32 %v1512_v33, %v4839_v25  ;;  %v4937_v13 = vadd.f32 %v3625_v54, %v1579_v34 }
 0x18d   : > { %v3594_v16 = vpop.f32.mrf.mxu1  ;;  %v3629_v24 = vpop.f32.mrf.mxu0 }
 0x18e   : > { %5290 = vst [vmem:[#allocation10_spill] sm:$0xff] %v4937_v13  ;;  %v1582_v42 = vadd.f32 %v3594_v16, %v4842_v56  ;;  %v4940_v45 = vadd.f32 %v1724_v32, %v1577_v29 }
 0x18f   : > { %v1525_v41 = vpop.f32.mrf.mxu1  ;;  %v1740_v3 = vpop.f32.mrf.mxu0 }
 0x190   : > { %5291 = vst [vmem:[#allocation12_spill] sm:$0xff] %v4940_v45  ;;  %v1580_v36 = vadd.f32 %v1525_v41, %v4846_v52  ;;  %v4943_v14 = vadd.f32 %v3628_v18, %v1582_v42 }
 0x191   : > { %v3595_v27 = vpop.f32.mrf.mxu1  ;;  %v3632_v49 = vpop.f32.mrf.mxu0 }
 0x192   : > { %v1583_v28 = vadd.f32 %v3595_v27, %v4849_v1  ;;  %v4946_v25 = vadd.f32 %v1737_v31, %v1580_v36 }
 0x193   : > { %v1528_v22 = vpop.f32.mrf.mxu1  ;;  %v1753_v58 = vpop.f32.mrf.mxu0 }
 0x194   : > { %5292 = vst [vmem:[#allocation15_spill] sm:$0xff] %v4946_v25  ;;  %v1581_v5 = vadd.f32 %v1528_v22, %v4856_v8  ;;  %v4949_v56 = vadd.f32 %v3629_v24, %v1583_v28 }
 0x195   : > { %v3598_v4 = vpop.f32.mrf.mxu1  ;;  %v3633_v6 = vpop.f32.mrf.mxu0 }
 0x196   : > { %5293 = vst [vmem:[#allocation16_spill] sm:$0xff] %v4949_v56  ;;  %v1586_v46 = vadd.f32 %v3598_v4, %v4859_v2  ;;  %v4952_v52 = vadd.f32 %v1740_v3, %v1581_v5 }
 0x197   : > { %v1541_v35 = vpop.f32.mrf.mxu1  ;;  %v1756_v53 = vpop.f32.mrf.mxu0 }
 0x198   : > { %5294 = vst [vmem:[#allocation17_spill] sm:$0xff] %v4952_v52  ;;  %v1584_v11 = vadd.f32 %v1541_v35, %v4862_v63  ;;  %v4955_v1 = vadd.f32 %v3632_v49, %v1586_v46 }
 0x199   : > { %v3599_v38 = vpop.f32.mrf.mxu1  ;;  %v3672_v54 = vpop.f32.mrf.mxu0 }
 0x19a   : > { %v1587_v40 = vadd.f32 %v3599_v38, %v4865_v55  ;;  %v4958_v8 = vadd.f32 %v1753_v58, %v1584_v11 }
 0x19b   : > { %v1544_v39 = vpop.f32.mrf.mxu1  ;;  %v2052_v32 = vpop.f32.mrf.mxu0 }
 0x19c   : > { %5295 = vst [vmem:[#allocation20_spill] sm:$0xff] %v4958_v8  ;;  %v1585_v12 = vadd.f32 %v1544_v39, %v4868_v57  ;;  %v4961_v2 = vadd.f32 %v3633_v6, %v1587_v40 }
 0x19d   : > { %v3638_v26 = vpop.f32.mrf.mxu1  ;;  %v4964_v18 = vpop.f32.mrf.mxu0 }
 0x19e   : > { %5296 = vst [vmem:[#allocation18_spill] sm:$0xff] %v4961_v2  ;;  %v1979_v34 = vadd.f32 %v3638_v26, %v4871_v20  ;;  %v4966_v63 = vadd.f32 %v1756_v53, %v1585_v12 }
 0x19f   : > { %v1850_v33 = vpop.f32.mrf.mxu1  ;;  %v4969_v55 = vpop.f32.mrf.mxu0 }
 0x1a0   : > { %5297 = vst [vmem:[#allocation3_spill] sm:$0xff] %v4966_v63  ;;  %v1977_v29 = vadd.f32 %v1850_v33, %v4874_v7  ;;  %v4971_v31 = vadd.f32 %v3672_v54, %v1979_v34 }
 0x1a1   : > { %v4973_v16 = vpop.f32.mrf.mxu1  ;;  %v3676_v57 = vpop.f32.mrf.mxu0 }
 0x1a2   : > { %v4975_v42 = vadd.f32 %v2052_v32, %v1977_v29 }
 0x1a3   : > { %v4977_v24 = vpop.f32.mrf.mxu1  ;;  %v4979_v41 = vpop.f32.mrf.mxu0 }
 0x1a5   : > { %v3642_v20 = vpop.f32.mrf.mxu1  ;;  %v4982_v3 = vpop.f32.mrf.mxu0 }
 0x1a6   : > { %v1983_v36 = vadd.f32 %v3642_v20, %v4883_v17 }
 0x1a7   : > { %v4984_v27 = vpop.f32.mrf.mxu1  ;;  %v4986_v7 = vpop.f32.mrf.mxu0 }
 0x1a8   : > { %v4988_v28 = vadd.f32 %v3676_v57, %v1983_v36 }
 0x1a9   : > { %v4990_v49 = vpop.f32.mrf.mxu1  ;;  %v3680_v22 = vpop.f32.mrf.mxu0 }
 0x1ab   : > { %v4992_v5 = vpop.f32.mrf.mxu1  ;;  %v4994_v58 = vpop.f32.mrf.mxu0 }
 0x1ad   : > { %v3646_v4 = vpop.f32.mrf.mxu1  ;;  %v4997_v6 = vpop.f32.mrf.mxu0 }
 0x1ae   : > { %v1987_v46 = vadd.f32 %v3646_v4, %v4895_v10 }
 0x1af   : > { %v4999_v17 = vpop.f32.mrf.mxu1  ;;  %v5001_v35 = vpop.f32.mrf.mxu0 }
 0x1b0   : > { %v5003_v11 = vadd.f32 %v3680_v22, %v1987_v46 }
 0x1b1   : > { %v5005_v53 = vpop.f32.mrf.mxu1  ;;  %v3684_v38 = vpop.f32.mrf.mxu0 }
 0x1b3   : > { %v5007_v40 = vpop.f32.mrf.mxu1  ;;  %v5009_v54 = vpop.f32.mrf.mxu0 }
 0x1b5   : > { %v3650_v39 = vpop.f32.mrf.mxu1  ;;  %v5012_v32 = vpop.f32.mrf.mxu0 }
 0x1b6   : > { %v1991_v12 = vadd.f32 %v3650_v39, %v4907_v9 }
 0x1b7   : > { %v5014_v10 = vpop.f32.mrf.mxu1  ;;  %v5016_v26 = vpop.f32.mrf.mxu0 }
 0x1b8   : > { %v5018_v34 = vadd.f32 %v3684_v38, %v1991_v12 }
 0x1b9   : > { %v5020_v33 = vpop.f32.mrf.mxu1  ;;  %v3688_v29 = vpop.f32.mrf.mxu0 }
 0x1bb   : > { %v5022_v57 = vpop.f32.mrf.mxu1  ;;  %v5024_v20 = vpop.f32.mrf.mxu0 }
 0x1bd   : > { %v3654_v36 = vpop.f32.mrf.mxu1  ;;  %v5027_v4 = vpop.f32.mrf.mxu0 }
 0x1be   : > { %v1995_v22 = vadd.f32 %v3654_v36, %v4919_v37 }
 0x1bf   : > { %v5029_v9 = vpop.f32.mrf.mxu1  ;;  %v5031_v46 = vpop.f32.mrf.mxu0 }
 0x1c0   : > { %5298 = vst [vmem:[#allocation19_spill] sm:$0xff] %v5031_v46  ;;  %v5033_v39 = vadd.f32 %v3688_v29, %v1995_v22 }
 0x1c1   : > { %v5035_v38 = vpop.f32.mrf.mxu1  ;;  %v3692_v12 = vpop.f32.mrf.mxu0 }
 0x1c3   : > { %v5037_v63 = vpop.f32.mrf.mxu1  ;;  %v5039_v2 = vpop.f32.mrf.mxu0 }
 0x1c4   : > { %5299 = vst [vmem:[#allocation4_spill] sm:$0xff] %v5039_v2 }
 0x1c5   : > { %v3658_v8 = vpop.f32.mrf.mxu1  ;;  %v5042_v56 = vpop.f32.mrf.mxu0 }
 0x1c6   : > { %v1999_v52 = vadd.f32 %v3658_v8, %v4931_v59  ;;  %5300 = vst [vmem:[#allocation8_spill] sm:$0xff] %v5042_v56 }
 0x1c7   : > { %v5044_v37 = vpop.f32.mrf.mxu1  ;;  %v5046_v36 = vpop.f32.mrf.mxu0 }
 0x1c8   : > { %5301 = vst [vmem:[#allocation11_spill] sm:$0xff] %v5046_v36  ;;  %v5048_v25 = vadd.f32 %v3692_v12, %v1999_v52 }
 0x1c9   : > { %v5050_v29 = vpop.f32.mrf.mxu1  ;;  %v3696_v22 = vpop.f32.mrf.mxu0 }
 0x1ca   : > { %5302 = vst [vmem:[#allocation6_spill] sm:$0xff] %v5048_v25  ;;  %5303 = vst [vmem:[#allocation9_spill] sm:$0xff] %v5050_v29 }
 0x1cb   : > { %v5052_v45 = vpop.f32.mrf.mxu1  ;;  %v5054_v46 = vpop.f32.mrf.mxu0 }
 0x1cc   : > { %5304 = vst [vmem:[#allocation13_spill] sm:$0xff] %v5052_v45  ;;  %5305 = vst [vmem:[#allocation14_spill] sm:$0xff] %v5054_v46 }
 0x1cd   : > { %v3662_v13 = vpop.f32.mrf.mxu1  ;;  %v5057_v19 = vpop.f32.mrf.mxu0 }
 0x1ce   : > { %v2003_v2 = vadd.f32 %v3662_v13, %v4943_v14  ;;  %5306 = vst [vmem:[#allocation5_spill] sm:$0xff] %v5057_v19 }
 0x1cf   : > { %v5059_v59 = vpop.f32.mrf.mxu1  ;;  %v5061_v8 = vpop.f32.mrf.mxu0 }
 0x1d0   : > { %5307 = vst [vmem:[#allocation21_spill] sm:$0xff] %v5061_v8  ;;  %v5063_v56 = vadd.f32 %v3696_v22, %v2003_v2 }
 0x1d1   : > { %v5065_v52 = vpop.f32.mrf.mxu1  ;;  %v3700_v12 = vpop.f32.mrf.mxu0 }
 0x1d2   : > { %5308 = vst [vmem:[#allocation22_spill] sm:$0xff] %v5063_v56  ;;  %5309 = vst [vmem:[#allocation23_spill] sm:$0xff] %v5065_v52 }
 0x1d3   : > { %v5067_v36 = vpop.f32.mrf.mxu1  ;;  %v5069_v25 = vpop.f32.mrf.mxu0 }
 0x1d4   : > { %5310 = vst [vmem:[#allocation24_spill] sm:$0xff] %v5067_v36  ;;  %5311 = vst [vmem:[#allocation25_spill] sm:$0xff] %v5069_v25  ;;  %v1980_v25 = vadd.f32 %v4973_v16, %v4877_v60  ;;  %v1981_v16 = vadd.f32 %v4984_v27, %v4886_v50 }
 0x1d5   : > { %v3666_v45 = vpop.f32.mrf.mxu1  ;;  %v5072_v29 = vpop.f32.mrf.mxu0 }
 0x1d6   : > { %v2007_v46 = vadd.f32 %v3666_v45, %v4955_v1  ;;  %5312 = vst [vmem:[#allocation26_spill] sm:$0xff] %v5072_v29  ;;  %v1978_v45 = vadd.f32 %v4977_v24, %v4880_v47  ;;  %v1984_v47 = vadd.f32 %v4990_v49, %v4889_v23 }
 0x1d7   : > { %v5074_v13 = vpop.f32.mrf.mxu1  ;;  %v5076_v14 = vpop.f32.mrf.mxu0 }
 0x1d8   : > { %5313 = vst [vmem:[#allocation27_spill] sm:$0xff] %v5074_v13  ;;  %5314 = vst [vmem:[#allocation28_spill] sm:$0xff] %v5076_v14  ;;  %v5078_v8 = vadd.f32 %v3700_v12, %v2007_v46  ;;  %v2182_v12 = vadd.f32 %v4964_v18, %v1980_v25  ;;  %v2180_v13 = vadd.f32 %v4969_v55, %v1978_v45 }
 0x1d9   : > { %v5080_v2 = vpop.f32.mrf.mxu1  ;;  %v3740_v22 = vpop.f32.mrf.mxu0  ;;  %v1982_v25 = vadd.f32 %v4992_v5, %v4892_v43  ;;  %v2186_v49 = vadd.f32 %v4982_v3, %v1984_v47  ;;  %v1988_v3 = vadd.f32 %v5005_v53, %v4901_v44 }
 0x1da   : > { %5315 = vst [vmem:[#allocation29_spill] sm:$0xff] %v5078_v8  ;;  %5316 = vst [vmem:[#allocation30_spill] sm:$0xff] %v5080_v2 }
 0x1db   : > { %v5082_v56 = vpop.f32.mrf.mxu1  ;;  %v2473_v19 = vpop.f32.mrf.mxu0 }
 0x1dc   : > { %5317 = vst [vmem:[#allocation31_spill] sm:$0xff] %v5082_v56 }
 0x1dd   : > { %v3706_v36 = vpop.f32.mrf.mxu1  ;;  %v3741_v1 = vpop.f32.mrf.mxu0 }
 0x1de   : > { %v2393_v14 = vadd.f32 %v3706_v36, %v4971_v31 }
 0x1df   : > { %v2264_v29 = vpop.f32.mrf.mxu1  ;;  %v2476_v8 = vpop.f32.mrf.mxu0 }
 0x1e0   : > { %v2391_v46 = vadd.f32 %v2264_v29, %v4975_v42  ;;  %v2602_v52 = vadd.f32 %v3740_v22, %v2393_v14  ;;  %v1985_v22 = vadd.f32 %v4999_v17, %v4898_v0 }
 0x1e1   : > { %v3707_v2 = vpop.f32.mrf.mxu1  ;;  %v3744_v60 = vpop.f32.mrf.mxu0 }
 0x1e2   : > { %v2394_v56 = vadd.f32 %v3707_v2, %v2182_v12  ;;  %v2600_v31 = vadd.f32 %v2473_v19, %v2391_v46  ;;  %v2183_v19 = vadd.f32 %v4979_v41, %v1981_v16  ;;  %v2832_v46 = vmul.f32 %v2602_v52, %v2602_v52 }
 0x1e3   : > { %v2267_v24 = vpop.f32.mrf.mxu1  ;;  %v2489_v29 = vpop.f32.mrf.mxu0 }
 0x1e4   : > { %v2603_v36 = vadd.f32 %v3741_v1, %v2394_v56  ;;  %v2392_v42 = vadd.f32 %v2267_v24, %v2180_v13  ;;  %v2830_v13 = vmul.f32 %v2600_v31, %v2600_v31  ;;  %v2184_v1 = vadd.f32 %v4986_v7, %v1982_v25 }
 0x1e5   : > { %v3710_v18 = vpop.f32.mrf.mxu1  ;;  %v3745_v27 = vpop.f32.mrf.mxu0  ;;  %v1986_v7 = vadd.f32 %v5007_v40, %v4904_v61  ;;  %v2187_v25 = vadd.f32 %v4994_v58, %v1985_v22 }
 0x1e6   : > { %v3224_v50 = vpack.c.bf16 %v2603_v36, %v2602_v52  ;;  %v2601_v55 = vadd.f32 %v2476_v8, %v2392_v42  ;;  %v2397_v23 = vadd.f32 %v3710_v18, %v4988_v28  ;;  %v2833_v47 = vmul.f32 %v2603_v36, %v2603_v36 }
 0x1e7   : > { %v2280_v56 = vpop.f32.mrf.mxu1  ;;  %v2492_v2 = vpop.f32.mrf.mxu0 }
 0x1e8   : > { %3296 = vst [vmem:[%s5102_s14 + $0x8] sm:$0xff] %v3224_v50   ;;  %v3219_v43 = vpack.c.bf16 %v2601_v55, %v2600_v31  ;;  %v2792_v5 = vadd.f32 %v2601_v55, %v2600_v31  ;;  %v2831_v14 = vmul.f32 %v2601_v55, %v2601_v55  ;;  %v2395_v45 = vadd.f32 %v2280_v56, %v2183_v19 }
 0x1e9   : > { %v3711_v8 = vpop.f32.mrf.mxu1  ;;  %v3748_v16 = vpop.f32.mrf.mxu0  ;;  %v2606_v24 = vadd.f32 %v3744_v60, %v2397_v23 }
 0x1ea   : > { %3220 = vst [vmem:[%s5102_s14] sm:$0xff] %v3219_v43   ;;  %v2793_v28 = vadd.f32 %v2792_v5, %v2602_v52  ;;  %v2862_v41 = vadd.f32 %v2831_v14, %v2830_v13  ;;  %v2398_v12 = vadd.f32 %v3711_v8, %v2186_v49  ;;  %v2604_v31 = vadd.f32 %v2489_v29, %v2395_v45 }
 0x1eb   : > { %v2283_v42 = vpop.f32.mrf.mxu1  ;;  %v2505_v55 = vpop.f32.mrf.mxu0  ;;  %v2190_v13 = vadd.f32 %v4997_v6, %v1988_v3  ;;  %v1989_v14 = vadd.f32 %v5014_v10, %v4910_v15  ;;  %v2188_v45 = vadd.f32 %v5001_v35, %v1986_v7 }
 0x1ec   : > { %v2863_v18 = vadd.f32 %v2862_v41, %v2832_v46  ;;  %v2794_v0 = vadd.f32 %v2793_v28, %v2603_v36  ;;  %v2607_v17 = vadd.f32 %v3745_v27, %v2398_v12  ;;  %v2396_v50 = vadd.f32 %v2283_v42, %v2184_v1 }
 0x1ed   : > { %v3714_v52 = vpop.f32.mrf.mxu1  ;;  %v2834_v56 = vmul.f32 %v2604_v31, %v2604_v31  ;;  %v3749_v53 = vpop.f32.mrf.mxu0  ;;  %v2836_v1 = vmul.f32 %v2606_v24, %v2606_v24 }
 0x1ee   : > { %v2795_v19 = vadd.f32 %v2794_v0, %v2604_v31  ;;  %v2864_v49 = vadd.f32 %v2863_v18, %v2833_v47  ;;  %v3234_v44 = vpack.c.bf16 %v2607_v17, %v2606_v24  ;;  %v2605_v60 = vadd.f32 %v2492_v2, %v2396_v50 }
 0x1ef   : > { %v2296_v29 = vpop.f32.mrf.mxu1  ;;  %v2401_v36 = vadd.f32 %v3714_v52, %v5003_v11  ;;  %v2508_v43 = vpop.f32.mrf.mxu0  ;;  %v1992_v2 = vadd.f32 %v5020_v33, %v4913_v51  ;;  %v1990_v51 = vadd.f32 %v5022_v57, %v4916_v30  ;;  %v2191_v18 = vadd.f32 %v5009_v54, %v1989_v14 }
 0x1f0   : > { %v2865_v23 = vadd.f32 %v2864_v49, %v2834_v56  ;;  %3298 = vst [vmem:[%s5102_s14 + $0x18] sm:$0xff] %v3234_v44   ;;  %v2399_v27 = vadd.f32 %v2296_v29, %v2187_v25  ;;  %v3229_v61 = vpack.c.bf16 %v2605_v60, %v2604_v31  ;;  %v2796_v40 = vadd.f32 %v2795_v19, %v2605_v60 }
 0x1f1   : > { %v2835_v5 = vmul.f32 %v2605_v60, %v2605_v60  ;;  %v3715_v58 = vpop.f32.mrf.mxu1  ;;  %v3752_v8 = vpop.f32.mrf.mxu0  ;;  %v2610_v41 = vadd.f32 %v3748_v16, %v2401_v36  ;;  %v2837_v31 = vmul.f32 %v2607_v17, %v2607_v17  ;;  %v2194_v7 = vadd.f32 %v5012_v32, %v1992_v2 }
 0x1f2   : > { %v2402_v22 = vadd.f32 %v3715_v58, %v2190_v13  ;;  %3297 = vst [vmem:[%s5102_s14 + $0x10] sm:$0xff] %v3229_v61   ;;  %v2797_v11 = vadd.f32 %v2796_v40, %v2606_v24  ;;  %v2608_v6 = vadd.f32 %v2505_v55, %v2399_v27  ;;  %v1993_v54 = vadd.f32 %v5029_v9, %v4922_v48 }
 0x1f3   : > { %v2866_v46 = vadd.f32 %v2865_v23, %v2835_v5  ;;  %v2299_v28 = vpop.f32.mrf.mxu1  ;;  %v2521_v47 = vpop.f32.mrf.mxu0  ;;  %v1996_v44 = vadd.f32 %v5035_v38, %v4925_v21  ;;  %v2192_v32 = vadd.f32 %v5016_v26, %v1990_v51  ;;  %v2840_v29 = vmul.f32 %v2610_v41, %v2610_v41  ;;  %v5321_v51 = vld [vmem:[#allocation19_spill] sm:$0xff] }
 0x1f4   : > { %v2611_v12 = vadd.f32 %v3749_v53, %v2402_v22  ;;  %v2400_v3 = vadd.f32 %v2299_v28, %v2188_v45  ;;  %v2798_v10 = vadd.f32 %v2797_v11, %v2607_v17  ;;  %v2838_v50 = vmul.f32 %v2608_v6, %v2608_v6 }
 0x1f5   : > { %v2867_v15 = vadd.f32 %v2866_v46, %v2836_v1  ;;  %v3718_v42 = vpop.f32.mrf.mxu1  ;;  %v3753_v24 = vpop.f32.mrf.mxu0  ;;  %v1994_v21 = vadd.f32 %v5037_v63, %v4928_v62  ;;  %v2195_v14 = vadd.f32 %v5024_v20, %v1993_v54  ;;  %v2198_v11 = vadd.f32 %v5027_v4, %v1996_v44  ;;  %v5324_v54 = vld [vmem:[#allocation4_spill] sm:$0xff] }
 0x1f6   : > { %v3244_v35 = vpack.c.bf16 %v2611_v12, %v2610_v41  ;;  %v2609_v33 = vadd.f32 %v2508_v43, %v2400_v3  ;;  %v2799_v0 = vadd.f32 %v2798_v10, %v2608_v6  ;;  %v2405_v17 = vadd.f32 %v3718_v42, %v5018_v34 }
 0x1f7   : > { %v2868_v16 = vadd.f32 %v2867_v15, %v2837_v31  ;;  %v2312_v55 = vpop.f32.mrf.mxu1  ;;  %v2524_v56 = vpop.f32.mrf.mxu0  ;;  %v2841_v5 = vmul.f32 %v2611_v12, %v2611_v12  ;;  %v5319_v31 = vld [vmem:[#allocation10_spill] sm:$0xff]  ;;  %v5320_v15 = vld [vmem:[#allocation9_spill] sm:$0xff]  ;;  %v2196_v4 = vadd.f32 %v5321_v51, %v1994_v21  ;;  %v5327_v21 = vld [vmem:[#allocation15_spill] sm:$0xff] }
 0x1f8   : > { %3300 = vst [vmem:[%s5102_s14 + $0x28] sm:$0xff] %v3244_v35   ;;  %v3239_v52 = vpack.c.bf16 %v2609_v33, %v2608_v6  ;;  %v2839_v25 = vmul.f32 %v2609_v33, %v2609_v33  ;;  %v2403_v19 = vadd.f32 %v2312_v55, %v2191_v18  ;;  %v2800_v57 = vadd.f32 %v2799_v0, %v2609_v33 }
 0x1f9   : > { %v2869_v30 = vadd.f32 %v2868_v16, %v2838_v50  ;;  %v3719_v49 = vpop.f32.mrf.mxu1  ;;  %v3756_v60 = vpop.f32.mrf.mxu0  ;;  %v2614_v13 = vadd.f32 %v3752_v8, %v2405_v17  ;;  %v2000_v10 = vadd.f32 %v5320_v15, %v5319_v31  ;;  %v5331_v15 = vld [vmem:[#allocation17_spill] sm:$0xff] }
 0x1fa   : > { %3299 = vst [vmem:[%s5102_s14 + $0x20] sm:$0xff] %v3239_v52   ;;  %v2406_v53 = vadd.f32 %v3719_v49, %v2194_v7  ;;  %v2801_v23 = vadd.f32 %v2800_v57, %v2610_v41  ;;  %v2612_v34 = vadd.f32 %v2521_v47, %v2403_v19  ;;  %v5318_v47 = vld [vmem:[#allocation7_spill] sm:$0xff]  ;;  %v5322_v19 = vld [vmem:[#allocation12_spill] sm:$0xff] }
 0x1fb   : > { %v2870_v36 = vadd.f32 %v2869_v30, %v2839_v25  ;;  %v2315_v27 = vpop.f32.mrf.mxu1  ;;  %v2537_v40 = vpop.f32.mrf.mxu0  ;;  %v1997_v20 = vadd.f32 %v5044_v37, %v5318_v47  ;;  %v2844_v33 = vmul.f32 %v2614_v13, %v2614_v13 }
 0x1fc   : > { %v2615_v43 = vadd.f32 %v3753_v24, %v2406_v53  ;;  %v2404_v61 = vadd.f32 %v2315_v27, %v2192_v32  ;;  %v2802_v9 = vadd.f32 %v2801_v23, %v2611_v12  ;;  %v2842_v45 = vmul.f32 %v2612_v34, %v2612_v34 }
 0x1fd   : > { %v2871_v48 = vadd.f32 %v2870_v36, %v2840_v29  ;;  %v3722_v58 = vpop.f32.mrf.mxu1  ;;  %v3757_v2 = vpop.f32.mrf.mxu0  ;;  %v2199_v44 = vadd.f32 %v5324_v54, %v1997_v20  ;;  %v5325_v36 = vld [vmem:[#allocation8_spill] sm:$0xff]  ;;  %v5337_v54 = vld [vmem:[#allocation27_spill] sm:$0xff] }
 0x1fe   : > { %v3254_v38 = vpack.c.bf16 %v2615_v43, %v2614_v13  ;;  %v2613_v26 = vadd.f32 %v2524_v56, %v2404_v61  ;;  %v2803_v22 = vadd.f32 %v2802_v9, %v2612_v34  ;;  %v2409_v28 = vadd.f32 %v3722_v58, %v5033_v39  ;;  %v5323_v56 = vld [vmem:[#allocation13_spill] sm:$0xff] }
 0x1ff   : > { %v2872_v8 = vadd.f32 %v2871_v48, %v2841_v5  ;;  %v2328_v1 = vpop.f32.mrf.mxu1  ;;  %v2540_v12 = vpop.f32.mrf.mxu0  ;;  %v2845_v52 = vmul.f32 %v2615_v43, %v2615_v43  ;;  %v1998_v30 = vadd.f32 %v5323_v56, %v5322_v19 }
 0x200   : > { %3302 = vst [vmem:[%s5102_s14 + $0x38] sm:$0xff] %v3254_v38   ;;  %v3249_v46 = vpack.c.bf16 %v2613_v26, %v2612_v34  ;;  %v2843_v6 = vmul.f32 %v2613_v26, %v2613_v26  ;;  %v2407_v41 = vadd.f32 %v2328_v1, %v2195_v14  ;;  %v2804_v63 = vadd.f32 %v2803_v22, %v2613_v26  ;;  %v5328_v26 = vld [vmem:[#allocation16_spill] sm:$0xff]  ;;  %v5329_v14 = vld [vmem:[#allocation23_spill] sm:$0xff] }
 0x201   : > { %v2873_v62 = vadd.f32 %v2872_v8, %v2842_v45  ;;  %v3723_v3 = vpop.f32.mrf.mxu1  ;;  %v3760_v35 = vpop.f32.mrf.mxu0  ;;  %v2618_v50 = vadd.f32 %v3756_v60, %v2409_v28  ;;  %v2202_v34 = vadd.f32 %v5325_v36, %v2000_v10  ;;  %v2001_v38 = vadd.f32 %v5059_v59, %v5327_v21  ;;  %v5330_v45 = vld [vmem:[#allocation11_spill] sm:$0xff]  ;;  %v5332_v10 = vld [vmem:[#allocation24_spill] sm:$0xff] }
 0x202   : > { %3301 = vst [vmem:[%s5102_s14 + $0x30] sm:$0xff] %v3249_v46   ;;  %v2410_v42 = vadd.f32 %v3723_v3, %v2198_v11  ;;  %v2805_v18 = vadd.f32 %v2804_v63, %v2614_v13  ;;  %v2616_v39 = vadd.f32 %v2537_v40, %v2407_v41  ;;  %v2200_v8 = vadd.f32 %v5330_v45, %v1998_v30 }
 0x203   : > { %v2874_v24 = vadd.f32 %v2873_v62, %v2843_v6  ;;  %v2331_v0 = vpop.f32.mrf.mxu1  ;;  %v2553_v7 = vpop.f32.mrf.mxu0  ;;  %v2848_v11 = vmul.f32 %v2618_v50, %v2618_v50 }
 0x204   : > { %v2619_v16 = vadd.f32 %v3757_v2, %v2410_v42  ;;  %v2408_v55 = vadd.f32 %v2331_v0, %v2196_v4  ;;  %v2806_v25 = vadd.f32 %v2805_v18, %v2615_v43  ;;  %v2846_v29 = vmul.f32 %v2616_v39, %v2616_v39  ;;  %v5326_v43 = vld [vmem:[#allocation6_spill] sm:$0xff] }
 0x205   : > { %v2875_v37 = vadd.f32 %v2874_v24, %v2844_v33  ;;  %v3726_v17 = vpop.f32.mrf.mxu1  ;;  %v3761_v53 = vpop.f32.mrf.mxu0  ;;  %v2004_v2 = vadd.f32 %v5329_v14, %v5328_v26  ;;  %v2002_v42 = vadd.f32 %v5332_v10, %v5331_v15  ;;  %v5333_v33 = vld [vmem:[#allocation14_spill] sm:$0xff] }
 0x206   : > { %v3264_v57 = vpack.c.bf16 %v2619_v16, %v2618_v50  ;;  %v2617_v49 = vadd.f32 %v2540_v12, %v2408_v55  ;;  %v2807_v32 = vadd.f32 %v2806_v25, %v2616_v39  ;;  %v2413_v61 = vadd.f32 %v3726_v17, %v5326_v43  ;;  %v5334_v55 = vld [vmem:[#allocation5_spill] sm:$0xff] }
 0x207   : > { %v2876_v60 = vadd.f32 %v2875_v37, %v2845_v52  ;;  %v2344_v23 = vpop.f32.mrf.mxu1  ;;  %v2556_v5 = vpop.f32.mrf.mxu0  ;;  %v2849_v47 = vmul.f32 %v2619_v16, %v2619_v16  ;;  %v2203_v18 = vadd.f32 %v5333_v33, %v2001_v38  ;;  %v5346_v33 = vld [vmem:[#allocation28_spill] sm:$0xff] }
 0x208   : > { %3304 = vst [vmem:[%s5102_s14 + $0x48] sm:$0xff] %v3264_v57   ;;  %v3259_v27 = vpack.c.bf16 %v2617_v49, %v2616_v39  ;;  %v2847_v13 = vmul.f32 %v2617_v49, %v2617_v49  ;;  %v2411_v40 = vadd.f32 %v2344_v23, %v2199_v44  ;;  %v2808_v9 = vadd.f32 %v2807_v32, %v2617_v49  ;;  %v5336_v49 = vld [vmem:[#allocation20_spill] sm:$0xff]  ;;  %v5339_v32 = vld [vmem:[#allocation30_spill] sm:$0xff]  ;;  %v5340_v23 = vld [vmem:[#allocation21_spill] sm:$0xff] }
 0x209   : > { %v2877_v48 = vadd.f32 %v2876_v60, %v2846_v29  ;;  %v3727_v58 = vpop.f32.mrf.mxu1  ;;  %v3764_v1 = vpop.f32.mrf.mxu0  ;;  %v2622_v12 = vadd.f32 %v3760_v35, %v2413_v61  ;;  %v2005_v44 = vadd.f32 %v5337_v54, %v5336_v49  ;;  %v2204_v36 = vadd.f32 %v5340_v23, %v2002_v42 }
 0x20a   : > { %3303 = vst [vmem:[%s5102_s14 + $0x40] sm:$0xff] %v3259_v27   ;;  %v2414_v22 = vadd.f32 %v3727_v58, %v2202_v34  ;;  %v2809_v46 = vadd.f32 %v2808_v9, %v2618_v50  ;;  %v2620_v28 = vadd.f32 %v2553_v7, %v2411_v40  ;;  %v2206_v7 = vadd.f32 %v5334_v55, %v2004_v2  ;;  %v5341_v2 = vld [vmem:[#allocation3_spill] sm:$0xff] }
 0x20b   : > { %v2878_v6 = vadd.f32 %v2877_v48, %v2847_v13  ;;  %v2347_v41 = vpop.f32.mrf.mxu1  ;;  %v2569_v3 = vpop.f32.mrf.mxu0  ;;  %v2852_v27 = vmul.f32 %v2622_v12, %v2622_v12 }
 0x20c   : > { %v2623_v62 = vadd.f32 %v3761_v53, %v2414_v22  ;;  %v2412_v63 = vadd.f32 %v2347_v41, %v2200_v8  ;;  %v2810_v20 = vadd.f32 %v2809_v46, %v2619_v16  ;;  %v2850_v0 = vmul.f32 %v2620_v28, %v2620_v28  ;;  %v5335_v16 = vld [vmem:[#allocation22_spill] sm:$0xff]  ;;  %v5342_v22 = vld [vmem:[#allocation31_spill] sm:$0xff]  ;;  %v5343_v46 = vld [vmem:[#allocation25_spill] sm:$0xff] }
 0x20d   : > { %v2879_v59 = vadd.f32 %v2878_v6, %v2848_v11  ;;  %v3730_v31 = vpop.f32.mrf.mxu1  ;;  %v3765_v24 = vpop.f32.mrf.mxu0  ;;  %v5338_v53 = vld [vmem:[#allocation18_spill] sm:$0xff]  ;;  %v2006_v45 = vadd.f32 %v5342_v22, %v5341_v2  ;;  %v2207_v6 = vadd.f32 %v5343_v46, %v2005_v44 }
 0x20e   : > { %v3274_v51 = vpack.c.bf16 %v2623_v62, %v2622_v12  ;;  %v2621_v4 = vadd.f32 %v2556_v5, %v2412_v63  ;;  %v2811_v39 = vadd.f32 %v2810_v20, %v2620_v28  ;;  %v2417_v25 = vadd.f32 %v3730_v31, %v5335_v16  ;;  %v5344_v63 = vld [vmem:[#allocation26_spill] sm:$0xff] }
 0x20f   : > { %v2880_v35 = vadd.f32 %v2879_v59, %v2849_v47  ;;  %v2360_v50 = vpop.f32.mrf.mxu1  ;;  %v2572_v19 = vpop.f32.mrf.mxu0  ;;  %v2008_v29 = vadd.f32 %v5339_v32, %v5338_v53  ;;  %v2853_v58 = vmul.f32 %v2623_v62, %v2623_v62 }
 0x210   : > { %3306 = vst [vmem:[%s5102_s14 + $0x58] sm:$0xff] %v3274_v51   ;;  %v3269_v52 = vpack.c.bf16 %v2621_v4, %v2620_v28  ;;  %v2851_v37 = vmul.f32 %v2621_v4, %v2621_v4  ;;  %v2415_v17 = vadd.f32 %v2360_v50, %v2203_v18  ;;  %v2812_v30 = vadd.f32 %v2811_v39, %v2621_v4 }
 0x211   : > { %v2881_v56 = vadd.f32 %v2880_v35, %v2850_v0  ;;  %v3731_v57 = vpop.f32.mrf.mxu1  ;;  %v3768_v34 = vpop.f32.mrf.mxu0  ;;  %v2626_v5 = vadd.f32 %v3764_v1, %v2417_v25  ;;  %v2208_v18 = vadd.f32 %v5346_v33, %v2006_v45 }
 0x212   : > { %3305 = vst [vmem:[%s5102_s14 + $0x50] sm:$0xff] %v3269_v52   ;;  %v2418_v60 = vadd.f32 %v3731_v57, %v2206_v7  ;;  %v2813_v13 = vadd.f32 %v2812_v30, %v2622_v12  ;;  %v2624_v61 = vadd.f32 %v2569_v3, %v2415_v17  ;;  %v2210_v3 = vadd.f32 %v5344_v63, %v2008_v29 }
 0x213   : > { %v2882_v43 = vadd.f32 %v2881_v56, %v2851_v37  ;;  %v2363_v40 = vpop.f32.mrf.mxu1  ;;  %v2585_v14 = vpop.f32.mrf.mxu0 }
 0x214   : > { %v2627_v48 = vadd.f32 %v3765_v24, %v2418_v60  ;;  %v2416_v9 = vadd.f32 %v2363_v40, %v2204_v36  ;;  %v2814_v38 = vadd.f32 %v2813_v13, %v2623_v62  ;;  %v2854_v41 = vmul.f32 %v2624_v61, %v2624_v61  ;;  %v5345_v62 = vld [vmem:[#allocation29_spill] sm:$0xff] }
 0x215   : > { %v2883_v21 = vadd.f32 %v2882_v43, %v2852_v27  ;;  %v3734_v26 = vpop.f32.mrf.mxu1  ;;  %v3769_v42 = vpop.f32.mrf.mxu0  ;;  %v2856_v24 = vmul.f32 %v2626_v5, %v2626_v5 }
 0x216   : > { %v3284_v8 = vpack.c.bf16 %v2627_v48, %v2626_v5  ;;  %v2625_v11 = vadd.f32 %v2572_v19, %v2416_v9  ;;  %v2815_v28 = vadd.f32 %v2814_v38, %v2624_v61  ;;  %v2421_v20 = vadd.f32 %v3734_v26, %v5345_v62 }
 0x217   : > { %v2884_v12 = vadd.f32 %v2883_v21, %v2853_v58  ;;  %v2376_v1 = vpop.f32.mrf.mxu1  ;;  %v2857_v37 = vmul.f32 %v2627_v48, %v2627_v48  ;;  %v2588_v17 = vpop.f32.mrf.mxu0 }
 0x218   : > { %3308 = vst [vmem:[%s5102_s14 + $0x68] sm:$0xff] %v3284_v8   ;;  %v3279_v47 = vpack.c.bf16 %v2625_v11, %v2624_v61  ;;  %v2855_v59 = vmul.f32 %v2625_v11, %v2625_v11  ;;  %v2419_v31 = vadd.f32 %v2376_v1, %v2207_v6  ;;  %v2816_v10 = vadd.f32 %v2815_v28, %v2625_v11 }
 0x219   : > { %v2885_v15 = vadd.f32 %v2884_v12, %v2854_v41  ;;  %v3735_v51 = vpop.f32.mrf.mxu1  ;;  %v2630_v55 = vadd.f32 %v3768_v34, %v2421_v20 }
 0x21a   : > { %3307 = vst [vmem:[%s5102_s14 + $0x60] sm:$0xff] %v3279_v47   ;;  %v2422_v4 = vadd.f32 %v3735_v51, %v2210_v3  ;;  %v2817_v39 = vadd.f32 %v2816_v10, %v2626_v5  ;;  %v2628_v35 = vadd.f32 %v2585_v14, %v2419_v31 }
 0x21b   : > { %v2886_v0 = vadd.f32 %v2885_v15, %v2855_v59  ;;  %v2379_v50 = vpop.f32.mrf.mxu1  ;;  %v2860_v29 = vmul.f32 %v2630_v55, %v2630_v55 }
 0x21c   : > { %v2631_v7 = vadd.f32 %v3769_v42, %v2422_v4  ;;  %v2420_v52 = vadd.f32 %v2379_v50, %v2208_v18  ;;  %v2818_v25 = vadd.f32 %v2817_v39, %v2627_v48  ;;  %v2858_v57 = vmul.f32 %v2628_v35, %v2628_v35 }
 0x21d   : > { %v2887_v16 = vadd.f32 %v2886_v0, %v2856_v24 }
 0x21e   : > { %v3294_v19 = vpack.c.bf16 %v2631_v7, %v2630_v55  ;;  %v2629_v56 = vadd.f32 %v2588_v17, %v2420_v52  ;;  %v2819_v30 = vadd.f32 %v2818_v25, %v2628_v35  ;;  %v2861_v36 = vmul.f32 %v2631_v7, %v2631_v7 }
 0x21f   : > { %v2888_v49 = vadd.f32 %v2887_v16, %v2857_v37 }
 0x220   : > { %3310 = vst [vmem:[%s5102_s14 + $0x78] sm:$0xff] %v3294_v19   ;;  %v3289_v54 = vpack.c.bf16 %v2629_v56, %v2628_v35  ;;  %v2859_v44 = vmul.f32 %v2629_v56, %v2629_v56  ;;  %v2820_v32 = vadd.f32 %v2819_v30, %v2629_v56 }
 0x221   : > { %v2889_v53 = vadd.f32 %v2888_v49, %v2858_v57 }
 0x222   : > { %3309 = vst [vmem:[%s5102_s14 + $0x70] sm:$0xff] %v3289_v54   ;;  %v2821_v60 = vadd.f32 %v2820_v32, %v2630_v55 }
 0x223   : > { %v2890_v23 = vadd.f32 %v2889_v53, %v2859_v44 }
 0x224   : > { %v2822_v34 = vadd.f32 %v2821_v60, %v2631_v7 }
 0x225   : > { %v2891_v27 = vadd.f32 %v2890_v23, %v2860_v29 }
 0x226   : > { %v2823_v13 = vrot.slane %v2822_v34, 4 }
 0x227   : > { %v2892_v43 = vadd.f32 %v2891_v27, %v2861_v36 }
 0x228   : > { %v2824_v61 = vadd.f32 %v2823_v13, %v2822_v34 }
 0x229   : > { %v2893_v40 = vrot.slane %v2892_v43, 4 }
 0x22a   : > { %v2825_v5 = vrot.slane %v2824_v61, 2 }
 0x22b   : > { %v2894_v48 = vadd.f32 %v2893_v40, %v2892_v43 }
 0x22c   : > { %v2826_v9 = vadd.f32 %v2825_v5, %v2824_v61 }
 0x22d   : > { %v2895_v58 = vrot.slane %v2894_v48, 2 }
 0x22e   : > { %v2827_v21 = vrot.slane %v2826_v9, 1 }
 0x22f   : > { %v2896_v38 = vadd.f32 %v2895_v58, %v2894_v48 }
 0x230   : > { %v2828_v26 = vadd.f32 %v2827_v21, %v2826_v9 }
 0x231   : > { %v2897_v14 = vrot.slane %v2896_v38, 1 }
 0x232   : > { %2829 = vst [vmem:[%s181_s18] sm:$0x1] %v2828_v26 }
 0x233   : > { %v2898_v2 = vadd.f32 %v2897_v14, %v2896_v38 }
 0x235   : > { %2899 = vst [vmem:[%s181_s18 + $0x1] sm:$0x1] %v2898_v2 }
 0x236 PF: > { %s14_s12 = sadd.s32 1, %s3797_s12  }
 0x237   : > { %p11_p4 = scmp.ge.s32.totalorder %s14_s12, 4  }
 0x239   :  { %13 = sbr.rel (!%p11_p4) target bundleno = 1 (0x1), region = 79 }

// kernel: branch_separables_stem.4
= control target key start
LH: loop header
LB: loop body
LE: loop exit
PB: predicated region body
PF: predicated region fallthrough
CT: control target
= control target key end

     0   :  { %s3635_s18 = smov 0   ;;  %s5018_s0 = inlined_call_operand.vmem [shape: bf16[2,16,16,128], index: 0, kind: input, shape index: {}]   ;;  %s5019_s1 = inlined_call_operand.vmem [shape: f32[1,128], index: 1, kind: input, shape index: {}]   ;;  %s5020_s2 = inlined_call_operand.vmem [shape: f32[1,128], index: 2, kind: input, shape index: {}]   ;;  %s5021_s3 = inlined_call_operand.vmem [shape: bf16[1152,128], index: 3, kind: input, shape index: {}]   ;;  %s5022_s4 = inlined_call_operand.vmem [shape: bf16[2,256,128], index: 4, kind: output, shape index: {0}]   ;;  %s5023_s5 = inlined_call_operand.vmem [shape: f32[2,2,128], index: 5, kind: output, shape index: {1}]  }
   0x1 LB: > { %s2649_s19 = sadd.s32 4294967295, %s3601_s18   ;;  %p2653_p0 = scmp.ge.s32.totalorder %s3601_s18, 1  ;;  %s3601_s18 = sphi %s3635_s18, %s16_s18  }
   0x2   : > { %p190_p1 = scmp.lt.s32.totalorder %s3601_s18, 3 }
   0x4   : > { %p191_p2 = pnand %p2653_p0, %p190_p1 }
   0x6   : > { %194 = sbr.rel (%p191_p2) target bundleno = 554 (0x22a), region = 36 }
   0xb   : > { %v3520_v0 = vld [vmem:[%s5021_s3 + $0x78] sm:$0xff]   ;;  %v3603_v2 = vmov 0.0   ;;  %v3522_v3 = vld [vmem:[%s5021_s3 + $0x70] sm:$0xff]   ;;  %v3524_v5 = vld [vmem:[%s5021_s3 + $0x68] sm:$0xff]   ;;  %p222_p3 = scmp.lt.s32.totalorder %s2649_s19, 1  ;;  %vm600_vm0 = vcmask 1046528  }
   0xc   : > { %v3521_v1 = vld [vmem:[%s5021_s3 + $0x38] sm:$0xff]   ;;  %237 = vst [vmem:[#allocation2] sm:$0xff] %v3603_v2  ;;  %239 = vst [vmem:[#allocation2 + $0x10] sm:$0x3] %v3603_v2  ;;  %2975 = vmatprep.subr.bf16.mxu0 %v3520_v0  ;;  %3495 = vmatprep.subr.bf16.mxu1 %v3520_v0  ;;  %v3523_v4 = vld [vmem:[%s5021_s3 + $0x30] sm:$0xff]   ;;  %v601_v10 = vrot.slane %v3603_v2, 1 }
   0xd   : > { %240 = vst [vmem:[#allocation2 + $0x18] sm:$0xff] %v3603_v2  ;;  %241 = vst [vmem:[#allocation2 + $0x20] sm:$0xff] %v3603_v2  ;;  %2976 = vmatpush3.bf16.msra.mxu0 %v3521_v1  ;;  %3503 = vmatpush3.bf16.msra.mxu1 %v3521_v1  ;;  %v3525_v6 = vld [vmem:[%s5021_s3 + $0x28] sm:$0xff]   ;;  %s5078_s19 = smov (!%p222_p3, %s2649_s19), 1  ;;  %v3526_v7 = vld [vmem:[%s5021_s3 + $0x60] sm:$0xff]   ;;  %vm713_vm1 = vcmask 1045504  }
   0xe   : > { %242 = vst [vmem:[#allocation2 + $0x28] sm:$0x3] %v3603_v2  ;;  %243 = vst [vmem:[#allocation2 + $0x30] sm:$0xff] %v3603_v2  ;;  %2977 = vmatprep.subr.bf16.mxu0 %v3522_v3  ;;  %3496 = vmatprep.subr.bf16.mxu1 %v3522_v3  ;;  %s2767_s9 = sshll.u32 %s5078_s19, 7  ;;  %v3527_v8 = vld [vmem:[%s5021_s3 + $0x20] sm:$0xff]   ;;  %v3528_v9 = vld [vmem:[%s5021_s3 + $0x58] sm:$0xff]  }
   0xf   : > { %244 = vst [vmem:[#allocation2 + $0x38] sm:$0xff] %v3603_v2  ;;  %245 = vst [vmem:[#allocation2 + $0x40] sm:$0x3] %v3603_v2  ;;  %s3734_s16 = scalar_lea.vmem %s5018_s0, %s2767_s9  ;;  %v3529_v11 = vld [vmem:[%s5021_s3 + $0x18] sm:$0xff]   ;;  %v3530_v12 = vld [vmem:[%s5021_s3 + $0x50] sm:$0xff]   ;;  %s4918_s28 = scalar_lea.vmem %s5022_s4, %s2767_s9 }
  0x10   : > { %246 = vst [vmem:[#allocation2 + $0x48] sm:$0xff] %v3603_v2  ;;  %247 = vst [vmem:[#allocation2 + $0x50] sm:$0xff] %v3603_v2  ;;  %v2955_v14 = vld [vmem:[%s3734_s16 + $0x58] sm:$0xff]   ;;  %v3748_v15 = vld [vmem:[%s5019_s1] ss:$0 sm:$0xff]  ;;  %s2658_s9 = sshll.u32 %s5078_s19, 1 }
  0x11   : > { %248 = vst [vmem:[#allocation2 + $0x58] sm:$0x3] %v3603_v2  ;;  %249 = vst [vmem:[#allocation2 + $0x60] sm:$0xff] %v3603_v2  ;;  %2978 = vmatpush3.bf16.msra.mxu0 %v3523_v4  ;;  %3504 = vmatpush3.bf16.msra.mxu1 %v3523_v4  ;;  %v2847_v17 = vunpack.c.l.bf16 %v2955_v14  ;;  %v2848_v18 = vunpack.c.h.bf16 %v2955_v14  ;;  %v3754_v19 = vld [vmem:[%s5020_s2] ss:$0 sm:$0xff]  ;;  %v3531_v20 = vld [vmem:[%s5021_s3 + $0x10] sm:$0xff]   ;;  %s235_s6 = scalar_lea.vmem %s5023_s5, %s2658_s9 }
  0x12   : > { %250 = vst [vmem:[#allocation2 + $0x68] sm:$0xff] %v3603_v2  ;;  %251 = vst [vmem:[#allocation2 + $0x70] sm:$0x3] %v3603_v2  ;;  %2979 = vmatprep.subr.bf16.mxu0 %v3524_v5  ;;  %3497 = vmatprep.subr.bf16.mxu1 %v3524_v5  ;;  %v3532_v23 = vld [vmem:[%s5021_s3 + $0x48] sm:$0xff]   ;;  %v3534_v29 = vld [vmem:[%s5021_s3 + $0x40] sm:$0xff]  }
  0x13   : > { %252 = vst [vmem:[#allocation2 + $0x78] sm:$0xff] %v3603_v2  ;;  %253 = vst [vmem:[#allocation2 + $0x80] sm:$0xff] %v3603_v2  ;;  %v3742_v13 = vld [vmem:[#allocation2 + $0x10] sm:$0x3]  ;;  %v384_v22 = vmul.f32 %v2847_v17, %v3748_v15  ;;  %v385_v25 = vmul.f32 %v2848_v18, %v3748_v15  ;;  %v3533_v27 = vld [vmem:[%s5021_s3 + $0x8] sm:$0xff]  }
  0x14   : > { %254 = vst [vmem:[#allocation2 + $0x88] sm:$0x3] %v3603_v2  ;;  %255 = vst [vmem:[#allocation2 + $0x90] sm:$0xff] %v3603_v2  ;;  %v604_v16 = vrot.slane %v3742_v13, 1  ;;  %v2802_v31 = vld [vmem:[%s3734_s16] sm:$0xff]   ;;  %v3536_v41 = vld [vmem:[%s5021_s3 + $0xf8] sm:$0xff]  }
  0x15   : > { %256 = vst [vmem:[#allocation2 + $0x98] sm:$0xff] %v3603_v2  ;;  %257 = vst [vmem:[#allocation2 + $0xa0] sm:$0x3] %v3603_v2  ;;  %2980 = vmatpush3.bf16.msra.mxu0 %v3525_v6  ;;  %3505 = vmatpush3.bf16.msra.mxu1 %v3525_v6  ;;  %v423_v26 = vadd.f32 %v3754_v19, %v384_v22  ;;  %v424_v28 = vadd.f32 %v3754_v19, %v385_v25  ;;  %v2803_v33 = vunpack.c.l.bf16 %v2802_v31  ;;  %v2956_v35 = vld [vmem:[%s3734_s16 + $0x60] sm:$0xff]   ;;  %v3537_v44 = vld [vmem:[%s5021_s3 + $0x178] sm:$0xff]   ;;  %v3604_v6 = vmov 0.0|0.0  }
  0x16   : > { %258 = vst [vmem:[#allocation2 + $0xa8] sm:$0xff] %v3603_v2  ;;  %259 = vst [vmem:[#allocation2 + $0xb0] sm:$0xff] %v3603_v2  ;;  %2981 = vmatprep.subr.bf16.mxu0 %v3526_v7  ;;  %3498 = vmatprep.subr.bf16.mxu1 %v3526_v7  ;;  %v605_v21 = vsel %vm600_vm0, %v601_v10, %v604_v16  ;;  %v2804_v34 = vunpack.c.h.bf16 %v2802_v31  ;;  %v2851_v36 = vunpack.c.l.bf16 %v2956_v35  ;;  %v2852_v37 = vunpack.c.h.bf16 %v2956_v35  ;;  %v3535_v38 = vld [vmem:[%s5021_s3] sm:$0xff]   ;;  %v3539_v49 = vld [vmem:[%s5021_s3 + $0x138] sm:$0xff]  }
  0x17   : > { %260 = vst [vmem:[#allocation2 + $0xb8] sm:$0x3] %v3603_v2  ;;  %261 = vst [vmem:[#allocation2 + $0xc0] sm:$0xff] %v3603_v2  ;;  %v861_v24 = vpack.c.bf16 %v605_v21, %v601_v10  ;;  %v455_v30 = vmax.f32 %v423_v26, 0.0  ;;  %v456_v32 = vmax.f32 %v424_v28, 0.0  ;;  %v362_v39 = vmul.f32 %v2803_v33, %v3748_v15  ;;  %v2945_v52 = vld [vmem:[%s3734_s16 + $0x8] sm:$0xff]  }
  0x18   : > { %262 = vst [vmem:[#allocation2 + $0xc8] sm:$0xff] %v3603_v2  ;;  %263 = vst [vmem:[#allocation2 + $0xd0] sm:$0x3] %v3603_v2  ;;  %v363_v40 = vmul.f32 %v2804_v34, %v3748_v15  ;;  %v386_v42 = vmul.f32 %v2851_v36, %v3748_v15  ;;  %v387_v43 = vmul.f32 %v2852_v37, %v3748_v15  ;;  %v2957_v53 = vld [vmem:[%s3734_s16 + $0x68] sm:$0xff]   ;;  %v2807_v56 = vunpack.c.l.bf16 %v2945_v52  ;;  %v3545_v59 = vld [vmem:[%s5021_s3 + $0x170] sm:$0xff]  }
  0x19   : > { %264 = vst [vmem:[#allocation2 + $0xd8] sm:$0xff] %v3603_v2  ;;  %265 = vst [vmem:[#allocation2 + $0xe0] sm:$0xff] %v3603_v2  ;;  %2982 = vmatpush3.bf16.msra.mxu0 %v3527_v8  ;;  %3506 = vmatpush3.bf16.msra.mxu1 %v3527_v8  ;;  %v401_v45 = vadd.f32 %v3754_v19, %v362_v39  ;;  %v2808_v57 = vunpack.c.h.bf16 %v2945_v52  ;;  %v2855_v60 = vunpack.c.l.bf16 %v2957_v53  ;;  %v2856_v61 = vunpack.c.h.bf16 %v2957_v53  ;;  %v3547_v7 = vld [vmem:[%s5021_s3 + $0x130] sm:$0xff]   ;;  %v3538_v17 = vld [vmem:[%s5021_s3 + $0xb8] sm:$0xff]  }
  0x1a   : > { %266 = vst [vmem:[#allocation2 + $0xe8] sm:$0x3] %v3603_v2  ;;  %267 = vst [vmem:[#allocation2 + $0xf0] sm:$0xff] %v3603_v2  ;;  %2983 = vmatprep.subr.bf16.mxu0 %v3528_v9  ;;  %3499 = vmatprep.subr.bf16.mxu1 %v3528_v9  ;;  %v402_v46 = vadd.f32 %v3754_v19, %v363_v40  ;;  %v425_v47 = vadd.f32 %v3754_v19, %v386_v42  ;;  %v2958_v21 = vld [vmem:[%s3734_s16 + $0x70] sm:$0xff]   ;;  %v3553_v42 = vld [vmem:[%s5021_s3 + $0x168] sm:$0xff]  }
  0x1b   : > { %268 = vst [vmem:[#allocation2 + $0xf8] sm:$0xff] %v3603_v2  ;;  %269 = vst [vmem:[#allocation2 + $0x100] sm:$0x3] %v3603_v2  ;;  %1522 = vmatprep.mubr.bf16.mxu0 %v861_v24  ;;  %v426_v48 = vadd.f32 %v3754_v19, %v387_v43  ;;  %v433_v50 = vmax.f32 %v401_v45, 0.0  ;;  %v364_v1 = vmul.f32 %v2807_v56, %v3748_v15  ;;  %v3540_v26 = vld [vmem:[%s5021_s3 + $0xf0] sm:$0xff]   ;;  %v2859_v35 = vunpack.c.l.bf16 %v2958_v21 }
  0x1c   : > { %270 = vst [vmem:[#allocation2 + $0x108] sm:$0xff] %v3603_v2  ;;  %271 = vst [vmem:[#allocation2 + $0x110] sm:$0xff] %v3603_v2  ;;  %v434_v51 = vmax.f32 %v402_v46, 0.0  ;;  %v457_v54 = vmax.f32 %v425_v47, 0.0  ;;  %v365_v3 = vmul.f32 %v2808_v57, %v3748_v15  ;;  %v388_v8 = vmul.f32 %v2855_v60, %v3748_v15  ;;  %v3555_v57 = vld [vmem:[%s5021_s3 + $0x128] sm:$0xff]  }
  0x1d   : > { %272 = vst [vmem:[#allocation2 + $0x118] sm:$0x3] %v3603_v2  ;;  %273 = vst [vmem:[#allocation2 + $0x120] sm:$0xff] %v3603_v2  ;;  %2984 = vmatpush3.bf16.msra.mxu0 %v3529_v11  ;;  %3507 = vmatpush3.bf16.msra.mxu1 %v3529_v11  ;;  %v458_v55 = vmax.f32 %v426_v48, 0.0  ;;  %v403_v9 = vadd.f32 %v3754_v19, %v364_v1  ;;  %v389_v11 = vmul.f32 %v2856_v61, %v3748_v15  ;;  %v3543_v61 = vld [vmem:[%s5021_s3 + $0xa8] sm:$0xff]  }
  0x1e   : > { %274 = vst [vmem:[#allocation2 + $0x128] sm:$0xff] %v3603_v2  ;;  %275 = vst [vmem:[#allocation2 + $0x130] sm:$0x3] %v3603_v2  ;;  %2985 = vmatprep.subr.bf16.mxu0 %v3530_v12  ;;  %3500 = vmatprep.subr.bf16.mxu1 %v3530_v12  ;;  %v404_v10 = vadd.f32 %v3754_v19, %v365_v3  ;;  %v427_v18 = vadd.f32 %v3754_v19, %v388_v8 }
  0x1f   : > { %276 = vst [vmem:[#allocation2 + $0x138] sm:$0xff] %v3603_v2  ;;  %277 = vst [vmem:[#allocation2 + $0x140] sm:$0xff] %v3603_v2  ;;  %v428_v25 = vadd.f32 %v3754_v19, %v389_v11  ;;  %v390_v56 = vmul.f32 %v2859_v35, %v3748_v15 }
  0x20   : > { %278 = vst [vmem:[#allocation2 + $0x148] sm:$0x3] %v3603_v2  ;;  %279 = vst [vmem:[#allocation2 + $0x150] sm:$0xff] %v3603_v2  ;;  %v436_v24 = vmax.f32 %v404_v10, 0.0 }
  0x21   : > { %280 = vst [vmem:[#allocation2 + $0x158] sm:$0xff] %v3603_v2  ;;  %281 = vst [vmem:[#allocation2 + $0x160] sm:$0x3] %v3603_v2  ;;  %2986 = vmatpush3.bf16.msra.mxu0 %v3531_v20  ;;  %3508 = vmatpush3.bf16.msra.mxu1 %v3531_v20  ;;  %v2946_v20 = vld [vmem:[%s3734_s16 + $0x10] sm:$0xff]   ;;  %v460_v34 = vmax.f32 %v428_v25, 0.0 }
  0x22   : > { %282 = vst [vmem:[#allocation2 + $0x168] sm:$0xff] %v3603_v2  ;;  %283 = vst [vmem:[#allocation2 + $0x170] sm:$0xff] %v3603_v2  ;;  %2987 = vmatprep.subr.bf16.mxu0 %v3532_v23  ;;  %3501 = vmatprep.subr.bf16.mxu1 %v3532_v23  ;;  %v435_v23 = vmax.f32 %v403_v9, 0.0  ;;  %v2811_v28 = vunpack.c.l.bf16 %v2946_v20 }
  0x23   : > { %284 = vst [vmem:[#allocation2 + $0x178] sm:$0x3] %v3603_v2  ;;  %285 = vst [vmem:[#allocation2 + $0x180] sm:$0xff] %v3603_v2 }
  0x24   : > { %286 = vst [vmem:[#allocation2 + $0x188] sm:$0xff] %v3603_v2  ;;  %287 = vst [vmem:[#allocation2 + $0x190] sm:$0x3] %v3603_v2  ;;  %v366_v47 = vmul.f32 %v2811_v28, %v3748_v15 }
  0x25   : > { %290 = vst [vmem:[#allocation2 + $0x1a8] sm:$0x3] %v3603_v2  ;;  %488 = vst [vmem:[#allocation2 + $0x121] sm:$0xff] %v455_v30  ;;  %2988 = vmatpush3.bf16.msra.mxu0 %v3533_v27  ;;  %3509 = vmatpush3.bf16.msra.mxu1 %v3533_v27  ;;  %v459_v27 = vmax.f32 %v427_v18, 0.0  ;;  %v3541_v30 = vld [vmem:[%s5021_s3 + $0xb0] sm:$0xff]  }
  0x26   : > { %489 = vst [vmem:[#allocation2 + $0x129] sm:$0xff] %v456_v32  ;;  %2989 = vmatprep.subr.bf16.mxu0 %v3534_v29  ;;  %3502 = vmatprep.subr.bf16.mxu1 %v3534_v29  ;;  %466 = vst [vmem:[#allocation2 + $0x19] sm:$0xff] %v433_v50  ;;  %v2812_v29 = vunpack.c.h.bf16 %v2946_v20 }
  0x27   : > { %467 = vst [vmem:[#allocation2 + $0x21] sm:$0xff] %v434_v51  ;;  %490 = vst [vmem:[#allocation2 + $0x139] sm:$0xff] %v457_v54  ;;  %v3542_v51 = vld [vmem:[%s5021_s3 + $0xe8] sm:$0xff]  }
  0x28   : > { %491 = vst [vmem:[#allocation2 + $0x141] sm:$0xff] %v458_v55  ;;  %468 = vst [vmem:[#allocation2 + $0x31] sm:$0xff] %v435_v23  ;;  %v367_v52 = vmul.f32 %v2812_v29, %v3748_v15  ;;  %v405_v55 = vadd.f32 %v3754_v19, %v366_v47 }
  0x29   : > { %2990 = vmatpush3.bf16.msra.mxu0 %v3535_v38  ;;  %3510 = vmatpush3.bf16.msra.mxu1 %v3535_v38  ;;  %469 = vst [vmem:[#allocation2 + $0x39] sm:$0xff] %v436_v24  ;;  %492 = vst [vmem:[#allocation2 + $0x151] sm:$0xff] %v459_v27 }
  0x2a   : > { %3087 = vmatprep.subr.bf16.mxu1 %v3536_v41  ;;  %3199 = vmatprep.subr.bf16.mxu0 %v3537_v44  ;;  %v2860_v41 = vunpack.c.h.bf16 %v2958_v21  ;;  %493 = vst [vmem:[#allocation2 + $0x159] sm:$0xff] %v460_v34 }
  0x2c   : > { %v3797_v58 = vld [vmem:[#allocation2 + $0x120] sm:$0xff]  ;;  %1523 = vmatmul.mubr.bf16.vlgmr.msra.gmra.mxu0 %v3604_v6  ;;  %v391_v1 = vmul.f32 %v2860_v41, %v3748_v15  ;;  %v429_v6 = vadd.f32 %v3754_v19, %v390_v56 }
  0x2d   : > { %v3802_v62 = vld [vmem:[#allocation2 + $0x128] sm:$0xff]  ;;  %v3804_v63 = vld [vmem:[#allocation2 + $0x130] sm:$0x3]  ;;  %v661_v0 = vrot.slane %v3797_v58, 1  ;;  %3200 = vmatpush3.bf16.msra.mxu0 %v3539_v49  ;;  %v3840_v31 = vld [vmem:[#allocation2 + $0x18] sm:$0xff] }
  0x2e   : > { %v662_v4 = vrot.slane %v3802_v62, 1  ;;  %v664_v5 = vrot.slane %v3804_v63, 1  ;;  %v3822_v16 = vpack.c.bf16 %v3802_v62, %v3797_v58  ;;  %3201 = vmatprep.subr.bf16.mxu0 %v3545_v59  ;;  %v3842_v32 = vld [vmem:[#allocation2 + $0x20] sm:$0xff]  ;;  %v3844_v33 = vld [vmem:[#allocation2 + $0x28] sm:$0x3]  ;;  %v606_v36 = vrot.slane %v3840_v31, 1 }
  0x2f   : > { %v607_v37 = vrot.slane %v3842_v32, 1  ;;  %v609_v38 = vrot.slane %v3844_v33, 1  ;;  %v3850_v39 = vld [vmem:[#allocation2 + $0x138] sm:$0xff]  ;;  %v3852_v40 = vld [vmem:[#allocation2 + $0x140] sm:$0xff]  ;;  %v3857_v43 = vld [vmem:[#allocation2 + $0x148] sm:$0x3]  ;;  %v3863_v46 = vpack.c.bf16 %v3842_v32, %v3840_v31 }
  0x30   : > { %v663_v12 = vsel %vm600_vm0, %v661_v0, %v662_v4  ;;  %v665_v14 = vsel %vm600_vm0, %v662_v4, %v664_v5  ;;  %v666_v44 = vrot.slane %v3850_v39, 1  ;;  %v667_v45 = vrot.slane %v3852_v40, 1  ;;  %v3544_v4 = vld [vmem:[%s5021_s3 + $0xe0] sm:$0xff]   ;;  %v3900_v8 = vld [vmem:[#allocation2 + $0x30] sm:$0xff]  ;;  %v3902_v9 = vld [vmem:[#allocation2 + $0x38] sm:$0xff] }
  0x31   : > { %v3830_v22 = vpack.c.bf16 %v665_v14, %v663_v12  ;;  %3202 = vmatpush3.bf16.msra.mxu0 %v3547_v7  ;;  %v608_v48 = vsel %vm600_vm0, %v606_v36, %v607_v37  ;;  %v610_v49 = vsel %vm600_vm0, %v607_v37, %v609_v38  ;;  %v669_v50 = vrot.slane %v3857_v43, 1  ;;  %v2947_v7 = vld [vmem:[%s3734_s16 + $0x18] sm:$0xff]   ;;  %v3904_v10 = vld [vmem:[#allocation2 + $0x40] sm:$0x3]  ;;  %v3911_v23 = vld [vmem:[#allocation2 + $0x150] sm:$0xff] }
  0x32   : > { %3203 = vmatprep.subr.bf16.mxu0 %v3553_v42  ;;  %v3873_v53 = vpack.c.bf16 %v610_v49, %v608_v48  ;;  %v668_v54 = vsel %vm600_vm0, %v666_v44, %v667_v45  ;;  %v3884_v60 = vpack.c.bf16 %v3852_v40, %v3850_v39  ;;  %v406_v0 = vadd.f32 %v3754_v19, %v367_v52  ;;  %v3914_v24 = vld [vmem:[#allocation2 + $0x158] sm:$0xff]  ;;  %v3916_v25 = vld [vmem:[#allocation2 + $0x160] sm:$0x3] }
  0x33   : > { %5039 = vst [vmem:[#allocation3_spill] sm:$0xff] %v3830_v22  ;;  %1618 = vmatprep.mubr.bf16.mxu1 %v3830_v22  ;;  %v670_v59 = vsel %vm600_vm0, %v667_v45, %v669_v50  ;;  %v437_v5 = vmax.f32 %v405_v55, 0.0  ;;  %v430_v12 = vadd.f32 %v3754_v19, %v391_v1  ;;  %v2815_v14 = vunpack.c.l.bf16 %v2947_v7  ;;  %v3548_v38 = vld [vmem:[%s5021_s3 + $0xd8] sm:$0xff]   ;;  %v3560_v50 = vld [vmem:[%s5021_s3 + $0x160] sm:$0xff]   ;;  %v2949_v1 = vld [vmem:[%s3734_s16 + $0x28] sm:$0xff]  }
  0x34   : > { %1619 = vmatmul.mubr.bf16.vlgmr.msra.gmra.mxu1 %v3822_v16  ;;  %1530 = vmatprep.mubr.bf16.mxu0 %v3873_v53  ;;  %v3892_v3 = vpack.c.bf16 %v670_v59, %v668_v54  ;;  %v438_v11 = vmax.f32 %v406_v0, 0.0  ;;  %v611_v18 = vrot.slane %v3900_v8, 1  ;;  %v612_v20 = vrot.slane %v3902_v9, 1  ;;  %v3549_v49 = vld [vmem:[%s5021_s3 + $0x98] sm:$0xff]   ;;  %v3550_v54 = vld [vmem:[%s5021_s3 + $0xd0] sm:$0xff]   ;;  %v2948_v59 = vld [vmem:[%s3734_s16 + $0x20] sm:$0xff]  }
  0x35   : > { %3088 = vmatpush3.bf16.msra.mxu1 %v3538_v17  ;;  %1531 = vmatmul.mubr.bf16.gmra.mxu0 %v3863_v46  ;;  %v2816_v17 = vunpack.c.h.bf16 %v2947_v7  ;;  %v614_v21 = vrot.slane %v3904_v10, 1  ;;  %470 = vst [vmem:[#allocation2 + $0x49] sm:$0xff] %v437_v5  ;;  %v461_v27 = vmax.f32 %v429_v6, 0.0  ;;  %v462_v28 = vmax.f32 %v430_v12, 0.0  ;;  %v3562_v12 = vld [vmem:[%s5021_s3 + $0x158] sm:$0xff]  }
  0x36   : > { %3089 = vmatprep.subr.bf16.mxu1 %v3540_v26  ;;  %5040 = vst [vmem:[#allocation4_spill] sm:$0xff] %v3892_v3  ;;  %1626 = vmatprep.mubr.bf16.mxu1 %v3892_v3  ;;  %v671_v26 = vrot.slane %v3911_v23, 1  ;;  %471 = vst [vmem:[#allocation2 + $0x51] sm:$0xff] %v438_v11  ;;  %v368_v29 = vmul.f32 %v2815_v14, %v3748_v15  ;;  %v613_v34 = vsel %vm600_vm0, %v611_v18, %v612_v20  ;;  %v2953_v3 = vld [vmem:[%s3734_s16 + $0x48] sm:$0xff]  }
  0x37   : > { %3204 = vmatpush3.bf16.msra.mxu0 %v3555_v57  ;;  %v615_v35 = vsel %vm600_vm0, %v612_v20, %v614_v21  ;;  %v672_v36 = vrot.slane %v3914_v24, 1  ;;  %v674_v37 = vrot.slane %v3916_v25, 1  ;;  %v3934_v42 = vpack.c.bf16 %v3902_v9, %v3900_v8  ;;  %494 = vst [vmem:[#allocation2 + $0x169] sm:$0xff] %v461_v27  ;;  %495 = vst [vmem:[#allocation2 + $0x171] sm:$0xff] %v462_v28  ;;  %v3561_v57 = vld [vmem:[%s5021_s3 + $0x120] sm:$0xff]   ;;  %v3552_v28 = vld [vmem:[%s5021_s3 + $0xc8] sm:$0xff]  }
  0x38   : > { %v3930_v41 = vpack.c.bf16 %v615_v35, %v613_v34  ;;  %v369_v44 = vmul.f32 %v2816_v17, %v3748_v15  ;;  %v407_v45 = vadd.f32 %v3754_v19, %v368_v29  ;;  %v3951_v52 = vpack.c.bf16 %v3914_v24, %v3911_v23  ;;  %3205 = vmatprep.subr.bf16.mxu0 %v3560_v50 }
  0x39   : > { %3090 = vmatpush3.bf16.msra.mxu1 %v3541_v30  ;;  %v3546_v30 = vld [vmem:[%s5021_s3 + $0xa0] sm:$0xff]   ;;  %5041 = vst [vmem:[#allocation5_spill] sm:$0xff] %v3934_v42  ;;  %v673_v47 = vsel %vm600_vm0, %v671_v26, %v672_v36  ;;  %v675_v48 = vsel %vm600_vm0, %v672_v36, %v674_v37  ;;  %v2820_v0 = vunpack.c.h.bf16 %v2948_v59  ;;  %v2823_v7 = vunpack.c.l.bf16 %v2949_v1 }
  0x3a   : > { %3091 = vmatprep.subr.bf16.mxu1 %v3542_v51  ;;  %1538 = vmatprep.mubr.bf16.mxu0 %v3930_v41  ;;  %v3947_v51 = vpack.c.bf16 %v675_v48, %v673_v47  ;;  %5043 = vst [vmem:[#allocation7_spill] sm:$0xff] %v3951_v52  ;;  %v408_v55 = vadd.f32 %v3754_v19, %v369_v44  ;;  %v439_v56 = vmax.f32 %v407_v45, 0.0  ;;  %v2824_v11 = vunpack.c.h.bf16 %v2949_v1 }
  0x3b   : > { %3206 = vmatpush3.bf16.msra.mxu0 %v3561_v57  ;;  %v371_v21 = vmul.f32 %v2820_v0, %v3748_v15  ;;  %v372_v29 = vmul.f32 %v2823_v7, %v3748_v15 }
  0x3c   : > { %1627 = vmatmul.mubr.bf16.gmra.mxu1 %v3884_v60  ;;  %5042 = vst [vmem:[#allocation6_spill] sm:$0xff] %v3947_v51  ;;  %v3967_v5 = vld [vmem:[#allocation2 + $0x48] sm:$0xff]  ;;  %v440_v6 = vmax.f32 %v408_v55, 0.0  ;;  %472 = vst [vmem:[#allocation2 + $0x61] sm:$0xff] %v439_v56  ;;  %3207 = vmatprep.subr.bf16.mxu0 %v3562_v12  ;;  %v373_v45 = vmul.f32 %v2824_v11, %v3748_v15  ;;  %v717_v55 = vrot.slane %v3742_v13, 2  ;;  %v3566_v13 = vld [vmem:[%s5021_s3 + $0x150] sm:$0xff]  }
  0x3d   : > { %3092 = vmatpush3.bf16.msra.mxu1 %v3543_v61  ;;  %v2819_v61 = vunpack.c.l.bf16 %v2948_v59  ;;  %1634 = vmatprep.mubr.bf16.mxu1 %v3947_v51  ;;  %v3975_v14 = vld [vmem:[#allocation2 + $0x50] sm:$0xff]  ;;  %v3977_v17 = vld [vmem:[#allocation2 + $0x58] sm:$0x3]  ;;  %v616_v18 = vrot.slane %v3967_v5, 1  ;;  %v410_v44 = vadd.f32 %v3754_v19, %v371_v21 }
  0x3e   : > { %3093 = vmatprep.subr.bf16.mxu1 %v3544_v4  ;;  %v3963_v4 = vrot.slane %v3603_v2, 2  ;;  %1539 = vmatmul.mubr.bf16.gmra.mxu0 %v3934_v42  ;;  %v3551_v2 = vld [vmem:[%s5021_s3 + $0x90] sm:$0xff]   ;;  %v617_v26 = vrot.slane %v3975_v14, 1  ;;  %v619_v27 = vrot.slane %v3977_v17, 1  ;;  %473 = vst [vmem:[#allocation2 + $0x69] sm:$0xff] %v440_v6  ;;  %v3992_v34 = vld [vmem:[#allocation2 + $0x168] sm:$0xff]  ;;  %v4000_v37 = vpack.c.bf16 %v3975_v14, %v3967_v5 }
  0x3f   : > { %v370_v20 = vmul.f32 %v2819_v61, %v3748_v15  ;;  %v3994_v35 = vld [vmem:[#allocation2 + $0x170] sm:$0xff]  ;;  %v3996_v36 = vld [vmem:[#allocation2 + $0x178] sm:$0x3]  ;;  %v442_v1 = vmax.f32 %v410_v44, 0.0  ;;  %v411_v6 = vadd.f32 %v3754_v19, %v372_v29  ;;  %v412_v7 = vadd.f32 %v3754_v19, %v373_v45 }
  0x40   : > { %5044 = vst [vmem:[#allocation8_spill] sm:$0xff] %v4000_v37  ;;  %v618_v47 = vsel %vm600_vm0, %v616_v18, %v617_v26  ;;  %v620_v48 = vsel %vm600_vm0, %v617_v26, %v619_v27  ;;  %v677_v50 = vrot.slane %v3994_v35, 1  ;;  %v679_v57 = vrot.slane %v3996_v36, 1  ;;  %v2950_v61 = vld [vmem:[%s3734_s16 + $0x30] sm:$0xff]   ;;  %v2951_v44 = vld [vmem:[%s3734_s16 + $0x38] sm:$0xff]  }
  0x41   : > { %3094 = vmatpush3.bf16.msra.mxu1 %v3546_v30  ;;  %v3564_v30 = vld [vmem:[%s5021_s3 + $0x118] sm:$0xff]   ;;  %v4010_v56 = vpack.c.bf16 %v620_v48, %v618_v47  ;;  %v4027_v12 = vpack.c.bf16 %v3994_v35, %v3992_v34  ;;  %v2828_v21 = vunpack.c.h.bf16 %v2950_v61  ;;  %475 = vst [vmem:[#allocation2 + $0x81] sm:$0xff] %v442_v1  ;;  %v443_v29 = vmax.f32 %v411_v6, 0.0  ;;  %v3565_v51 = vld [vmem:[%s5021_s3 + $0x1b0] sm:$0xff]  }
  0x42   : > { %3095 = vmatprep.subr.bf16.mxu1 %v3548_v38  ;;  %v409_v38 = vadd.f32 %v3754_v19, %v370_v20  ;;  %3208 = vmatpush3.bf16.msra.mxu0 %v3564_v30  ;;  %v680_v11 = vsel %vm600_vm0, %v677_v50, %v679_v57  ;;  %v2827_v20 = vunpack.c.l.bf16 %v2950_v61  ;;  %v444_v30 = vmax.f32 %v412_v7, 0.0 }
  0x43   : > { %1546 = vmatprep.mubr.bf16.mxu0 %v4010_v56  ;;  %5045 = vst [vmem:[#allocation9_spill] sm:$0xff] %v4027_v12  ;;  %v4029_v18 = vld [vmem:[#allocation2 + $0x60] sm:$0xff]  ;;  %v375_v48 = vmul.f32 %v2828_v21, %v3748_v15  ;;  %3209 = vmatprep.subr.bf16.mxu0 %v3566_v13  ;;  %v719_v61 = vrot.slane %v3840_v31, 2  ;;  %476 = vst [vmem:[#allocation2 + $0x91] sm:$0xff] %v443_v29  ;;  %v2831_v7 = vunpack.c.l.bf16 %v2951_v44  ;;  %v2832_v21 = vunpack.c.h.bf16 %v2951_v44  ;;  %v3571_v44 = vld [vmem:[%s5021_s3 + $0x108] sm:$0xff]  }
  0x44   : > { %1635 = vmatmul.mubr.bf16.gmra.mxu1 %v3951_v52  ;;  %v441_v59 = vmax.f32 %v409_v38, 0.0  ;;  %v621_v27 = vrot.slane %v4029_v18, 1  ;;  %v3567_v38 = vld [vmem:[%s5021_s3 + $0x110] sm:$0xff]   ;;  %477 = vst [vmem:[#allocation2 + $0x99] sm:$0xff] %v444_v30  ;;  %v4067_v13 = vld [vmem:[%s3734_s16 + $0x40] sm:$0xff]  }
  0x45   : > { %3096 = vmatpush3.bf16.msra.mxu1 %v3549_v49  ;;  %v676_v49 = vrot.slane %v3992_v34, 1  ;;  %v4042_v45 = vld [vmem:[#allocation2 + $0x68] sm:$0xff]  ;;  %v4044_v47 = vld [vmem:[#allocation2 + $0x70] sm:$0x3]  ;;  %v414_v6 = vadd.f32 %v3754_v19, %v375_v48 }
  0x46   : > { %3097 = vmatprep.subr.bf16.mxu1 %v3550_v54  ;;  %v3554_v54 = vld [vmem:[%s5021_s3 + $0x88] sm:$0xff]   ;;  %474 = vst [vmem:[#allocation2 + $0x79] sm:$0xff] %v441_v59  ;;  %1547 = vmatmul.mubr.bf16.gmra.mxu0 %v4000_v37  ;;  %v622_v57 = vrot.slane %v4042_v45, 1  ;;  %v624_v59 = vrot.slane %v4044_v47, 1 }
  0x47   : > { %v678_v0 = vsel %vm600_vm0, %v676_v49, %v677_v50  ;;  %v4050_v49 = vsel %vm713_vm1, %v3963_v4, %v717_v55  ;;  %v3557_v50 = vld [vmem:[%s5021_s3 + $0x80] sm:$0xff]   ;;  %3210 = vmatpush3.bf16.msra.mxu0 %v3567_v38  ;;  %v3558_v55 = vld [vmem:[%s5021_s3 + $0x1f8] sm:$0xff]  }
  0x48   : > { %v4031_v26 = vpack.c.bf16 %v680_v11, %v678_v0  ;;  %v720_v0 = vrot.slane %v3842_v32, 2  ;;  %v623_v31 = vsel %vm600_vm0, %v621_v27, %v622_v57  ;;  %v625_v11 = vsel %vm600_vm0, %v622_v57, %v624_v59  ;;  %v3570_v32 = vld [vmem:[%s5021_s3 + $0x148] sm:$0xff]   ;;  %v3559_v27 = vld [vmem:[%s5021_s3 + $0x1b8] sm:$0xff]  }
  0x49   : > { %3098 = vmatpush3.bf16.msra.mxu1 %v3551_v2  ;;  %v3556_v2 = vld [vmem:[%s5021_s3 + $0xc0] sm:$0xff]   ;;  %v4079_v29 = vpack.c.bf16 %v625_v11, %v623_v31  ;;  %3211 = vmatprep.subr.bf16.mxu0 %v3570_v32  ;;  %v4096_v57 = vld [vmem:[#allocation2 + $0x88] sm:$0x3]  ;;  %v2835_v31 = vunpack.c.l.bf16 %v4067_v13 }
  0x4a   : > { %5046 = vst [vmem:[#allocation10_spill] sm:$0xff] %v4031_v26  ;;  %3099 = vmatprep.subr.bf16.mxu1 %v3552_v28  ;;  %v374_v28 = vmul.f32 %v2827_v20, %v3748_v15  ;;  %1642 = vmatprep.mubr.bf16.mxu1 %v4031_v26  ;;  %v4074_v20 = vpack.c.bf16 %v4042_v45, %v4029_v18  ;;  %v4109_v11 = vld [vmem:[#allocation2 + $0x90] sm:$0xff] }
  0x4b   : > { %1554 = vmatprep.mubr.bf16.mxu0 %v4079_v29  ;;  %v4113_v32 = vld [vmem:[#allocation2 + $0xa0] sm:$0x3]  ;;  %3212 = vmatpush3.bf16.msra.mxu0 %v3571_v44  ;;  %v378_v22 = vmul.f32 %v2835_v31, %v3748_v15 }
  0x4c   : > { %1643 = vmatmul.mubr.bf16.gmra.mxu1 %v4027_v12  ;;  %v413_v1 = vadd.f32 %v3754_v19, %v374_v28  ;;  %5047 = vst [vmem:[#allocation11_spill] sm:$0xff] %v4074_v20  ;;  %v377_v28 = vmul.f32 %v2832_v21, %v3748_v15  ;;  %v4111_v21 = vld [vmem:[#allocation2 + $0x98] sm:$0xff]  ;;  %v3575_v31 = vld [vmem:[%s5021_s3 + $0x100] sm:$0xff]  }
  0x4d   : > { %3100 = vmatpush3.bf16.msra.mxu1 %v3554_v54  ;;  %1683 = vmatprep.mubr.bf16.mxu1 %v3863_v46  ;;  %v446_v54 = vmax.f32 %v414_v6, 0.0  ;;  %v4084_v38 = vld [vmem:[#allocation2 + $0x78] sm:$0xff]  ;;  %v376_v46 = vmul.f32 %v2831_v7, %v3748_v15  ;;  %v4094_v48 = vld [vmem:[#allocation2 + $0x80] sm:$0xff]  ;;  %v3563_v6 = vld [vmem:[%s5021_s3 + $0x1f0] sm:$0xff]  }
  0x4e   : > { %3101 = vmatprep.subr.bf16.mxu1 %v3556_v2  ;;  %v445_v30 = vmax.f32 %v413_v1, 0.0  ;;  %v862_v2 = vpack.c.bf16 %v4050_v49, %v3963_v4  ;;  %v626_v59 = vrot.slane %v4084_v38, 1  ;;  %v722_v1 = vrot.slane %v3844_v33, 2  ;;  %1555 = vmatmul.mubr.bf16.gmra.mxu0 %v4074_v20 }
  0x4f   : > { %479 = vst [vmem:[#allocation2 + $0xb1] sm:$0xff] %v446_v54  ;;  %v627_v7 = vrot.slane %v4094_v48, 1  ;;  %v629_v4 = vrot.slane %v4096_v57, 1  ;;  %v415_v49 = vadd.f32 %v3754_v19, %v376_v46  ;;  %v721_v33 = vsel %vm713_vm1, %v719_v61, %v720_v0 }
  0x50   : > { %478 = vst [vmem:[#allocation2 + $0xa9] sm:$0xff] %v445_v30  ;;  %v416_v30 = vadd.f32 %v3754_v19, %v377_v28  ;;  %v2836_v54 = vunpack.c.h.bf16 %v4067_v13  ;;  %v632_v61 = vrot.slane %v4111_v21, 1  ;;  %v723_v28 = vsel %vm713_vm1, %v720_v0, %v722_v1  ;;  %v3568_v1 = vld [vmem:[%s5021_s3 + $0x1e8] sm:$0xff]  }
  0x51   : > { %3102 = vmatpush3.bf16.msra.mxu1 %v3557_v50  ;;  %v724_v50 = vrot.slane %v3900_v8, 2  ;;  %v628_v46 = vsel %vm600_vm0, %v626_v59, %v627_v7  ;;  %v630_v26 = vsel %vm600_vm0, %v627_v7, %v629_v4  ;;  %v634_v13 = vrot.slane %v4113_v32, 1 }
  0x52   : > { %3311 = vmatprep.subr.bf16.mxu1 %v3558_v55  ;;  %v631_v55 = vrot.slane %v4109_v11, 1  ;;  %v4126_v8 = vpack.c.bf16 %v630_v26, %v628_v46  ;;  %v447_v44 = vmax.f32 %v415_v49, 0.0  ;;  %v4133_v59 = vpack.c.bf16 %v4094_v48, %v4084_v38  ;;  %v3574_v26 = vld [vmem:[%s5021_s3 + $0x140] sm:$0xff]  }
  0x53   : > { %v448_v4 = vmax.f32 %v416_v30, 0.0  ;;  %v635_v0 = vsel %vm600_vm0, %v632_v61, %v634_v13  ;;  %v379_v49 = vmul.f32 %v2836_v54, %v3748_v15  ;;  %v417_v54 = vadd.f32 %v3754_v19, %v378_v22  ;;  %3213 = vmatprep.subr.bf16.mxu0 %v3574_v26 }
  0x54   : > { %1684 = vmatmul.mubr.bf16.vlgmr.msra.gmra.mxu1 %v862_v2  ;;  %v633_v7 = vsel %vm600_vm0, %v631_v55, %v632_v61  ;;  %1562 = vmatprep.mubr.bf16.mxu0 %v4126_v8  ;;  %v727_v2 = vrot.slane %v3904_v10, 2  ;;  %480 = vst [vmem:[#allocation2 + $0xc1] sm:$0xff] %v447_v44  ;;  %v2839_v55 = vunpack.c.l.bf16 %v2953_v3  ;;  %v4163_v61 = vpack.c.bf16 %v723_v28, %v721_v33  ;;  %v4177_v33 = vld [vmem:[%s5021_s3 + $0x238] sm:$0xff]  }
  0x55   : > { %3312 = vmatpush3.bf16.msra.mxu1 %v3559_v27  ;;  %1691 = vmatprep.mubr.bf16.mxu1 %v3934_v42  ;;  %v725_v27 = vrot.slane %v3902_v9, 2  ;;  %v4151_v30 = vpack.c.bf16 %v635_v0, %v633_v7  ;;  %481 = vst [vmem:[#allocation2 + $0xc9] sm:$0xff] %v448_v4  ;;  %v3572_v4 = vld [vmem:[%s5021_s3 + $0x1e0] sm:$0xff]   ;;  %v2954_v0 = vld [vmem:[%s3734_s16 + $0x50] sm:$0xff]   ;;  %v418_v22 = vadd.f32 %v3754_v19, %v379_v49  ;;  %v449_v26 = vmax.f32 %v417_v54, 0.0 }
  0x56   : > { %3313 = vmatprep.subr.bf16.mxu1 %v3563_v6  ;;  %v4157_v10 = vld [vmem:[#allocation2 + $0xb8] sm:$0x3]  ;;  %v3569_v6 = vld [vmem:[%s5021_s3 + $0x1a8] sm:$0xff]   ;;  %3214 = vmatpush3.bf16.msra.mxu0 %v3575_v31  ;;  %v2840_v31 = vunpack.c.h.bf16 %v2953_v3  ;;  %v380_v49 = vmul.f32 %v2839_v55, %v3748_v15  ;;  %v4194_v3 = vpack.c.bf16 %v4111_v21, %v4109_v11  ;;  %v2844_v55 = vunpack.c.h.bf16 %v2954_v0 }
  0x57   : > { %v4153_v46 = vld [vmem:[#allocation2 + $0xa8] sm:$0xff]  ;;  %v4155_v9 = vld [vmem:[#allocation2 + $0xb0] sm:$0xff]  ;;  %v639_v7 = vrot.slane %v4157_v10, 1  ;;  %1563 = vmatmul.mubr.bf16.gmra.mxu0 %v4133_v59  ;;  %v726_v28 = vsel %vm713_vm1, %v724_v50, %v725_v27  ;;  %v728_v42 = vsel %vm713_vm1, %v725_v27, %v727_v2  ;;  %v450_v52 = vmax.f32 %v418_v22, 0.0  ;;  %482 = vst [vmem:[#allocation2 + $0xd9] sm:$0xff] %v449_v26  ;;  %3447 = vmatprep.subr.bf16.mxu0 %v4177_v33  ;;  %v3573_v50 = vld [vmem:[%s5021_s3 + $0x1a0] sm:$0xff]  }
  0x58   : > { %v636_v13 = vrot.slane %v4153_v46, 1  ;;  %v637_v44 = vrot.slane %v4155_v9, 1  ;;  %1570 = vmatprep.mubr.bf16.mxu0 %v4151_v30  ;;  %v381_v54 = vmul.f32 %v2840_v31, %v3748_v15  ;;  %v2843_v27 = vunpack.c.l.bf16 %v2954_v0  ;;  %v3576_v15 = vld [vmem:[%s5021_s3 + $0x1d8] sm:$0xff]  }
  0x59   : > { %3314 = vmatpush3.bf16.msra.mxu1 %v3565_v51  ;;  %483 = vst [vmem:[#allocation2 + $0xe1] sm:$0xff] %v450_v52  ;;  %v729_v22 = vrot.slane %v3967_v5, 2  ;;  %v4220_v5 = vld [vmem:[%s5019_s1] ss:$0 sm:$0xff] }
  0x5a   : > { %3315 = vmatprep.subr.bf16.mxu1 %v3568_v1  ;;  %v638_v12 = vsel %vm600_vm0, %v636_v13, %v637_v44  ;;  %v640_v51 = vsel %vm600_vm0, %v637_v44, %v639_v7  ;;  %v419_v1 = vadd.f32 %v3754_v19, %v380_v49  ;;  %v774_v13 = vrot.slane %v3797_v58, 2 }
  0x5b   : > { %v4196_v2 = vld [vmem:[#allocation2 + $0xc0] sm:$0xff]  ;;  %v4203_v44 = vpack.c.bf16 %v728_v42, %v726_v28  ;;  %v4205_v7 = vpack.c.bf16 %v640_v51, %v638_v12  ;;  %v420_v52 = vadd.f32 %v3754_v19, %v381_v54  ;;  %v730_v42 = vrot.slane %v3975_v14, 2  ;;  %v3578_v14 = vld [vmem:[%s5021_s3 + $0x198] sm:$0xff]  }
  0x5c   : > { %1692 = vmatmul.mubr.bf16.gmra.mxu1 %v4163_v61  ;;  %v4208_v26 = vld [vmem:[#allocation2 + $0xc8] sm:$0xff]  ;;  %v4210_v31 = vld [vmem:[#allocation2 + $0xd0] sm:$0x3]  ;;  %v451_v58 = vmax.f32 %v419_v1, 0.0  ;;  %v382_v28 = vmul.f32 %v4220_v5, %v2843_v27  ;;  %v383_v19 = vmul.f32 %v4220_v5, %v2844_v55  ;;  %v4233_v51 = vld [vmem:[%s5020_s2] ss:$0 sm:$0xff] }
  0x5d   : > { %1699 = vmatprep.mubr.bf16.mxu1 %v4000_v37  ;;  %3316 = vmatpush3.bf16.msra.mxu1 %v3569_v6  ;;  %v641_v6 = vrot.slane %v4196_v2, 1  ;;  %v642_v0 = vrot.slane %v4208_v26, 1  ;;  %v644_v49 = vrot.slane %v4210_v31, 1  ;;  %v452_v12 = vmax.f32 %v420_v52, 0.0 }
  0x5e   : > { %3317 = vmatprep.subr.bf16.mxu1 %v3572_v4  ;;  %v732_v4 = vrot.slane %v3977_v17, 2  ;;  %484 = vst [vmem:[#allocation2 + $0xf1] sm:$0xff] %v451_v58  ;;  %v421_v54 = vadd.f32 %v4233_v51, %v382_v28  ;;  %v422_v27 = vadd.f32 %v4233_v51, %v383_v19  ;;  %v3579_v17 = vld [vmem:[%s5021_s3 + $0x1d0] sm:$0xff]   ;;  %v4243_v52 = vld [vmem:[#allocation2 + $0xd8] sm:$0xff]  ;;  %v4253_v19 = vpack.c.bf16 %v4155_v9, %v4153_v46 }
  0x5f   : > { %1571 = vmatmul.mubr.bf16.gmra.mxu0 %v4194_v3  ;;  %485 = vst [vmem:[#allocation2 + $0xf9] sm:$0xff] %v452_v12  ;;  %v643_v1 = vsel %vm600_vm0, %v641_v6, %v642_v0  ;;  %v645_v55 = vsel %vm600_vm0, %v642_v0, %v644_v49  ;;  %v3581_v0 = vld [vmem:[%s5021_s3 + $0x190] sm:$0xff]   ;;  %v3582_v49 = vld [vmem:[%s5021_s3 + $0x1c8] sm:$0xff]   ;;  %v734_v37 = vrot.slane %v4029_v18, 2 }
  0x60   : > { %1578 = vmatprep.mubr.bf16.mxu0 %v4205_v7  ;;  %v4246_v58 = vld [vmem:[#allocation2 + $0xe0] sm:$0xff]  ;;  %v4248_v12 = vld [vmem:[#allocation2 + $0xe8] sm:$0x3]  ;;  %v453_v28 = vmax.f32 %v421_v54, 0.0  ;;  %v733_v6 = vsel %vm713_vm1, %v730_v42, %v732_v4  ;;  %v4263_v54 = vpack.c.bf16 %v645_v55, %v643_v1  ;;  %v777_v4 = vrot.slane %v3804_v63, 2 }
  0x61   : > { %3318 = vmatpush3.bf16.msra.mxu1 %v3573_v50  ;;  %v775_v50 = vrot.slane %v3802_v62, 2  ;;  %v731_v62 = vsel %vm713_vm1, %v729_v22, %v730_v42  ;;  %v649_v42 = vrot.slane %v4248_v12, 1  ;;  %v735_v1 = vrot.slane %v4042_v45, 2  ;;  %v3585_v45 = vld [vmem:[%s5021_s3 + $0x1c0] sm:$0xff]  }
  0x62   : > { %3319 = vmatprep.subr.bf16.mxu1 %v3576_v15  ;;  %v454_v15 = vmax.f32 %v422_v27, 0.0  ;;  %v646_v27 = vrot.slane %v4243_v52, 1  ;;  %486 = vst [vmem:[#allocation2 + $0x109] sm:$0xff] %v453_v28  ;;  %v737_v55 = vrot.slane %v4044_v47, 2  ;;  %v739_v63 = vrot.slane %v4084_v38, 2 }
  0x63   : > { %v776_v22 = vsel %vm713_vm1, %v774_v13, %v775_v50  ;;  %v778_v28 = vsel %vm713_vm1, %v775_v50, %v777_v4  ;;  %v3584_v13 = vld [vmem:[%s5021_s3 + $0x188] sm:$0xff]   ;;  %v736_v38 = vsel %vm713_vm1, %v734_v37, %v735_v1  ;;  %v785_v37 = vrot.slane %v3914_v24, 2 }
  0x64   : > { %1700 = vmatmul.mubr.bf16.gmra.mxu1 %v4203_v44  ;;  %487 = vst [vmem:[#allocation2 + $0x111] sm:$0xff] %v454_v15 }
  0x65   : > { %1707 = vmatprep.mubr.bf16.mxu1 %v4074_v20  ;;  %3320 = vmatpush3.bf16.msra.mxu1 %v3578_v14  ;;  %v647_v20 = vrot.slane %v4246_v58, 1  ;;  %v4270_v14 = vpack.c.bf16 %v733_v6, %v731_v62  ;;  %v4283_v18 = vld [vmem:[#allocation2 + $0xf0] sm:$0xff]  ;;  %v780_v6 = vrot.slane %v3852_v40, 2 }
  0x66   : > { %3321 = vmatprep.subr.bf16.mxu1 %v3579_v17  ;;  %v779_v17 = vrot.slane %v3850_v39, 2  ;;  %v4290_v15 = vld [vmem:[#allocation2 + $0xf8] sm:$0xff]  ;;  %v4292_v62 = vld [vmem:[#allocation2 + $0x100] sm:$0x3]  ;;  %v4294_v39 = vpack.c.bf16 %v778_v28, %v776_v22  ;;  %v740_v22 = vrot.slane %v4094_v48, 2  ;;  %v651_v4 = vrot.slane %v4283_v18, 1 }
  0x67   : > { %1579 = vmatmul.mubr.bf16.gmra.mxu0 %v4253_v19  ;;  %v648_v47 = vsel %vm600_vm0, %v646_v27, %v647_v20  ;;  %v650_v50 = vsel %vm600_vm0, %v647_v20, %v649_v42  ;;  %v784_v27 = vrot.slane %v3911_v23, 2  ;;  %v4305_v20 = vpack.c.bf16 %v4208_v26, %v4196_v2  ;;  %v3587_v23 = vld [vmem:[%s5021_s3 + $0x180] sm:$0xff]  }
  0x68   : > { %1586 = vmatprep.mubr.bf16.mxu0 %v4263_v54  ;;  %v781_v40 = vsel %vm713_vm1, %v779_v17, %v780_v6  ;;  %v4310_v42 = vpack.c.bf16 %v650_v50, %v648_v47  ;;  %v742_v28 = vrot.slane %v4096_v57, 2  ;;  %v741_v17 = vsel %vm713_vm1, %v739_v63, %v740_v22 }
  0x69   : > { %3322 = vmatpush3.bf16.msra.mxu1 %v3581_v0  ;;  %v738_v0 = vsel %vm713_vm1, %v735_v1, %v737_v55  ;;  %v654_v1 = vrot.slane %v4292_v62, 1  ;;  %v2959_v55 = vld [vmem:[%s3734_s16 + $0x78] sm:$0xff]   ;;  %v787_v50 = vrot.slane %v3916_v25, 2 }
  0x6a   : > { %3323 = vmatprep.subr.bf16.mxu1 %v3582_v49  ;;  %v782_v49 = vrot.slane %v3857_v43, 2  ;;  %v652_v43 = vrot.slane %v4290_v15, 1  ;;  %v4319_v48 = vpack.c.bf16 %v738_v0, %v736_v38  ;;  %v2863_v38 = vunpack.c.l.bf16 %v2959_v55 }
  0x6b   : > { %v2864_v0 = vunpack.c.h.bf16 %v2959_v55  ;;  %v743_v63 = vsel %vm713_vm1, %v740_v22, %v742_v28  ;;  %v4341_v25 = vld [vmem:[#allocation2 + $0x118] sm:$0x3] }
  0x6c   : > { %1708 = vmatmul.mubr.bf16.gmra.mxu1 %v4270_v14  ;;  %v783_v24 = vsel %vm713_vm1, %v780_v6, %v782_v49  ;;  %v653_v47 = vsel %vm600_vm0, %v651_v4, %v652_v43  ;;  %v655_v57 = vsel %vm600_vm0, %v652_v43, %v654_v1  ;;  %v789_v6 = vrot.slane %v3992_v34, 2  ;;  %v4339_v4 = vld [vmem:[#allocation2 + $0x110] sm:$0xff] }
  0x6d   : > { %1715 = vmatprep.mubr.bf16.mxu1 %v4133_v59  ;;  %3324 = vmatpush3.bf16.msra.mxu1 %v3584_v13  ;;  %v786_v13 = vsel %vm713_vm1, %v784_v27, %v785_v37  ;;  %v790_v49 = vrot.slane %v3994_v35, 2  ;;  %v792_v27 = vrot.slane %v3996_v36, 2  ;;  %v392_v43 = vmul.f32 %v4220_v5, %v2863_v38 }
  0x6e   : > { %3325 = vmatprep.subr.bf16.mxu1 %v3585_v45  ;;  %v4326_v45 = vpack.c.bf16 %v783_v24, %v781_v40  ;;  %v4337_v40 = vld [vmem:[#allocation2 + $0x108] sm:$0xff]  ;;  %v393_v34 = vmul.f32 %v4220_v5, %v2864_v0  ;;  %v4349_v35 = vpack.c.bf16 %v4246_v58, %v4243_v52  ;;  %v4355_v55 = vpack.c.bf16 %v655_v57, %v653_v47 }
  0x6f   : > { %1587 = vmatmul.mubr.bf16.gmra.mxu0 %v4305_v20  ;;  %v791_v22 = vsel %vm713_vm1, %v789_v6, %v790_v49  ;;  %v793_v1 = vsel %vm713_vm1, %v790_v49, %v792_v27  ;;  %v656_v5 = vrot.slane %v4337_v40, 1  ;;  %v659_v38 = vrot.slane %v4341_v25, 1 }
  0x70   : > { %1594 = vmatprep.mubr.bf16.mxu0 %v4310_v42  ;;  %v432_v28 = vadd.f32 %v4233_v51, %v393_v34  ;;  %v4359_v24 = vpack.c.bf16 %v793_v1, %v791_v22  ;;  %v744_v47 = vrot.slane %v4109_v11, 2  ;;  %v745_v57 = vrot.slane %v4111_v21, 2 }
  0x71   : > { %3326 = vmatpush3.bf16.msra.mxu1 %v3587_v23  ;;  %v788_v23 = vsel %vm713_vm1, %v785_v37, %v787_v50  ;;  %v431_v37 = vadd.f32 %v4233_v51, %v392_v43  ;;  %v657_v50 = vrot.slane %v4339_v4, 1  ;;  %v747_v51 = vrot.slane %v4113_v32, 2 }
  0x72   : > { %v4351_v36 = vpack.c.bf16 %v788_v23, %v786_v13  ;;  %v4364_v13 = vpack.c.bf16 %v743_v63, %v741_v17  ;;  %v464_v6 = vmax.f32 %v432_v28, 0.0  ;;  %v4377_v17 = vpack.c.bf16 %v4290_v15, %v4283_v18 }
  0x73   : > { %v463_v0 = vmax.f32 %v431_v37, 0.0  ;;  %v658_v49 = vsel %vm600_vm0, %v656_v5, %v657_v50  ;;  %v660_v27 = vsel %vm600_vm0, %v657_v50, %v659_v38  ;;  %v746_v11 = vsel %vm713_vm1, %v744_v47, %v745_v57 }
  0x74   : > { %1716 = vmatmul.mubr.bf16.gmra.mxu1 %v4319_v48  ;;  %497 = vst [vmem:[#allocation2 + $0x189] sm:$0xff] %v464_v6  ;;  %v748_v21 = vsel %vm713_vm1, %v745_v57, %v747_v51  ;;  %v4381_v32 = vpack.c.bf16 %v660_v27, %v658_v49  ;;  %v749_v23 = vrot.slane %v4153_v46, 2  ;;  %v750_v43 = vrot.slane %v4155_v9, 2 }
  0x75   : > { %1723 = vmatprep.mubr.bf16.mxu1 %v4194_v3  ;;  %496 = vst [vmem:[#allocation2 + $0x181] sm:$0xff] %v463_v0  ;;  %v4383_v63 = vpack.c.bf16 %v748_v21, %v746_v11  ;;  %v752_v34 = vrot.slane %v4157_v10, 2  ;;  %v4399_v46 = vpack.c.bf16 %v4339_v4, %v4337_v40  ;;  %v754_v0 = vrot.slane %v4196_v2, 2 }
  0x76   : > { %v751_v22 = vsel %vm713_vm1, %v749_v23, %v750_v43  ;;  %v755_v6 = vrot.slane %v4208_v26, 2  ;;  %v757_v47 = vrot.slane %v4210_v31, 2  ;;  %v3580_v26 = vld [vmem:[%s5021_s3 + $0x230] sm:$0xff]   ;;  %v760_v11 = vrot.slane %v4246_v58, 2  ;;  %v3583_v23 = vld [vmem:[%s5021_s3 + $0x228] sm:$0xff]  }
  0x77   : > { %1595 = vmatmul.mubr.bf16.gmra.mxu0 %v4349_v35  ;;  %v753_v9 = vsel %vm713_vm1, %v750_v43, %v752_v34  ;;  %v762_v21 = vrot.slane %v4248_v12, 2  ;;  %v764_v12 = vrot.slane %v4283_v18, 2  ;;  %v765_v43 = vrot.slane %v4290_v15, 2  ;;  %v3589_v15 = vld [vmem:[%s5021_s3 + $0x210] sm:$0xff]  }
  0x78   : > { %1602 = vmatprep.mubr.bf16.mxu0 %v4355_v55  ;;  %v4407_v38 = vpack.c.bf16 %v753_v9, %v751_v22  ;;  %v756_v2 = vsel %vm713_vm1, %v754_v0, %v755_v6  ;;  %v758_v27 = vsel %vm713_vm1, %v755_v6, %v757_v47  ;;  %v767_v34 = vrot.slane %v4292_v62, 2  ;;  %v3588_v22 = vld [vmem:[%s5021_s3 + $0x218] sm:$0xff]   ;;  %v3590_v0 = vld [vmem:[%s5021_s3 + $0x208] sm:$0xff]   ;;  %v5048_v47 = vld [vmem:[#allocation7_spill] sm:$0xff] }
  0x79   : > { %v4425_v31 = vpack.c.bf16 %v758_v27, %v756_v2  ;;  %v766_v9 = vsel %vm713_vm1, %v764_v12, %v765_v43  ;;  %v5050_v2 = vld [vmem:[#allocation5_spill] sm:$0xff]  ;;  %v5051_v27 = vld [vmem:[#allocation8_spill] sm:$0xff] }
  0x7a   : > { %v768_v18 = vsel %vm713_vm1, %v765_v43, %v767_v34 }
  0x7b   : > { %v4404_v5 = vld [vmem:[#allocation2 + $0x190] sm:$0x3]  ;;  %v4460_v62 = vpack.c.bf16 %v768_v18, %v766_v9  ;;  %v5055_v9 = vld [vmem:[#allocation6_spill] sm:$0xff] }
  0x7c   : > { %1724 = vmatmul.mubr.bf16.gmra.mxu1 %v4364_v13  ;;  %v4392_v1 = vld [vmem:[#allocation2 + $0x180] sm:$0xff]  ;;  %v4394_v37 = vld [vmem:[#allocation2 + $0x188] sm:$0xff]  ;;  %v832_v50 = vrot.slane %v4404_v5, 1  ;;  %v839_v43 = vrot.slane %v4404_v5, 2 }
  0x7d   : > { %1731 = vmatprep.mubr.bf16.mxu1 %v4253_v19  ;;  %v829_v10 = vrot.slane %v4392_v1, 1  ;;  %v830_v28 = vrot.slane %v4394_v37, 1 }
  0x7f   : > { %1603 = vmatmul.mubr.bf16.gmra.mxu0 %v4377_v17  ;;  %v831_v57 = vsel %vm600_vm0, %v829_v10, %v830_v28  ;;  %v833_v51 = vsel %vm600_vm0, %v830_v28, %v832_v50  ;;  %v769_v10 = vrot.slane %v4337_v40, 2  ;;  %v770_v28 = vrot.slane %v4339_v4, 2  ;;  %v3591_v4 = vld [vmem:[%s5021_s3 + $0x200] sm:$0xff]  }
  0x80   : > { %1610 = vmatprep.mubr.bf16.mxu0 %v4381_v32  ;;  %v4416_v49 = vpack.c.bf16 %v833_v51, %v831_v57  ;;  %v772_v50 = vrot.slane %v4341_v25, 2  ;;  %v5049_v57 = vld [vmem:[#allocation9_spill] sm:$0xff]  ;;  %v4494_v51 = vpack.c.bf16 %v4394_v37, %v4392_v1 }
  0x81   : > { %v771_v6 = vsel %vm713_vm1, %v769_v10, %v770_v28 }
  0x82   : > { %v773_v40 = vsel %vm713_vm1, %v770_v28, %v772_v50 }
  0x83   : > { %v4477_v25 = vpack.c.bf16 %v773_v40, %v771_v6 }
  0x84   : > { %1732 = vmatmul.mubr.bf16.gmra.mxu1 %v4383_v63 }
  0x85   : > { %1739 = vmatprep.mubr.bf16.mxu1 %v4305_v20 }
  0x87   : > { %1611 = vmatmul.mubr.bf16.gmra.mxu0 %v4399_v46 }
  0x88   : > { %1844 = vmatprep.mubr.bf16.mxu0 %v4163_v61  ;;  %v759_v61 = vrot.slane %v4243_v52, 2  ;;  %v763_v52 = vsel %vm713_vm1, %v760_v11, %v762_v21 }
  0x8c   : > { %1740 = vmatmul.mubr.bf16.gmra.mxu1 %v4407_v38 }
  0x8d   : > { %1747 = vmatprep.mubr.bf16.mxu1 %v4349_v35 }
  0x8f   : > { %1845 = vmatmul.mubr.bf16.vlgmr.msra.gmra.mxu0 %v3873_v53  ;;  %v761_v53 = vsel %vm713_vm1, %v759_v61, %v760_v11 }
  0x90   : > { %3448 = vmatpush3.bf16.msra.mxu0 %v4177_v33  ;;  %1852 = vmatprep.mubr.bf16.mxu0 %v4203_v44  ;;  %v3586_v33 = vld [vmem:[%s5021_s3 + $0x220] sm:$0xff]   ;;  %v4443_v58 = vpack.c.bf16 %v763_v52, %v761_v53 }
  0x91   : > { %3449 = vmatprep.subr.bf16.mxu0 %v3580_v26 }
  0x94   : > { %1748 = vmatmul.mubr.bf16.gmra.mxu1 %v4425_v31  ;;  %3450 = vmatpush3.bf16.msra.mxu0 %v3580_v26  ;;  %v5053_v26 = vld [vmem:[#allocation3_spill] sm:$0xff] }
  0x95   : > { %1755 = vmatprep.mubr.bf16.mxu1 %v4377_v17  ;;  %3451 = vmatprep.subr.bf16.mxu0 %v3583_v23 }
  0x97   : > { %1853 = vmatmul.mubr.bf16.gmra.mxu0 %v3930_v41 }
  0x98   : > { %1860 = vmatprep.mubr.bf16.mxu0 %v4270_v14  ;;  %3452 = vmatpush3.bf16.msra.mxu0 %v3583_v23 }
  0x99   : > { %3453 = vmatprep.subr.bf16.mxu0 %v3586_v33 }
  0x9c   : > { %1756 = vmatmul.mubr.bf16.gmra.mxu1 %v4443_v58  ;;  %3454 = vmatpush3.bf16.msra.mxu0 %v3586_v33  ;;  %v837_v33 = vrot.slane %v4394_v37, 2 }
  0x9d   : > { %1763 = vmatprep.mubr.bf16.mxu1 %v4399_v46  ;;  %3455 = vmatprep.subr.bf16.mxu0 %v3588_v22 }
  0x9e   : > { %v840_v10 = vsel %vm713_vm1, %v837_v33, %v839_v43 }
  0x9f   : > { %1861 = vmatmul.mubr.bf16.gmra.mxu0 %v4010_v56 }
  0xa0   : > { %1868 = vmatprep.mubr.bf16.mxu0 %v4319_v48  ;;  %3456 = vmatpush3.bf16.msra.mxu0 %v3588_v22 }
  0xa1   : > { %3457 = vmatprep.subr.bf16.mxu0 %v3589_v15 }
  0xa4   : > { %1764 = vmatmul.mubr.bf16.gmra.mxu1 %v4460_v62  ;;  %3458 = vmatpush3.bf16.msra.mxu0 %v3589_v15 }
  0xa5   : > { %1771 = vmatprep.mubr.bf16.mxu1 %v3822_v16  ;;  %3459 = vmatprep.subr.bf16.mxu0 %v3590_v0 }
  0xa7   : > { %1869 = vmatmul.mubr.bf16.gmra.mxu0 %v4079_v29 }
  0xa8   : > { %1876 = vmatprep.mubr.bf16.mxu0 %v4364_v13  ;;  %3460 = vmatpush3.bf16.msra.mxu0 %v3590_v0 }
  0xa9   : > { %3461 = vmatprep.subr.bf16.mxu0 %v3591_v4 }
  0xac   : > { %1772 = vmatmul.mubr.bf16.gmra.mxu1 %v4477_v25  ;;  %3462 = vmatpush3.bf16.msra.mxu0 %v3591_v4 }
  0xad   : > { %1779 = vmatprep.mubr.bf16.mxu1 %v3884_v60 }
  0xaf   : > { %1877 = vmatmul.mubr.bf16.gmra.mxu0 %v4126_v8 }
  0xb0   : > { %1884 = vmatprep.mubr.bf16.mxu0 %v4383_v63 }
  0xb4   : > { %1780 = vmatmul.mubr.bf16.gmra.mxu1 %v4294_v39 }
  0xb5   : > { %1787 = vmatprep.mubr.bf16.mxu1 %v5048_v47 }
  0xb7   : > { %1885 = vmatmul.mubr.bf16.gmra.mxu0 %v4151_v30 }
  0xb8   : > { %1892 = vmatprep.mubr.bf16.mxu0 %v4407_v38 }
  0xbc   : > { %1788 = vmatmul.mubr.bf16.gmra.mxu1 %v4326_v45 }
  0xbd   : > { %1795 = vmatprep.mubr.bf16.mxu1 %v5049_v57 }
  0xbf   : > { %1893 = vmatmul.mubr.bf16.gmra.mxu0 %v4205_v7 }
  0xc0   : > { %1900 = vmatprep.mubr.bf16.mxu0 %v4425_v31 }
  0xc4   : > { %1796 = vmatmul.mubr.bf16.gmra.mxu1 %v4351_v36 }
  0xc5   : > { %1803 = vmatprep.mubr.bf16.mxu1 %v4494_v51 }
  0xc7   : > { %1901 = vmatmul.mubr.bf16.gmra.mxu0 %v4263_v54 }
  0xc8   : > { %1908 = vmatprep.mubr.bf16.mxu0 %v4443_v58 }
  0xcc   : > { %1804 = vmatmul.mubr.bf16.gmra.mxu1 %v4359_v24 }
  0xcd   : > { %2005 = vmatprep.mubr.bf16.mxu1 %v3930_v41  ;;  %v5052_v41 = vld [vmem:[#allocation11_spill] sm:$0xff] }
  0xcf   : > { %1909 = vmatmul.mubr.bf16.gmra.mxu0 %v4310_v42 }
  0xd0   : > { %1916 = vmatprep.mubr.bf16.mxu0 %v4460_v62 }
  0xd4   : > { %2006 = vmatmul.mubr.bf16.vlgmr.msra.gmra.mxu1 %v5050_v2 }
  0xd5   : > { %2013 = vmatprep.mubr.bf16.mxu1 %v4010_v56 }
  0xd7   : > { %1917 = vmatmul.mubr.bf16.gmra.mxu0 %v4355_v55 }
  0xd8   : > { %1924 = vmatprep.mubr.bf16.mxu0 %v4477_v25 }
  0xdc   : > { %2014 = vmatmul.mubr.bf16.gmra.mxu1 %v5051_v27  ;;  %v5056_v27 = vld [vmem:[#allocation10_spill] sm:$0xff] }
  0xdd   : > { %2021 = vmatprep.mubr.bf16.mxu1 %v4079_v29  ;;  %v5054_v29 = vld [vmem:[#allocation4_spill] sm:$0xff] }
  0xdf   : > { %1925 = vmatmul.mubr.bf16.gmra.mxu0 %v4381_v32 }
  0xe0   : > { %1932 = vmatprep.mubr.bf16.mxu0 %v4294_v39 }
  0xe4   : > { %2022 = vmatmul.mubr.bf16.gmra.mxu1 %v5052_v41 }
  0xe5   : > { %2029 = vmatprep.mubr.bf16.mxu1 %v4126_v8 }
  0xe7   : > { %1933 = vmatmul.mubr.bf16.gmra.mxu0 %v5053_v26 }
  0xe8   : > { %1940 = vmatprep.mubr.bf16.mxu0 %v4326_v45 }
  0xec   : > { %2030 = vmatmul.mubr.bf16.gmra.mxu1 %v4133_v59  ;;  %v2991_v56 = vpop.f32.mrf.mxu0 }
  0xed   : > { %2037 = vmatprep.mubr.bf16.mxu1 %v4151_v30  ;;  %v836_v30 = vrot.slane %v4392_v1, 2 }
  0xee   : > { %v2992_v61 = vpop.f32.mrf.mxu0 }
  0xef   : > { %v4519_v11 = vadd.f32 %v2992_v61, %v2991_v56  ;;  %1941 = vmatmul.mubr.bf16.gmra.mxu0 %v5054_v29 }
  0xf0   : > { %v2994_v21 = vpop.f32.mrf.mxu0  ;;  %1948 = vmatprep.mubr.bf16.mxu0 %v4351_v36 }
  0xf2   : > { %v2995_v53 = vpop.f32.mrf.mxu0 }
  0xf3   : > { %v4524_v8 = vadd.f32 %v2995_v53, %v2994_v21 }
  0xf4   : > { %v3063_v23 = vpop.f32.mrf.mxu1  ;;  %2038 = vmatmul.mubr.bf16.gmra.mxu1 %v4194_v3 }
  0xf5   : > { %2045 = vmatprep.mubr.bf16.mxu1 %v4205_v7  ;;  %v2997_v22 = vpop.f32.mrf.mxu0  ;;  %v838_v7 = vsel %vm713_vm1, %v836_v30, %v837_v33 }
  0xf6   : > { %v3064_v52 = vpop.f32.mrf.mxu1  ;;  %v4544_v50 = vpack.c.bf16 %v840_v10, %v838_v7 }
  0xf7   : > { %v4527_v59 = vadd.f32 %v3064_v52, %v3063_v23  ;;  %1949 = vmatmul.mubr.bf16.gmra.mxu0 %v5055_v9  ;;  %v2998_v15 = vpop.f32.mrf.mxu0 }
  0xf8   : > { %v3066_v12 = vpop.f32.mrf.mxu1  ;;  %1956 = vmatprep.mubr.bf16.mxu0 %v4359_v24  ;;  %v4539_v1 = vadd.f32 %v2998_v15, %v2997_v22 }
  0xf9   : > { %v3000_v5 = vpop.f32.mrf.mxu0 }
  0xfa   : > { %v3067_v34 = vpop.f32.mrf.mxu1 }
  0xfb   : > { %v4533_v18 = vadd.f32 %v3067_v34, %v3066_v12  ;;  %v3001_v6 = vpop.f32.mrf.mxu0 }
  0xfc   : > { %v3069_v3 = vpop.f32.mrf.mxu1  ;;  %2046 = vmatmul.mubr.bf16.gmra.mxu1 %v4253_v19  ;;  %v4546_v40 = vadd.f32 %v3001_v6, %v3000_v5 }
  0xfd   : > { %2053 = vmatprep.mubr.bf16.mxu1 %v4263_v54 }
  0xfe   : > { %v3070_v37 = vpop.f32.mrf.mxu1  ;;  %v3003_v2 = vpop.f32.mrf.mxu0 }
  0xff   : > { %v4542_v28 = vadd.f32 %v3070_v37, %v3069_v3  ;;  %1957 = vmatmul.mubr.bf16.gmra.mxu0 %v5056_v27 }
 0x100   : > { %v3072_v0 = vpop.f32.mrf.mxu1  ;;  %1964 = vmatprep.mubr.bf16.mxu0 %v4544_v50  ;;  %v3004_v56 = vpop.f32.mrf.mxu0 }
 0x101   : > { %v4553_v54 = vadd.f32 %v3004_v56, %v3003_v2 }
 0x102   : > { %v3073_v4 = vpop.f32.mrf.mxu1  ;;  %v3006_v21 = vpop.f32.mrf.mxu0 }
 0x103   : > { %v4549_v41 = vadd.f32 %v3073_v4, %v3072_v0 }
 0x104   : > { %v3075_v19 = vpop.f32.mrf.mxu1  ;;  %2054 = vmatmul.mubr.bf16.gmra.mxu1 %v4305_v20  ;;  %v3007_v52 = vpop.f32.mrf.mxu0 }
 0x105   : > { %2061 = vmatprep.mubr.bf16.mxu1 %v4310_v42  ;;  %v4558_v30 = vadd.f32 %v3007_v52, %v3006_v21 }
 0x106   : > { %v3076_v61 = vpop.f32.mrf.mxu1  ;;  %v3009_v12 = vpop.f32.mrf.mxu0 }
 0x107   : > { %v4556_v23 = vadd.f32 %v3076_v61, %v3075_v19  ;;  %1965 = vmatmul.mubr.bf16.gmra.mxu0 %v4416_v49 }
 0x108   : > { %v3078_v53 = vpop.f32.mrf.mxu1  ;;  %3463 = vmatprep.mubr.bf16.mxu0 %v4203_v44  ;;  %v3010_v20 = vpop.f32.mrf.mxu0 }
 0x109   : > { %v4565_v22 = vadd.f32 %v3010_v20, %v3009_v12 }
 0x10a   : > { %v3079_v33 = vpop.f32.mrf.mxu1  ;;  %v3012_v42 = vpop.f32.mrf.mxu0 }
 0x10b   : > { %v4561_v43 = vadd.f32 %v3079_v33, %v3078_v53 }
 0x10c   : > { %v3081_v34 = vpop.f32.mrf.mxu1  ;;  %2062 = vmatmul.mubr.bf16.gmra.mxu1 %v4349_v35  ;;  %v3013_v7 = vpop.f32.mrf.mxu0 }
 0x10d   : > { %2069 = vmatprep.mubr.bf16.mxu1 %v4355_v55  ;;  %v4570_v37 = vadd.f32 %v3013_v7, %v3012_v42 }
 0x10e   : > { %v3082_v3 = vpop.f32.mrf.mxu1  ;;  %v3015_v5 = vpop.f32.mrf.mxu0 }
 0x10f   : > { %v4568_v15 = vadd.f32 %v3082_v3, %v3081_v34  ;;  %3464 = vmatmul.mubr.bf16.vlgmr.msra.gmra.mxu0 %v4270_v14 }
 0x110   : > { %v3084_v10 = vpop.f32.mrf.mxu1  ;;  %3467 = vmatprep.mubr.bf16.mxu0 %v4319_v48  ;;  %v3016_v35 = vpop.f32.mrf.mxu0 }
 0x111   : > { %v4577_v55 = vadd.f32 %v3016_v35, %v3015_v5 }
 0x112   : > { %v3085_v44 = vpop.f32.mrf.mxu1  ;;  %v3018_v4 = vpop.f32.mrf.mxu0 }
 0x113   : > { %v4574_v0 = vadd.f32 %v3085_v44, %v3084_v10 }
 0x114   : > { %v3103_v6 = vpop.f32.mrf.mxu1  ;;  %2070 = vmatmul.mubr.bf16.gmra.mxu1 %v4377_v17  ;;  %v3019_v56 = vpop.f32.mrf.mxu0 }
 0x115   : > { %2077 = vmatprep.mubr.bf16.mxu1 %v4381_v32  ;;  %v4580_v21 = vadd.f32 %v3019_v56, %v3018_v4 }
 0x116   : > { %v3104_v2 = vpop.f32.mrf.mxu1 }
 0x117   : > { %v3105_v19 = vadd.f32 %v3104_v2, %v3103_v6  ;;  %v3021_v48 = vpop.f32.mrf.mxu0  ;;  %3468 = vmatmul.mubr.bf16.gmra.mxu0 %v4364_v13 }
 0x118   : > { %v3106_v61 = vpop.f32.mrf.mxu1  ;;  %3471 = vmatprep.mubr.bf16.mxu0 %v4383_v63 }
 0x119   : > { %v4583_v14 = vadd.f32 %v3105_v19, %v4519_v11  ;;  %v3022_v52 = vpop.f32.mrf.mxu0 }
 0x11a   : > { %v3107_v53 = vpop.f32.mrf.mxu1  ;;  %v4588_v32 = vadd.f32 %v3022_v52, %v3021_v48 }
 0x11b   : > { %v3108_v17 = vadd.f32 %v3107_v53, %v3106_v61  ;;  %v3024_v20 = vpop.f32.mrf.mxu0 }
 0x11c   : > { %v3109_v33 = vpop.f32.mrf.mxu1  ;;  %2078 = vmatmul.mubr.bf16.gmra.mxu1 %v4399_v46 }
 0x11d   : > { %v4591_v12 = vadd.f32 %v3108_v17, %v4524_v8  ;;  %2085 = vmatprep.mubr.bf16.mxu1 %v5053_v26  ;;  %v3025_v42 = vpop.f32.mrf.mxu0 }
 0x11e   : > { %v3110_v11 = vpop.f32.mrf.mxu1  ;;  %v4594_v3 = vadd.f32 %v3025_v42, %v3024_v20 }
 0x11f   : > { %v3111_v34 = vadd.f32 %v3110_v11, %v3109_v33  ;;  %v3027_v7 = vpop.f32.mrf.mxu0  ;;  %3472 = vmatmul.mubr.bf16.gmra.mxu0 %v4407_v38 }
 0x120   : > { %v3112_v13 = vpop.f32.mrf.mxu1  ;;  %3475 = vmatprep.mubr.bf16.mxu0 %v4425_v31 }
 0x121   : > { %v4597_v63 = vadd.f32 %v3111_v34, %v4539_v1  ;;  %v3028_v10 = vpop.f32.mrf.mxu0 }
 0x122   : > { %v3113_v46 = vpop.f32.mrf.mxu1  ;;  %v4602_v26 = vadd.f32 %v3028_v10, %v3027_v7 }
 0x123   : > { %v3114_v8 = vadd.f32 %v3113_v46, %v3112_v13  ;;  %v3030_v35 = vpop.f32.mrf.mxu0 }
 0x124   : > { %v3115_v5 = vpop.f32.mrf.mxu1  ;;  %2086 = vmatmul.mubr.bf16.gmra.mxu1 %v3822_v16 }
 0x125   : > { %v4605_v44 = vadd.f32 %v3114_v8, %v4546_v40  ;;  %2093 = vmatprep.mubr.bf16.mxu1 %v5054_v29  ;;  %v3031_v4 = vpop.f32.mrf.mxu0 }
 0x126   : > { %v3116_v1 = vpop.f32.mrf.mxu1  ;;  %v4608_v2 = vadd.f32 %v3031_v4, %v3030_v35 }
 0x127   : > { %v3117_v6 = vadd.f32 %v3116_v1, %v3115_v5  ;;  %v3033_v19 = vpop.f32.mrf.mxu0  ;;  %3476 = vmatmul.mubr.bf16.gmra.mxu0 %v4443_v58 }
 0x128   : > { %v3118_v38 = vpop.f32.mrf.mxu1  ;;  %3479 = vmatprep.mubr.bf16.mxu0 %v4460_v62 }
 0x129   : > { %v4611_v31 = vadd.f32 %v3117_v6, %v4553_v54  ;;  %v3034_v56 = vpop.f32.mrf.mxu0 }
 0x12a   : > { %v3119_v16 = vpop.f32.mrf.mxu1  ;;  %v4616_v29 = vadd.f32 %v3034_v56, %v3033_v19 }
 0x12b   : > { %v3120_v40 = vadd.f32 %v3119_v16, %v3118_v38  ;;  %v3036_v53 = vpop.f32.mrf.mxu0 }
 0x12c   : > { %v3121_v61 = vpop.f32.mrf.mxu1  ;;  %2094 = vmatmul.mubr.bf16.gmra.mxu1 %v3884_v60 }
 0x12d   : > { %v4619_v48 = vadd.f32 %v3120_v40, %v4558_v30  ;;  %2101 = vmatprep.mubr.bf16.mxu1 %v5055_v9  ;;  %v3037_v52 = vpop.f32.mrf.mxu0 }
 0x12e   : > { %v3122_v54 = vpop.f32.mrf.mxu1  ;;  %v4622_v33 = vadd.f32 %v3037_v52, %v3036_v53 }
 0x12f   : > { %v3123_v17 = vadd.f32 %v3122_v54, %v3121_v61  ;;  %v3039_v20 = vpop.f32.mrf.mxu0  ;;  %3480 = vmatmul.mubr.bf16.gmra.mxu0 %v4477_v25  ;;  %v551_v25 = vld [vmem:[#allocation2 + $0x1a8] sm:$0x3] }
 0x130   : > { %v3124_v58 = vpop.f32.mrf.mxu1  ;;  %3483 = vmatprep.mubr.bf16.mxu0 %v4294_v39  ;;  %v849_v1 = vrot.slane %v551_v25, 1 }
 0x131   : > { %v4625_v62 = vadd.f32 %v3123_v17, %v4565_v22  ;;  %v3040_v11 = vpop.f32.mrf.mxu0 }
 0x132   : > { %v3125_v60 = vpop.f32.mrf.mxu1  ;;  %v4630_v9 = vadd.f32 %v3040_v11, %v3039_v20 }
 0x133   : > { %v3126_v30 = vadd.f32 %v3125_v60, %v3124_v58  ;;  %v3042_v13 = vpop.f32.mrf.mxu0 }
 0x134   : > { %v3127_v34 = vpop.f32.mrf.mxu1  ;;  %2102 = vmatmul.mubr.bf16.gmra.mxu1 %v5048_v47 }
 0x135   : > { %v4633_v42 = vadd.f32 %v3126_v30, %v4570_v37  ;;  %2109 = vmatprep.mubr.bf16.mxu1 %v5056_v27  ;;  %v3043_v46 = vpop.f32.mrf.mxu0  ;;  %v3594_v37 = vld [vmem:[#allocation2] sm:$0xff] }
 0x136   : > { %v3128_v22 = vpop.f32.mrf.mxu1  ;;  %v4636_v10 = vadd.f32 %v3043_v46, %v3042_v13  ;;  %v846_v35 = vrot.slane %v3594_v37, 1  ;;  %v853_v40 = vrot.slane %v3594_v37, 2  ;;  %v911_v46 = vpack.c.bf16 %v3594_v37, %v3594_v37 }
 0x137   : > { %v3129_v7 = vadd.f32 %v3128_v22, %v3127_v34  ;;  %v3045_v5 = vpop.f32.mrf.mxu0  ;;  %3484 = vmatmul.mubr.bf16.gmra.mxu0 %v4326_v45 }
 0x138   : > { %v3130_v8 = vpop.f32.mrf.mxu1  ;;  %3487 = vmatprep.mubr.bf16.mxu0 %v4351_v36  ;;  %v850_v16 = vsel %vm600_vm0, %v846_v35, %v849_v1  ;;  %v856_v36 = vrot.slane %v551_v25, 2 }
 0x139   : > { %v4639_v39 = vadd.f32 %v3129_v7, %v4577_v55  ;;  %v3046_v6 = vpop.f32.mrf.mxu0 }
 0x13a   : > { %v3131_v47 = vpop.f32.mrf.mxu1  ;;  %v4644_v38 = vadd.f32 %v3046_v6, %v3045_v5 }
 0x13b   : > { %v3132_v27 = vadd.f32 %v3131_v47, %v3130_v8  ;;  %v3048_v55 = vpop.f32.mrf.mxu0 }
 0x13c   : > { %v3133_v4 = vpop.f32.mrf.mxu1  ;;  %2110 = vmatmul.mubr.bf16.gmra.mxu1 %v5049_v57 }
 0x13d   : > { %v4647_v19 = vadd.f32 %v3132_v27, %v4580_v21  ;;  %2117 = vmatprep.mubr.bf16.mxu1 %v4416_v49  ;;  %v3049_v61 = vpop.f32.mrf.mxu0  ;;  %v912_v21 = vpack.c.bf16 %v850_v16, %v846_v35  ;;  %v857_v49 = vsel %vm713_vm1, %v853_v40, %v856_v36 }
 0x13e   : > { %v3134_v45 = vpop.f32.mrf.mxu1  ;;  %v4651_v54 = vadd.f32 %v3049_v61, %v3048_v55  ;;  %v913_v34 = vpack.c.bf16 %v857_v49, %v853_v40 }
 0x13f   : > { %v3135_v56 = vadd.f32 %v3134_v45, %v3133_v4  ;;  %v3051_v17 = vpop.f32.mrf.mxu0  ;;  %3488 = vmatmul.mubr.bf16.gmra.mxu0 %v4359_v24 }
 0x140   : > { %v3136_v53 = vpop.f32.mrf.mxu1  ;;  %3491 = vmatprep.mubr.bf16.mxu0 %v4544_v50 }
 0x141   : > { %v4654_v57 = vadd.f32 %v3135_v56, %v4588_v32  ;;  %v3052_v20 = vpop.f32.mrf.mxu0 }
 0x142   : > { %v3137_v52 = vpop.f32.mrf.mxu1  ;;  %v4660_v30 = vadd.f32 %v3052_v20, %v3051_v17 }
 0x143   : > { %v3138_v58 = vadd.f32 %v3137_v52, %v3136_v53  ;;  %v3054_v32 = vpop.f32.mrf.mxu0 }
 0x144   : > { %v3139_v60 = vpop.f32.mrf.mxu1  ;;  %2118 = vmatmul.mubr.bf16.gmra.mxu1 %v4494_v51 }
 0x145   : > { %v4663_v11 = vadd.f32 %v3138_v58, %v4594_v3  ;;  %2125 = vmatprep.mubr.bf16.mxu1 %v912_v21  ;;  %v3055_v22 = vpop.f32.mrf.mxu0 }
 0x146   : > { %v3140_v24 = vpop.f32.mrf.mxu1  ;;  %v4665_v50 = vadd.f32 %v3055_v22, %v3054_v32 }
 0x147   : > { %v3141_v13 = vadd.f32 %v3140_v24, %v3139_v60  ;;  %v3057_v8 = vpop.f32.mrf.mxu0  ;;  %3492 = vmatmul.mubr.bf16.gmra.mxu0 %v913_v34 }
 0x148   : > { %v3142_v7 = vpop.f32.mrf.mxu1 }
 0x149   : > { %v4668_v25 = vadd.f32 %v3141_v13, %v4602_v26  ;;  %v3058_v47 = vpop.f32.mrf.mxu0 }
 0x14a   : > { %v3143_v51 = vpop.f32.mrf.mxu1  ;;  %v4670_v35 = vadd.f32 %v3058_v47, %v3057_v8 }
 0x14b   : > { %v3144_v5 = vadd.f32 %v3143_v51, %v3142_v7  ;;  %v3060_v27 = vpop.f32.mrf.mxu0 }
 0x14c   : > { %v3145_v3 = vpop.f32.mrf.mxu1  ;;  %2126 = vmatmul.mubr.bf16.gmra.mxu1 %v911_v46 }
 0x14d   : > { %v4673_v1 = vadd.f32 %v3144_v5, %v4608_v2  ;;  %v3061_v55 = vpop.f32.mrf.mxu0 }
 0x14e   : > { %v3146_v6 = vpop.f32.mrf.mxu1  ;;  %v4675_v45 = vadd.f32 %v3061_v55, %v3060_v27 }
 0x14f   : > { %v3147_v4 = vadd.f32 %v3146_v6, %v3145_v3  ;;  %v3215_v16 = vpop.f32.mrf.mxu0 }
 0x150   : > { %v3148_v37 = vpop.f32.mrf.mxu1 }
 0x151   : > { %v4678_v26 = vadd.f32 %v3147_v4, %v4616_v29  ;;  %v3216_v56 = vpop.f32.mrf.mxu0 }
 0x152   : > { %v3149_v36 = vpop.f32.mrf.mxu1  ;;  %v3217_v53 = vadd.f32 %v3216_v56, %v3215_v16 }
 0x153   : > { %v3150_v40 = vadd.f32 %v3149_v36, %v3148_v37  ;;  %v3218_v2 = vpop.f32.mrf.mxu0 }
 0x154   : > { %v3151_v61 = vpop.f32.mrf.mxu1  ;;  %v4684_v52 = vadd.f32 %v3217_v53, %v4583_v14 }
 0x155   : > { %v4681_v17 = vadd.f32 %v3150_v40, %v4622_v33  ;;  %v3219_v58 = vpop.f32.mrf.mxu0 }
 0x156   : > { %v3152_v21 = vpop.f32.mrf.mxu1  ;;  %v3220_v60 = vadd.f32 %v3219_v58, %v3218_v2 }
 0x157   : > { %v3153_v49 = vadd.f32 %v3152_v21, %v3151_v61  ;;  %v3221_v32 = vpop.f32.mrf.mxu0 }
 0x158   : > { %v3154_v20 = vpop.f32.mrf.mxu1  ;;  %v4690_v24 = vadd.f32 %v3220_v60, %v4591_v12 }
 0x159   : > { %v4687_v29 = vadd.f32 %v3153_v49, %v4630_v9  ;;  %v3222_v33 = vpop.f32.mrf.mxu0 }
 0x15a   : > { %v3155_v34 = vpop.f32.mrf.mxu1  ;;  %v3223_v7 = vadd.f32 %v3222_v33, %v3221_v32 }
 0x15b   : > { %v3156_v13 = vadd.f32 %v3155_v34, %v3154_v20  ;;  %v3224_v14 = vpop.f32.mrf.mxu0 }
 0x15c   : > { %v3157_v22 = vpop.f32.mrf.mxu1  ;;  %v4696_v51 = vadd.f32 %v3223_v7, %v4597_v63 }
 0x15d   : > { %v4693_v46 = vadd.f32 %v3156_v13, %v4636_v10  ;;  %v3225_v9 = vpop.f32.mrf.mxu0 }
 0x15e   : > { %v3158_v8 = vpop.f32.mrf.mxu1  ;;  %v3226_v3 = vadd.f32 %v3225_v9, %v3224_v14 }
 0x15f   : > { %v3159_v5 = vadd.f32 %v3158_v8, %v3157_v22  ;;  %v3227_v12 = vpop.f32.mrf.mxu0 }
 0x160   : > { %v3160_v47 = vpop.f32.mrf.mxu1  ;;  %v4702_v4 = vadd.f32 %v3226_v3, %v4605_v44 }
 0x161   : > { %v4699_v27 = vadd.f32 %v3159_v5, %v4644_v38  ;;  %v3228_v10 = vpop.f32.mrf.mxu0 }
 0x162   : > { %v3161_v6 = vpop.f32.mrf.mxu1  ;;  %v3229_v16 = vadd.f32 %v3228_v10, %v3227_v12 }
 0x163   : > { %v3162_v55 = vadd.f32 %v3161_v6, %v3160_v47  ;;  %v3230_v63 = vpop.f32.mrf.mxu0 }
 0x164   : > { %v3163_v37 = vpop.f32.mrf.mxu1  ;;  %v4708_v56 = vadd.f32 %v3229_v16, %v4611_v31 }
 0x165   : > { %v4705_v36 = vadd.f32 %v3162_v55, %v4651_v54  ;;  %v3231_v38 = vpop.f32.mrf.mxu0 }
 0x166   : > { %v3164_v40 = vpop.f32.mrf.mxu1  ;;  %v3232_v2 = vadd.f32 %v3231_v38, %v3230_v63 }
 0x167   : > { %v3165_v61 = vadd.f32 %v3164_v40, %v3163_v37  ;;  %v3233_v44 = vpop.f32.mrf.mxu0 }
 0x168   : > { %v3166_v53 = vpop.f32.mrf.mxu1  ;;  %v4714_v58 = vadd.f32 %v3232_v2, %v4619_v48 }
 0x169   : > { %v4711_v21 = vadd.f32 %v3165_v61, %v4660_v30  ;;  %v3234_v54 = vpop.f32.mrf.mxu0 }
 0x16a   : > { %v3167_v49 = vpop.f32.mrf.mxu1  ;;  %v3235_v32 = vadd.f32 %v3234_v54, %v3233_v44 }
 0x16b   : > { %v3168_v20 = vadd.f32 %v3167_v49, %v3166_v53  ;;  %v3236_v31 = vpop.f32.mrf.mxu0 }
 0x16c   : > { %v3169_v60 = vpop.f32.mrf.mxu1  ;;  %v4720_v33 = vadd.f32 %v3235_v32, %v4625_v62 }
 0x16d   : > { %v4717_v34 = vadd.f32 %v3168_v20, %v4665_v50  ;;  %v3237_v30 = vpop.f32.mrf.mxu0 }
 0x16e   : > { %v3170_v13 = vpop.f32.mrf.mxu1  ;;  %v3238_v14 = vadd.f32 %v3237_v30, %v3236_v31 }
 0x16f   : > { %v3171_v22 = vadd.f32 %v3170_v13, %v3169_v60  ;;  %v3239_v48 = vpop.f32.mrf.mxu0 }
 0x170   : > { %v3172_v7 = vpop.f32.mrf.mxu1  ;;  %v4726_v9 = vadd.f32 %v3238_v14, %v4633_v42 }
 0x171   : > { %v4723_v8 = vadd.f32 %v3171_v22, %v4670_v35  ;;  %v3240_v50 = vpop.f32.mrf.mxu0 }
 0x172   : > { %v3173_v5 = vpop.f32.mrf.mxu1  ;;  %v3241_v12 = vadd.f32 %v3240_v50, %v3239_v48 }
 0x173   : > { %v3174_v47 = vadd.f32 %v3173_v5, %v3172_v7  ;;  %v3242_v62 = vpop.f32.mrf.mxu0 }
 0x174   : > { %v3175_v3 = vpop.f32.mrf.mxu1  ;;  %v4732_v10 = vadd.f32 %v3241_v12, %v4639_v39 }
 0x175   : > { %v4729_v6 = vadd.f32 %v3174_v47, %v4675_v45  ;;  %v3243_v35 = vpop.f32.mrf.mxu0 }
 0x176   : > { %v3176_v55 = vpop.f32.mrf.mxu1  ;;  %v3244_v63 = vadd.f32 %v3243_v35, %v3242_v62 }
 0x177   : > { %v3177_v37 = vadd.f32 %v3176_v55, %v3175_v3  ;;  %v3245_v42 = vpop.f32.mrf.mxu0 }
 0x178   : > { %v3178_v16 = vpop.f32.mrf.mxu1  ;;  %v4738_v38 = vadd.f32 %v3244_v63, %v4647_v19 }
 0x179   : > { %v4735_v40 = vadd.f32 %v3177_v37, %v4527_v59  ;;  %v3246_v45 = vpop.f32.mrf.mxu0 }
 0x17a   : > { %v3179_v61 = vpop.f32.mrf.mxu1  ;;  %v3247_v44 = vadd.f32 %v3246_v45, %v3245_v42 }
 0x17b   : > { %v3180_v53 = vadd.f32 %v3179_v61, %v3178_v16  ;;  %v3248_v39 = vpop.f32.mrf.mxu0 }
 0x17c   : > { %v3181_v2 = vpop.f32.mrf.mxu1  ;;  %v4744_v54 = vadd.f32 %v3247_v44, %v4654_v57 }
 0x17d   : > { %v4741_v49 = vadd.f32 %v3180_v53, %v4533_v18  ;;  %v3249_v59 = vpop.f32.mrf.mxu0 }
 0x17e   : > { %v3182_v20 = vpop.f32.mrf.mxu1  ;;  %v3250_v31 = vadd.f32 %v3249_v59, %v3248_v39 }
 0x17f   : > { %v3183_v60 = vadd.f32 %v3182_v20, %v3181_v2  ;;  %v3251_v19 = vpop.f32.mrf.mxu0 }
 0x180   : > { %v3184_v32 = vpop.f32.mrf.mxu1  ;;  %v4750_v30 = vadd.f32 %v3250_v31, %v4663_v11 }
 0x181   : > { %v4747_v13 = vadd.f32 %v3183_v60, %v4542_v28  ;;  %v3252_v18 = vpop.f32.mrf.mxu0 }
 0x182   : > { %v3185_v22 = vpop.f32.mrf.mxu1  ;;  %v3253_v48 = vadd.f32 %v3252_v18, %v3251_v19 }
 0x183   : > { %v3186_v7 = vadd.f32 %v3185_v22, %v3184_v32  ;;  %v3254_v57 = vpop.f32.mrf.mxu0 }
 0x184   : > { %v3187_v14 = vpop.f32.mrf.mxu1  ;;  %v4756_v50 = vadd.f32 %v3253_v48, %v4668_v25 }
 0x185   : > { %v4753_v5 = vadd.f32 %v3186_v7, %v4549_v41  ;;  %v3255_v28 = vpop.f32.mrf.mxu0 }
 0x186   : > { %v3188_v47 = vpop.f32.mrf.mxu1  ;;  %v3256_v62 = vadd.f32 %v3255_v28, %v3254_v57 }
 0x187   : > { %v3189_v3 = vadd.f32 %v3188_v47, %v3187_v14  ;;  %v3257_v11 = vpop.f32.mrf.mxu0 }
 0x188   : > { %v3190_v12 = vpop.f32.mrf.mxu1  ;;  %v4762_v35 = vadd.f32 %v3256_v62, %v4673_v1 }
 0x189   : > { %v4759_v55 = vadd.f32 %v3189_v3, %v4556_v23  ;;  %v3258_v41 = vpop.f32.mrf.mxu0 }
 0x18a   : > { %v3191_v37 = vpop.f32.mrf.mxu1  ;;  %v3259_v42 = vadd.f32 %v3258_v41, %v3257_v11 }
 0x18b   : > { %v3192_v16 = vadd.f32 %v3191_v37, %v3190_v12  ;;  %v3260_v25 = vpop.f32.mrf.mxu0 }
 0x18c   : > { %v3193_v63 = vpop.f32.mrf.mxu1  ;;  %v4768_v45 = vadd.f32 %v3259_v42, %v4678_v26 }
 0x18d   : > { %v4765_v61 = vadd.f32 %v3192_v16, %v4561_v43  ;;  %v3261_v23 = vpop.f32.mrf.mxu0 }
 0x18e   : > { %v3194_v53 = vpop.f32.mrf.mxu1  ;;  %v3262_v39 = vadd.f32 %v3261_v23, %v3260_v25 }
 0x18f   : > { %v3195_v2 = vadd.f32 %v3194_v53, %v3193_v63  ;;  %v3263_v1 = vpop.f32.mrf.mxu0 }
 0x190   : > { %v3196_v44 = vpop.f32.mrf.mxu1  ;;  %v4774_v59 = vadd.f32 %v3262_v39, %v4681_v17 }
 0x191   : > { %v4771_v20 = vadd.f32 %v3195_v2, %v4568_v15  ;;  %v3264_v43 = vpop.f32.mrf.mxu0 }
 0x192   : > { %v3197_v60 = vpop.f32.mrf.mxu1  ;;  %v3265_v19 = vadd.f32 %v3264_v43, %v3263_v1 }
 0x193   : > { %v3198_v32 = vadd.f32 %v3197_v60, %v3196_v44  ;;  %v3266_v22 = vpop.f32.mrf.mxu0 }
 0x194   : > { %v4776_v31 = vpop.f32.mrf.mxu1  ;;  %v4782_v7 = vadd.f32 %v3265_v19, %v4687_v29 }
 0x195   : > { %v4779_v26 = vadd.f32 %v3198_v32, %v4574_v0  ;;  %v3267_v15 = vpop.f32.mrf.mxu0 }
 0x196   : > { %v4784_v18 = vpop.f32.mrf.mxu1  ;;  %v3268_v48 = vadd.f32 %v3267_v15, %v3266_v22 }
 0x197   : > { %v3269_v17 = vpop.f32.mrf.mxu0 }
 0x198   : > { %v4786_v14 = vpop.f32.mrf.mxu1  ;;  %v4789_v57 = vadd.f32 %v3268_v48, %v4693_v46 }
 0x199   : > { %v3270_v3 = vpop.f32.mrf.mxu0 }
 0x19a   : > { %v4791_v47 = vpop.f32.mrf.mxu1  ;;  %v3271_v0 = vadd.f32 %v3270_v3, %v3269_v17 }
 0x19b   : > { %v3272_v12 = vpop.f32.mrf.mxu0 }
 0x19c   : > { %v4793_v28 = vpop.f32.mrf.mxu1  ;;  %v4796_v29 = vadd.f32 %v3271_v0, %v4699_v27 }
 0x19d   : > { %v3273_v11 = vpop.f32.mrf.mxu0 }
 0x19e   : > { %v4798_v62 = vpop.f32.mrf.mxu1  ;;  %v3274_v16 = vadd.f32 %v3273_v11, %v3272_v12 }
 0x19f   : > { %v3275_v41 = vpop.f32.mrf.mxu0 }
 0x1a0   : > { %v4800_v37 = vpop.f32.mrf.mxu1  ;;  %v4803_v46 = vadd.f32 %v3274_v16, %v4705_v36 }
 0x1a1   : > { %v3276_v42 = vpop.f32.mrf.mxu0 }
 0x1a2   : > { %v4805_v63 = vpop.f32.mrf.mxu1  ;;  %v3277_v53 = vadd.f32 %v3276_v42, %v3275_v41 }
 0x1a3   : > { %v3278_v2 = vpop.f32.mrf.mxu0 }
 0x1a4   : > { %v4807_v25 = vpop.f32.mrf.mxu1  ;;  %v4810_v27 = vadd.f32 %v3277_v53, %v4711_v21 }
 0x1a5   : > { %v3279_v44 = vpop.f32.mrf.mxu0 }
 0x1a6   : > { %v4812_v23 = vpop.f32.mrf.mxu1  ;;  %v3280_v1 = vadd.f32 %v3279_v44, %v3278_v2 }
 0x1a7   : > { %v3281_v60 = vpop.f32.mrf.mxu0 }
 0x1a8   : > { %v4814_v39 = vpop.f32.mrf.mxu1  ;;  %v4817_v36 = vadd.f32 %v3280_v1, %v4717_v34 }
 0x1a9   : > { %v3282_v43 = vpop.f32.mrf.mxu0 }
 0x1aa   : > { %5057 = vst [vmem:[#allocation7_spill] sm:$0xff] %v4817_v36  ;;  %v4819_v32 = vpop.f32.mrf.mxu1  ;;  %v3283_v22 = vadd.f32 %v3282_v43, %v3281_v60 }
 0x1ab   : > { %v3284_v15 = vpop.f32.mrf.mxu0 }
 0x1ac   : > { %v4821_v19 = vpop.f32.mrf.mxu1  ;;  %v4824_v21 = vadd.f32 %v3283_v22, %v4723_v8 }
 0x1ad   : > { %v3285_v17 = vpop.f32.mrf.mxu0 }
 0x1ae   : > { %5058 = vst [vmem:[#allocation9_spill] sm:$0xff] %v4824_v21  ;;  %v4826_v48 = vpop.f32.mrf.mxu1  ;;  %v3286_v0 = vadd.f32 %v3285_v17, %v3284_v15 }
 0x1af   : > { %v3287_v12 = vpop.f32.mrf.mxu0 }
 0x1b0   : > { %v4828_v3 = vpop.f32.mrf.mxu1  ;;  %v4831_v34 = vadd.f32 %v3286_v0, %v4729_v6 }
 0x1b1   : > { %v3288_v16 = vpop.f32.mrf.mxu0 }
 0x1b2   : > { %5059 = vst [vmem:[#allocation5_spill] sm:$0xff] %v4831_v34  ;;  %v4833_v11 = vpop.f32.mrf.mxu1  ;;  %v3289_v42 = vadd.f32 %v3288_v16, %v3287_v12 }
 0x1b3   : > { %v3290_v53 = vpop.f32.mrf.mxu0 }
 0x1b4   : > { %v4835_v41 = vpop.f32.mrf.mxu1  ;;  %v4838_v8 = vadd.f32 %v3289_v42, %v4735_v40 }
 0x1b5   : > { %v3291_v44 = vpop.f32.mrf.mxu0 }
 0x1b6   : > { %5060 = vst [vmem:[#allocation8_spill] sm:$0xff] %v4838_v8  ;;  %v4840_v2 = vpop.f32.mrf.mxu1  ;;  %v3292_v60 = vadd.f32 %v3291_v44, %v3290_v53 }
 0x1b7   : > { %v3293_v43 = vpop.f32.mrf.mxu0 }
 0x1b8   : > { %v4842_v1 = vpop.f32.mrf.mxu1  ;;  %v4845_v6 = vadd.f32 %v3292_v60, %v4741_v49 }
 0x1b9   : > { %v3294_v15 = vpop.f32.mrf.mxu0 }
 0x1ba   : > { %5061 = vst [vmem:[#allocation11_spill] sm:$0xff] %v4845_v6  ;;  %v4847_v22 = vpop.f32.mrf.mxu1  ;;  %v3295_v0 = vadd.f32 %v3294_v15, %v3293_v43 }
 0x1bb   : > { %v3296_v12 = vpop.f32.mrf.mxu0 }
 0x1bc   : > { %v4849_v17 = vpop.f32.mrf.mxu1  ;;  %v4852_v40 = vadd.f32 %v3295_v0, %v4747_v13 }
 0x1bd   : > { %v3297_v42 = vpop.f32.mrf.mxu0 }
 0x1be   : > { %5062 = vst [vmem:[#allocation3_spill] sm:$0xff] %v4852_v40  ;;  %v4854_v16 = vpop.f32.mrf.mxu1  ;;  %v3298_v53 = vadd.f32 %v3297_v42, %v3296_v12 }
 0x1bf   : > { %v3299_v44 = vpop.f32.mrf.mxu0 }
 0x1c0   : > { %v4856_v8 = vpop.f32.mrf.mxu1  ;;  %v4859_v49 = vadd.f32 %v3298_v53, %v4753_v5 }
 0x1c1   : > { %v3300_v6 = vpop.f32.mrf.mxu0 }
 0x1c2   : > { %5063 = vst [vmem:[#allocation4_spill] sm:$0xff] %v4859_v49  ;;  %v4861_v60 = vpop.f32.mrf.mxu1  ;;  %v3301_v43 = vadd.f32 %v3300_v6, %v3299_v44 }
 0x1c3   : > { %v3302_v15 = vpop.f32.mrf.mxu0 }
 0x1c4   : > { %v4863_v36 = vpop.f32.mrf.mxu1  ;;  %v4866_v13 = vadd.f32 %v3301_v43, %v4759_v55 }
 0x1c5   : > { %v3303_v40 = vpop.f32.mrf.mxu0 }
 0x1c6   : > { %5064 = vst [vmem:[#allocation6_spill] sm:$0xff] %v4866_v13  ;;  %v4868_v0 = vpop.f32.mrf.mxu1  ;;  %v3304_v12 = vadd.f32 %v3303_v40, %v3302_v15  ;;  %v3329_v40 = vadd.f32 %v4784_v18, %v4776_v31  ;;  %v3338_v15 = vadd.f32 %v4805_v63, %v4800_v37  ;;  %v3341_v63 = vadd.f32 %v4812_v23, %v4807_v25 }
 0x1c7   : > { %v3305_v42 = vpop.f32.mrf.mxu0 }
 0x1c8   : > { %v4870_v34 = vpop.f32.mrf.mxu1  ;;  %v4873_v5 = vadd.f32 %v3304_v12, %v4765_v61  ;;  %v3335_v61 = vadd.f32 %v4798_v62, %v4793_v28  ;;  %v2008_v62 = vadd.f32 %v3329_v40, %v4684_v52  ;;  %v2019_v37 = vadd.f32 %v3338_v15, %v4702_v4 }
 0x1c9   : > { %v3306_v49 = vpop.f32.mrf.mxu0  ;;  %v2024_v40 = vadd.f32 %v3341_v63, %v4708_v56  ;;  %v3344_v15 = vadd.f32 %v4819_v32, %v4814_v39  ;;  %v3362_v32 = vadd.f32 %v4861_v60, %v4856_v8 }
 0x1ca   : > { %5065 = vst [vmem:[#allocation10_spill] sm:$0xff] %v4873_v5  ;;  %v4875_v53 = vpop.f32.mrf.mxu1  ;;  %v3307_v6 = vadd.f32 %v3306_v49, %v3305_v42  ;;  %v2016_v28 = vadd.f32 %v3335_v61, %v4696_v51  ;;  %v3350_v51 = vadd.f32 %v4833_v11, %v4828_v3 }
 0x1cb   : > { %v3308_v44 = vpop.f32.mrf.mxu0 }
 0x1cc   : > { %v4877_v21 = vpop.f32.mrf.mxu1  ;;  %v4880_v55 = vadd.f32 %v3307_v6, %v4771_v20  ;;  %v3332_v20 = vadd.f32 %v4791_v47, %v4786_v14 }
 0x1cd   : > { %v3309_v13 = vpop.f32.mrf.mxu0 }
 0x1ce   : > { %v4882_v43 = vpop.f32.mrf.mxu1  ;;  %v3310_v5 = vadd.f32 %v3309_v13, %v3308_v44  ;;  %v2011_v44 = vadd.f32 %v3332_v20, %v4690_v24 }
 0x1cf   : > { %v3465_v49 = vpop.f32.mrf.mxu0 }
 0x1d0   : > { %v4890_v12 = vpop.f32.mrf.mxu1  ;;  %v4895_v42 = vadd.f32 %v3310_v5, %v4779_v26  ;;  %v2177_v14 = vadd.f32 %v3465_v49, %v2016_v28 }
 0x1d1   : > { %v2168_v31 = vpop.f32.mrf.mxu0 }
 0x1d2   : > { %5066 = vst [vmem:[#allocation12_spill] sm:$0xff] %v4895_v42  ;;  %v4897_v6 = vpop.f32.mrf.mxu1  ;;  %v2169_v26 = vadd.f32 %v2168_v31, %v2008_v62  ;;  %v3347_v42 = vadd.f32 %v4826_v48, %v4821_v19  ;;  %v2035_v31 = vadd.f32 %v3350_v51, %v4726_v9  ;;  %v2495_v28 = vmul.f32 %v2177_v14, %v2177_v14 }
 0x1d3   : > { %v3466_v13 = vpop.f32.mrf.mxu0  ;;  %v3359_v9 = vadd.f32 %v4854_v16, %v4849_v17 }
 0x1d4   : > { %v4899_v18 = vpop.f32.mrf.mxu1  ;;  %v2180_v5 = vadd.f32 %v3466_v13, %v2019_v37  ;;  %v2493_v19 = vmul.f32 %v2169_v26, %v2169_v26  ;;  %v2032_v49 = vadd.f32 %v3347_v42, %v4720_v33  ;;  %v3353_v33 = vadd.f32 %v4840_v2, %v4835_v41 }
 0x1d5   : > { %v2171_v52 = vpop.f32.mrf.mxu0  ;;  %v2027_v42 = vadd.f32 %v3344_v15, %v4714_v58  ;;  %v3356_v41 = vadd.f32 %v4847_v22, %v4842_v1 }
 0x1d6   : > { %v4906_v47 = vpop.f32.mrf.mxu1  ;;  %v2873_v25 = vpack.c.bf16 %v2180_v5, %v2177_v14  ;;  %v2172_v23 = vadd.f32 %v2171_v52, %v2011_v44  ;;  %v2496_v13 = vmul.f32 %v2180_v5, %v2180_v5  ;;  %v2040_v58 = vadd.f32 %v3353_v33, %v4732_v10 }
 0x1d7   : > { %v3469_v24 = vpop.f32.mrf.mxu0  ;;  %v3365_v10 = vadd.f32 %v4868_v0, %v4863_v36  ;;  %v3374_v33 = vadd.f32 %v4897_v6, %v4890_v12  ;;  %v3368_v36 = vadd.f32 %v4875_v53, %v4870_v34 }
 0x1d8   : > { %v4920_v4 = vpop.f32.mrf.mxu1  ;;  %2960 = vst [vmem:[%s4918_s28 + $0x8] sm:$0xff] %v2873_v25   ;;  %v2868_v3 = vpack.c.bf16 %v2172_v23, %v2169_v26  ;;  %v2455_v11 = vadd.f32 %v2172_v23, %v2169_v26  ;;  %v2494_v61 = vmul.f32 %v2172_v23, %v2172_v23  ;;  %v2193_v26 = vadd.f32 %v3469_v24, %v2032_v49 }
 0x1d9   : > { %v2184_v20 = vpop.f32.mrf.mxu0  ;;  %v2048_v49 = vadd.f32 %v3359_v9, %v4744_v54  ;;  %v2056_v12 = vadd.f32 %v3365_v10, %v4756_v50  ;;  %v3377_v50 = vadd.f32 %v4906_v47, %v4899_v18 }
 0x1da   : > { %v4924_v48 = vpop.f32.mrf.mxu1  ;;  %2869 = vst [vmem:[%s4918_s28] sm:$0xff] %v2868_v3   ;;  %v2456_v62 = vadd.f32 %v2455_v11, %v2177_v14  ;;  %v2525_v37 = vadd.f32 %v2494_v61, %v2493_v19  ;;  %v2185_v63 = vadd.f32 %v2184_v20, %v2024_v40  ;;  %v2051_v20 = vadd.f32 %v3362_v32, %v4750_v30 }
 0x1db   : > { %v3470_v44 = vpop.f32.mrf.mxu0  ;;  %v3380_v18 = vadd.f32 %v4924_v48, %v4920_v4 }
 0x1dc   : > { %v4931_v56 = vpop.f32.mrf.mxu1  ;;  %v2526_v52 = vadd.f32 %v2525_v37, %v2495_v28  ;;  %v2457_v23 = vadd.f32 %v2456_v62, %v2180_v5  ;;  %v2196_v39 = vadd.f32 %v3470_v44, %v2035_v31  ;;  %v2497_v40 = vmul.f32 %v2185_v63, %v2185_v63 }
 0x1dd   : > { %v2187_v14 = vpop.f32.mrf.mxu0  ;;  %v2499_v31 = vmul.f32 %v2193_v26, %v2193_v26  ;;  %v2043_v44 = vadd.f32 %v3356_v41, %v4738_v38 }
 0x1de   : > { %v4933_v25 = vpop.f32.mrf.mxu1  ;;  %v2458_v51 = vadd.f32 %v2457_v23, %v2185_v63  ;;  %v2527_v24 = vadd.f32 %v2526_v52, %v2496_v13  ;;  %v2883_v5 = vpack.c.bf16 %v2196_v39, %v2193_v26  ;;  %v2188_v3 = vadd.f32 %v2187_v14, %v2027_v42 }
 0x1df   : > { %v3473_v11 = vpop.f32.mrf.mxu0  ;;  %v2500_v52 = vmul.f32 %v2196_v39, %v2196_v39 }
 0x1e0   : > { %v4942_v19 = vpop.f32.mrf.mxu1  ;;  %v2528_v2 = vadd.f32 %v2527_v24, %v2497_v40  ;;  %2962 = vst [vmem:[%s4918_s28 + $0x18] sm:$0xff] %v2883_v5   ;;  %v2878_v16 = vpack.c.bf16 %v2188_v3, %v2185_v63  ;;  %v2459_v8 = vadd.f32 %v2458_v51, %v2188_v3  ;;  %v2498_v60 = vmul.f32 %v2188_v3, %v2188_v3 }
 0x1e1   : > { %v2200_v61 = vpop.f32.mrf.mxu0  ;;  %v2209_v37 = vadd.f32 %v3473_v11, %v2048_v49  ;;  %v2067_v11 = vadd.f32 %v3374_v33, %v4774_v59  ;;  %v3383_v59 = vadd.f32 %v4933_v25, %v4931_v56  ;;  %v2072_v56 = vadd.f32 %v3377_v50, %v4782_v7 }
 0x1e2   : > { %v3385_v17 = vpop.f32.mrf.mxu1  ;;  %2961 = vst [vmem:[%s4918_s28 + $0x10] sm:$0xff] %v2878_v16   ;;  %v2460_v28 = vadd.f32 %v2459_v8, %v2193_v26  ;;  %v2529_v62 = vadd.f32 %v2528_v2, %v2498_v60  ;;  %v2201_v1 = vadd.f32 %v2200_v61, %v2040_v58  ;;  %v3371_v26 = vadd.f32 %v4882_v43, %v4877_v21 }
 0x1e3   : > { %v3474_v22 = vpop.f32.mrf.mxu0  ;;  %v2503_v41 = vmul.f32 %v2209_v37, %v2209_v37  ;;  %v2059_v61 = vadd.f32 %v3368_v36, %v4762_v35 }
 0x1e4   : > { %v4948_v15 = vpop.f32.mrf.mxu1  ;;  %v2212_v63 = vadd.f32 %v3474_v22, %v2051_v20  ;;  %v2530_v54 = vadd.f32 %v2529_v62, %v2499_v31  ;;  %v2461_v23 = vadd.f32 %v2460_v28, %v2196_v39  ;;  %v2501_v14 = vmul.f32 %v2201_v1, %v2201_v1 }
 0x1e5   : > { %v2203_v30 = vpop.f32.mrf.mxu0  ;;  %v2064_v3 = vadd.f32 %v3371_v26, %v4768_v45  ;;  %v3386_v28 = vadd.f32 %v3385_v17, %v4942_v19  ;;  %v2080_v17 = vadd.f32 %v3383_v59, %v4796_v29 }
 0x1e6   : > { %v4953_v13 = vpop.f32.mrf.mxu1  ;;  %v2893_v32 = vpack.c.bf16 %v2212_v63, %v2209_v37  ;;  %v2204_v42 = vadd.f32 %v2203_v30, %v2043_v44  ;;  %v2462_v38 = vadd.f32 %v2461_v23, %v2201_v1  ;;  %v2531_v51 = vadd.f32 %v2530_v54, %v2500_v52 }
 0x1e7   : > { %v3477_v40 = vpop.f32.mrf.mxu0  ;;  %v2504_v49 = vmul.f32 %v2212_v63, %v2212_v63  ;;  %v2083_v30 = vadd.f32 %v3386_v28, %v4803_v46  ;;  %v3389_v7 = vadd.f32 %v4953_v13, %v4948_v15 }
 0x1e8   : > { %v4962_v9 = vpop.f32.mrf.mxu1  ;;  %2964 = vst [vmem:[%s4918_s28 + $0x28] sm:$0xff] %v2893_v32   ;;  %v2888_v39 = vpack.c.bf16 %v2204_v42, %v2201_v1  ;;  %v2502_v21 = vmul.f32 %v2204_v42, %v2204_v42  ;;  %v2532_v43 = vadd.f32 %v2531_v51, %v2501_v14  ;;  %v2463_v24 = vadd.f32 %v2462_v38, %v2204_v42 }
 0x1e9   : > { %v2216_v6 = vpop.f32.mrf.mxu0  ;;  %v2225_v8 = vadd.f32 %v3477_v40, %v2064_v3  ;;  %v2075_v51 = vadd.f32 %v3380_v18, %v4789_v57 }
 0x1ea   : > { %v4967_v0 = vpop.f32.mrf.mxu1  ;;  %2963 = vst [vmem:[%s4918_s28 + $0x20] sm:$0xff] %v2888_v39   ;;  %v2464_v2 = vadd.f32 %v2463_v24, %v2209_v37  ;;  %v2533_v16 = vadd.f32 %v2532_v43, %v2502_v21  ;;  %v2217_v34 = vadd.f32 %v2216_v6, %v2056_v12 }
 0x1eb   : > { %v3478_v53 = vpop.f32.mrf.mxu0  ;;  %v2507_v26 = vmul.f32 %v2225_v8, %v2225_v8  ;;  %v3392_v57 = vadd.f32 %v4967_v0, %v4962_v9 }
 0x1ec   : > { %v3393_v5 = vpop.f32.mrf.mxu1  ;;  %v2228_v58 = vadd.f32 %v3478_v53, %v2067_v11  ;;  %v2534_v20 = vadd.f32 %v2533_v16, %v2503_v41  ;;  %v2465_v31 = vadd.f32 %v2464_v2, %v2212_v63  ;;  %v2505_v44 = vmul.f32 %v2217_v34, %v2217_v34 }
 0x1ed   : > { %v2219_v45 = vpop.f32.mrf.mxu0 }
 0x1ee   : > { %v3394_v60 = vpop.f32.mrf.mxu1  ;;  %v2903_v1 = vpack.c.bf16 %v2228_v58, %v2225_v8  ;;  %v2220_v22 = vadd.f32 %v2219_v45, %v2059_v61  ;;  %v2466_v37 = vadd.f32 %v2465_v31, %v2217_v34  ;;  %v2535_v35 = vadd.f32 %v2534_v20, %v2504_v49  ;;  %v5068_v61 = vld [vmem:[#allocation5_spill] sm:$0xff] }
 0x1ef   : > { %v3481_v10 = vpop.f32.mrf.mxu0  ;;  %v2508_v40 = vmul.f32 %v2228_v58, %v2228_v58  ;;  %v3395_v21 = vadd.f32 %v3394_v60, %v3393_v5  ;;  %v2088_v5 = vadd.f32 %v3389_v7, %v4810_v27  ;;  %v5067_v60 = vld [vmem:[#allocation9_spill] sm:$0xff] }
 0x1f0   : > { %v3396_v62 = vpop.f32.mrf.mxu1  ;;  %2966 = vst [vmem:[%s4918_s28 + $0x38] sm:$0xff] %v2903_v1   ;;  %v2898_v63 = vpack.c.bf16 %v2220_v22, %v2217_v34  ;;  %v2506_v52 = vmul.f32 %v2220_v22, %v2220_v22  ;;  %v2536_v54 = vadd.f32 %v2535_v35, %v2505_v44  ;;  %v2467_v23 = vadd.f32 %v2466_v37, %v2220_v22 }
 0x1f1   : > { %v2232_v25 = vpop.f32.mrf.mxu0  ;;  %v2241_v48 = vadd.f32 %v3481_v10, %v2080_v17 }
 0x1f2   : > { %v3397_v47 = vpop.f32.mrf.mxu1  ;;  %2965 = vst [vmem:[%s4918_s28 + $0x30] sm:$0xff] %v2898_v63   ;;  %v2468_v33 = vadd.f32 %v2467_v23, %v2225_v8  ;;  %v2537_v32 = vadd.f32 %v2536_v54, %v2506_v52  ;;  %v2233_v42 = vadd.f32 %v2232_v25, %v2072_v56 }
 0x1f3   : > { %v3482_v4 = vpop.f32.mrf.mxu0  ;;  %v3398_v46 = vadd.f32 %v3397_v47, %v3396_v62  ;;  %v2511_v49 = vmul.f32 %v2241_v48, %v2241_v48  ;;  %v5069_v62 = vld [vmem:[#allocation7_spill] sm:$0xff] }
 0x1f4   : > { %v3399_v19 = vpop.f32.mrf.mxu1  ;;  %v2244_v14 = vadd.f32 %v3482_v4, %v2083_v30  ;;  %v2538_v36 = vadd.f32 %v2537_v32, %v2507_v26  ;;  %v2469_v39 = vadd.f32 %v2468_v33, %v2228_v58  ;;  %v2509_v3 = vmul.f32 %v2233_v42, %v2233_v42 }
 0x1f5   : > { %v2235_v29 = vpop.f32.mrf.mxu0  ;;  %v2096_v58 = vadd.f32 %v3395_v21, %v5067_v60  ;;  %v2099_v50 = vadd.f32 %v3398_v46, %v5068_v61  ;;  %v2091_v1 = vadd.f32 %v3392_v57, %v5069_v62 }
 0x1f6   : > { %v3400_v38 = vpop.f32.mrf.mxu1  ;;  %v2913_v24 = vpack.c.bf16 %v2244_v14, %v2241_v48  ;;  %v2236_v12 = vadd.f32 %v2235_v29, %v2075_v51  ;;  %v2470_v6 = vadd.f32 %v2469_v39, %v2233_v42  ;;  %v2539_v11 = vadd.f32 %v2538_v36, %v2508_v40  ;;  %v5071_v51 = vld [vmem:[#allocation3_spill] sm:$0xff]  ;;  %v5072_v29 = vld [vmem:[#allocation4_spill] sm:$0xff] }
 0x1f7   : > { %v3485_v41 = vpop.f32.mrf.mxu0  ;;  %v3401_v22 = vadd.f32 %v3400_v38, %v3399_v19  ;;  %v2512_v27 = vmul.f32 %v2244_v14, %v2244_v14 }
 0x1f8   : > { %v3402_v43 = vpop.f32.mrf.mxu1  ;;  %2968 = vst [vmem:[%s4918_s28 + $0x48] sm:$0xff] %v2913_v24   ;;  %v2908_v15 = vpack.c.bf16 %v2236_v12, %v2233_v42  ;;  %v2510_v13 = vmul.f32 %v2236_v12, %v2236_v12  ;;  %v2540_v16 = vadd.f32 %v2539_v11, %v2509_v3  ;;  %v2471_v34 = vadd.f32 %v2470_v6, %v2236_v12  ;;  %v5070_v42 = vld [vmem:[#allocation8_spill] sm:$0xff]  ;;  %v5073_v6 = vld [vmem:[#allocation11_spill] sm:$0xff] }
 0x1f9   : > { %v2248_v53 = vpop.f32.mrf.mxu0  ;;  %v2257_v0 = vadd.f32 %v3485_v41, %v2096_v58  ;;  %v2104_v4 = vadd.f32 %v3401_v22, %v5070_v42 }
 0x1fa   : > { %v3403_v2 = vpop.f32.mrf.mxu1  ;;  %2967 = vst [vmem:[%s4918_s28 + $0x40] sm:$0xff] %v2908_v15   ;;  %v2472_v20 = vadd.f32 %v2471_v34, %v2241_v48  ;;  %v2541_v31 = vadd.f32 %v2540_v16, %v2510_v13  ;;  %v2249_v45 = vadd.f32 %v2248_v53, %v2088_v5 }
 0x1fb   : > { %v3486_v9 = vpop.f32.mrf.mxu0  ;;  %v3404_v25 = vadd.f32 %v3403_v2, %v3402_v43  ;;  %v2515_v38 = vmul.f32 %v2257_v0, %v2257_v0 }
 0x1fc   : > { %v3405_v8 = vpop.f32.mrf.mxu1  ;;  %v2260_v28 = vadd.f32 %v3486_v9, %v2099_v50  ;;  %v2542_v37 = vadd.f32 %v2541_v31, %v2511_v49  ;;  %v2473_v44 = vadd.f32 %v2472_v20, %v2244_v14  ;;  %v2513_v54 = vmul.f32 %v2249_v45, %v2249_v45 }
 0x1fd   : > { %v2251_v35 = vpop.f32.mrf.mxu0  ;;  %v2107_v3 = vadd.f32 %v3404_v25, %v5073_v6 }
 0x1fe   : > { %v3406_v59 = vpop.f32.mrf.mxu1  ;;  %v2923_v47 = vpack.c.bf16 %v2260_v28, %v2257_v0  ;;  %v2252_v63 = vadd.f32 %v2251_v35, %v2091_v1  ;;  %v2474_v52 = vadd.f32 %v2473_v44, %v2249_v45  ;;  %v2543_v23 = vadd.f32 %v2542_v37, %v2512_v27  ;;  %v5075_v44 = vld [vmem:[#allocation10_spill] sm:$0xff] }
 0x1ff   : > { %v3407_v10 = vadd.f32 %v3406_v59, %v3405_v8  ;;  %v3489_v56 = vpop.f32.mrf.mxu0  ;;  %v2516_v43 = vmul.f32 %v2260_v28, %v2260_v28 }
 0x200   : > { %v3408_v18 = vpop.f32.mrf.mxu1  ;;  %2970 = vst [vmem:[%s4918_s28 + $0x58] sm:$0xff] %v2923_v47   ;;  %v2918_v30 = vpack.c.bf16 %v2252_v63, %v2249_v45  ;;  %v2514_v26 = vmul.f32 %v2252_v63, %v2252_v63  ;;  %v2544_v33 = vadd.f32 %v2543_v23, %v2513_v54  ;;  %v2475_v32 = vadd.f32 %v2474_v52, %v2252_v63  ;;  %v5074_v45 = vld [vmem:[#allocation6_spill] sm:$0xff] }
 0x201   : > { %v2264_v48 = vpop.f32.mrf.mxu0  ;;  %v2112_v7 = vadd.f32 %v3407_v10, %v5071_v51 }
 0x202   : > { %v3409_v17 = vpop.f32.mrf.mxu1  ;;  %2969 = vst [vmem:[%s4918_s28 + $0x50] sm:$0xff] %v2918_v30   ;;  %v2476_v40 = vadd.f32 %v2475_v32, %v2257_v0  ;;  %v2545_v36 = vadd.f32 %v2544_v33, %v2514_v26  ;;  %v2265_v39 = vadd.f32 %v2264_v48, %v2104_v4 }
 0x203   : > { %v3410_v19 = vadd.f32 %v3409_v17, %v3408_v18  ;;  %v3490_v46 = vpop.f32.mrf.mxu0  ;;  %v2273_v24 = vadd.f32 %v3489_v56, %v2112_v7 }
 0x204   : > { %v3411_v14 = vpop.f32.mrf.mxu1  ;;  %v2546_v11 = vadd.f32 %v2545_v36, %v2515_v38  ;;  %v2477_v57 = vadd.f32 %v2476_v40, %v2260_v28  ;;  %v2517_v5 = vmul.f32 %v2265_v39, %v2265_v39 }
 0x205   : > { %v2115_v21 = vadd.f32 %v3410_v19, %v5072_v29  ;;  %v2267_v15 = vpop.f32.mrf.mxu0  ;;  %v2519_v28 = vmul.f32 %v2273_v24, %v2273_v24 }
 0x206   : > { %v3412_v12 = vpop.f32.mrf.mxu1  ;;  %v2268_v16 = vadd.f32 %v2267_v15, %v2107_v3  ;;  %v2478_v34 = vadd.f32 %v2477_v57, %v2265_v39  ;;  %v2547_v53 = vadd.f32 %v2546_v11, %v2516_v43 }
 0x207   : > { %v3413_v41 = vadd.f32 %v3412_v12, %v3411_v14  ;;  %v2276_v2 = vadd.f32 %v3490_v46, %v2115_v21  ;;  %v3493_v60 = vpop.f32.mrf.mxu0  ;;  %v5076_v14 = vld [vmem:[#allocation12_spill] sm:$0xff] }
 0x208   : > { %v3414_v13 = vpop.f32.mrf.mxu1  ;;  %v2928_v61 = vpack.c.bf16 %v2268_v16, %v2265_v39  ;;  %v2518_v50 = vmul.f32 %v2268_v16, %v2268_v16  ;;  %v2548_v49 = vadd.f32 %v2547_v53, %v2517_v5  ;;  %v2479_v31 = vadd.f32 %v2478_v34, %v2268_v16 }
 0x209   : > { %v2933_v8 = vpack.c.bf16 %v2276_v2, %v2273_v24  ;;  %v2120_v9 = vadd.f32 %v3413_v41, %v5074_v45  ;;  %v2280_v0 = vpop.f32.mrf.mxu0  ;;  %v2520_v10 = vmul.f32 %v2276_v2, %v2276_v2 }
 0x20a   : > { %v3415_v58 = vpop.f32.mrf.mxu1  ;;  %2971 = vst [vmem:[%s4918_s28 + $0x60] sm:$0xff] %v2928_v61   ;;  %v2480_v62 = vadd.f32 %v2479_v31, %v2273_v24  ;;  %v2549_v1 = vadd.f32 %v2548_v49, %v2518_v50 }
 0x20b   : > { %2972 = vst [vmem:[%s4918_s28 + $0x68] sm:$0xff] %v2933_v8   ;;  %v3416_v20 = vadd.f32 %v3415_v58, %v3414_v13  ;;  %v2281_v22 = vadd.f32 %v2280_v0, %v2120_v9  ;;  %v3494_v27 = vpop.f32.mrf.mxu0 }
 0x20c   : > { %v3417_v59 = vpop.f32.mrf.mxu1  ;;  %v2550_v18 = vadd.f32 %v2549_v1, %v2519_v28  ;;  %v2481_v63 = vadd.f32 %v2480_v62, %v2276_v2 }
 0x20d   : > { %v2123_v35 = vadd.f32 %v3416_v20, %v5075_v44  ;;  %v2283_v52 = vpop.f32.mrf.mxu0  ;;  %v2521_v17 = vmul.f32 %v2281_v22, %v2281_v22 }
 0x20e   : > { %v3418_v37 = vpop.f32.mrf.mxu1  ;;  %v2482_v25 = vadd.f32 %v2481_v63, %v2281_v22  ;;  %v2551_v30 = vadd.f32 %v2550_v18, %v2520_v10 }
 0x20f   : > { %v3419_v47 = vadd.f32 %v3418_v37, %v3417_v59  ;;  %v2284_v23 = vadd.f32 %v2283_v52, %v2123_v35 }
 0x210   : > { %v3420_v54 = vpop.f32.mrf.mxu1  ;;  %v2552_v42 = vadd.f32 %v2551_v30, %v2521_v17 }
 0x211   : > { %v2128_v56 = vadd.f32 %v3419_v47, %v4880_v55  ;;  %v2938_v33 = vpack.c.bf16 %v2284_v23, %v2281_v22  ;;  %v2522_v19 = vmul.f32 %v2284_v23, %v2284_v23  ;;  %v2483_v48 = vadd.f32 %v2482_v25, %v2284_v23 }
 0x212   : > { %v3421_v26 = vpop.f32.mrf.mxu1 }
 0x213   : > { %v2289_v32 = vadd.f32 %v3493_v60, %v2128_v56  ;;  %v3422_v4 = vadd.f32 %v3421_v26, %v3420_v54  ;;  %2973 = vst [vmem:[%s4918_s28 + $0x70] sm:$0xff] %v2938_v33   ;;  %v2553_v40 = vadd.f32 %v2552_v42, %v2522_v19 }
 0x215   : > { %v2523_v38 = vmul.f32 %v2289_v32, %v2289_v32  ;;  %v2131_v51 = vadd.f32 %v3422_v4, %v5076_v14  ;;  %v2484_v7 = vadd.f32 %v2483_v48, %v2289_v32 }
 0x217   : > { %v2292_v36 = vadd.f32 %v3494_v27, %v2131_v51  ;;  %v2554_v55 = vadd.f32 %v2553_v40, %v2523_v38 }
 0x219   : > { %v2943_v39 = vpack.c.bf16 %v2292_v36, %v2289_v32  ;;  %v2524_v29 = vmul.f32 %v2292_v36, %v2292_v36  ;;  %v2485_v21 = vadd.f32 %v2484_v7, %v2292_v36 }
 0x21b   : > { %2974 = vst [vmem:[%s4918_s28 + $0x78] sm:$0xff] %v2943_v39   ;;  %v2486_v46 = vrot.slane %v2485_v21, 4  ;;  %v2555_v43 = vadd.f32 %v2554_v55, %v2524_v29 }
 0x21d   : > { %v2487_v24 = vadd.f32 %v2486_v46, %v2485_v21  ;;  %v2556_v12 = vrot.slane %v2555_v43, 4 }
 0x21f   : > { %v2488_v6 = vrot.slane %v2487_v24, 2  ;;  %v2557_v3 = vadd.f32 %v2556_v12, %v2555_v43 }
 0x221   : > { %v2489_v11 = vadd.f32 %v2488_v6, %v2487_v24  ;;  %v2558_v41 = vrot.slane %v2557_v3, 2 }
 0x223   : > { %v2490_v57 = vrot.slane %v2489_v11, 1  ;;  %v2559_v2 = vadd.f32 %v2558_v41, %v2557_v3 }
 0x225   : > { %v2491_v15 = vadd.f32 %v2490_v57, %v2489_v11  ;;  %v2560_v13 = vrot.slane %v2559_v2, 1 }
 0x227   : > { %2492 = vst [vmem:[%s235_s6] sm:$0x1] %v2491_v15  ;;  %v2561_v16 = vadd.f32 %v2560_v13, %v2559_v2 }
 0x229   : > { %2562 = vst [vmem:[%s235_s6 + $0x1] sm:$0x1] %v2561_v16 }
 0x22a PF: > { %s16_s18 = sadd.s32 1, %s3601_s18  }
 0x22b   : > { %p13_p4 = scmp.ge.s32.totalorder %s16_s18, 4  }
 0x22d   :  { %15 = sbr.rel (!%p13_p4) target bundleno = 1 (0x1), region = 79 }

</bundles_post_ra>
